<compile_context>
chip_gen: v6e
topology: v6e:2x2x1
jax: 0.10.0
libtpu: 0.0.40
codegen_flags: <defaults>
</compile_context>

<pallas_src>
import functools

import jax
import jax.numpy as jnp
from jax import lax
from jax.experimental import pallas as pl
from jax.experimental.pallas import tpu as pltpu


SEQ_TILE = 128   # sequence tile (L is padded up to a multiple of this)
TM = 128         # dense M tile
TN = 128         # dense N tile
TK = 128         # dense K (contraction) tile


def _round_up(x, m):
    return (x + m - 1) // m * m


# ---------------------------------------------------------------------------
# Pallas kernels
# ---------------------------------------------------------------------------

def _dense_kernel(x_ref, w_ref, b_ref, o_ref, acc_ref, *, activation):
    # Tiled o = act(x @ w + b); K-accumulation in f32 VMEM scratch.
    k = pl.program_id(2)

    @pl.when(k == 0)
    def _():
        acc_ref[...] = jnp.zeros_like(acc_ref)

    acc_ref[...] += jnp.dot(x_ref[...], w_ref[...],
                            preferred_element_type=jnp.float32)

    @pl.when(k == pl.num_programs(2) - 1)
    def _():
        y = acc_ref[...] + b_ref[...]
        if activation == "gelu":
            y = jax.nn.gelu(y, approximate=True)
        o_ref[...] = y.astype(o_ref.dtype)


def pallas_dense(x, w, b, activation=None, out_dtype=jnp.float32):
    M, K = x.shape
    K2, N = w.shape
    assert K == K2 and M % TM == 0 and K % TK == 0 and N % TN == 0
    grid = (M // TM, N // TN, K // TK)
    return pl.pallas_call(
        functools.partial(_dense_kernel, activation=activation),
        out_shape=jax.ShapeDtypeStruct((M, N), out_dtype),
        grid=grid,
        in_specs=[
            pl.BlockSpec((TM, TK), lambda i, j, k: (i, k)),
            pl.BlockSpec((TK, TN), lambda i, j, k: (k, j)),
            pl.BlockSpec((1, TN), lambda i, j, k: (0, j)),
        ],
        out_specs=pl.BlockSpec((TM, TN), lambda i, j, k: (i, j)),
        scratch_shapes=[pltpu.VMEM((TM, TN), jnp.float32)],
        compiler_params=pltpu.CompilerParams(
            dimension_semantics=("parallel", "parallel", "arbitrary")),
    )(x.astype(jnp.bfloat16), w.astype(jnp.bfloat16),
      b.reshape(1, N).astype(jnp.float32))


def _dense_res_ln_kernel(x_ref, w_ref, b_ref, res_ref, g_ref, bt_ref,
                         o_ref, acc_ref, *, eps):
    # Tiled y = LayerNorm(x @ w + b + residual); LN fused into the epilogue.
    k = pl.program_id(1)

    @pl.when(k == 0)
    def _():
        acc_ref[...] = jnp.zeros_like(acc_ref)

    acc_ref[...] += jnp.dot(x_ref[...], w_ref[...],
                            preferred_element_type=jnp.float32)

    @pl.when(k == pl.num_programs(1) - 1)
    def _():
        y = acc_ref[...] + b_ref[...] + res_ref[...]
        mu = jnp.mean(y, axis=-1, keepdims=True)
        var = jnp.mean((y - mu) ** 2, axis=-1, keepdims=True)
        o_ref[...] = ((y - mu) * lax.rsqrt(var + eps) * g_ref[...] + bt_ref[...]
                      ).astype(o_ref.dtype)


def pallas_dense_res_ln(x, w, b, res, gamma, beta, eps=1e-12):
    # LayerNorm epilogue needs the full feature dim in one N tile.
    M, K = x.shape
    K2, N = w.shape
    assert K == K2 and M % TM == 0 and K % TK == 0 and N % 128 == 0
    grid = (M // TM, K // TK)
    return pl.pallas_call(
        functools.partial(_dense_res_ln_kernel, eps=eps),
        out_shape=jax.ShapeDtypeStruct((M, N), jnp.float32),
        grid=grid,
        in_specs=[
            pl.BlockSpec((TM, TK), lambda i, k: (i, k)),
            pl.BlockSpec((TK, N), lambda i, k: (k, 0)),
            pl.BlockSpec((1, N), lambda i, k: (0, 0)),
            pl.BlockSpec((TM, N), lambda i, k: (i, 0)),
            pl.BlockSpec((1, N), lambda i, k: (0, 0)),
            pl.BlockSpec((1, N), lambda i, k: (0, 0)),
        ],
        out_specs=pl.BlockSpec((TM, N), lambda i, k: (i, 0)),
        scratch_shapes=[pltpu.VMEM((TM, N), jnp.float32)],
        compiler_params=pltpu.CompilerParams(
            dimension_semantics=("parallel", "arbitrary")),
    )(x.astype(jnp.bfloat16), w.astype(jnp.bfloat16),
      b.reshape(1, N).astype(jnp.float32), res.astype(jnp.float32),
      gamma.reshape(1, N).astype(jnp.float32),
      beta.reshape(1, N).astype(jnp.float32))


def _flash_attn_kernel(mask_ref, q_ref, k_ref, v_ref, o_ref,
                       m_sc, l_sc, acc_sc, *, scale):
    # Online-softmax attention over kv tiles; key mask built in-kernel from a
    # (1, 1, TKV) slice of the (B, 1, L) padding mask.
    ki = pl.program_id(3)

    @pl.when(ki == 0)
    def _():
        m_sc[...] = jnp.full_like(m_sc[...], -1e30)
        l_sc[...] = jnp.zeros_like(l_sc[...])
        acc_sc[...] = jnp.zeros_like(acc_sc[...])

    q = q_ref[0, 0]                       # (TQ, D) bf16
    k = k_ref[0, 0]                       # (TKV, D) bf16
    s = lax.dot_general(q, k, (((1,), (1,)), ((), ())),
                        preferred_element_type=jnp.float32) * scale
    s = s + (1.0 - mask_ref[0]) * (-10000.0)   # BERT extended attention mask

    m_prev = m_sc[...]
    m_new = jnp.maximum(m_prev, jnp.max(s, axis=-1, keepdims=True))
    alpha = jnp.exp(m_prev - m_new)
    p = jnp.exp(s - m_new)
    l_sc[...] = alpha * l_sc[...] + jnp.sum(p, axis=-1, keepdims=True)
    acc_sc[...] = alpha * acc_sc[...] + jnp.dot(
        p.astype(v_ref.dtype), v_ref[0, 0], preferred_element_type=jnp.float32)
    m_sc[...] = m_new

    @pl.when(ki == pl.num_programs(3) - 1)
    def _():
        o_ref[0, 0] = (acc_sc[...] * pl.reciprocal(l_sc[...], approx=True)
                       ).astype(o_ref.dtype)


def pallas_flash_attention(q, k, v, mask_row, scale):
    # q, k, v: (B, nH, L, D) bf16; mask_row: (B, 1, L) f32. Returns bf16 ctx.
    B, nH, L, D = q.shape
    TQ = TKV = SEQ_TILE
    assert L % TQ == 0
    grid = (B, nH, L // TQ, L // TKV)
    return pl.pallas_call(
        functools.partial(_flash_attn_kernel, scale=scale),
        out_shape=jax.ShapeDtypeStruct((B, nH, L, D), jnp.bfloat16),
        grid=grid,
        in_specs=[
            pl.BlockSpec((1, 1, TKV), lambda b, h, qi, ki: (b, 0, ki)),
            pl.BlockSpec((1, 1, TQ, D), lambda b, h, qi, ki: (b, h, qi, 0)),
            pl.BlockSpec((1, 1, TKV, D), lambda b, h, qi, ki: (b, h, ki, 0)),
            pl.BlockSpec((1, 1, TKV, D), lambda b, h, qi, ki: (b, h, ki, 0)),
        ],
        out_specs=pl.BlockSpec((1, 1, TQ, D), lambda b, h, qi, ki: (b, h, qi, 0)),
        scratch_shapes=[
            pltpu.VMEM((TQ, 1), jnp.float32),
            pltpu.VMEM((TQ, 1), jnp.float32),
            pltpu.VMEM((TQ, D), jnp.float32),
        ],
        compiler_params=pltpu.CompilerParams(
            dimension_semantics=("parallel", "parallel", "parallel", "arbitrary")),
    )(mask_row, q, k, v)


def _gp_kernel(qm_ref, km_ref, q_ref, k_ref, o_ref, *, scale, tril, tq, tkv):
    # GlobalPointer tile scoring with in-kernel pad/tril mask construction.
    s = lax.dot_general(q_ref[0, 0], k_ref[0, 0], (((1,), (1,)), ((), ())),
                        preferred_element_type=jnp.float32) * scale
    pad = qm_ref[0] * km_ref[0]                 # (TQ,1) * (1,TKV) -> (TQ,TKV)
    s = s * pad - (1.0 - pad) * 1e12
    if tril:
        row = lax.broadcasted_iota(jnp.int32, (tq, tkv), 0) + pl.program_id(2) * tq
        col = lax.broadcasted_iota(jnp.int32, (tq, tkv), 1) + pl.program_id(3) * tkv
        s = s - (row > col).astype(jnp.float32) * 1e12
    o_ref[0, 0] = s


def pallas_gp_scores(qw, kw, mask_col, mask_row, scale, tril):
    # qw, kw: (B, heads, L, D) bf16; masks: (B, L, 1) / (B, 1, L) f32.
    B, heads, L, D = qw.shape
    TQ = TKV = SEQ_TILE
    assert L % TQ == 0
    grid = (B, heads, L // TQ, L // TKV)
    return pl.pallas_call(
        functools.partial(_gp_kernel, scale=scale, tril=tril, tq=TQ, tkv=TKV),
        out_shape=jax.ShapeDtypeStruct((B, heads, L, L), jnp.float32),
        grid=grid,
        in_specs=[
            pl.BlockSpec((1, TQ, 1), lambda b, h, qi, ki: (b, qi, 0)),
            pl.BlockSpec((1, 1, TKV), lambda b, h, qi, ki: (b, 0, ki)),
            pl.BlockSpec((1, 1, TQ, D), lambda b, h, qi, ki: (b, h, qi, 0)),
            pl.BlockSpec((1, 1, TKV, D), lambda b, h, qi, ki: (b, h, ki, 0)),
        ],
        out_specs=pl.BlockSpec((1, 1, TQ, TKV), lambda b, h, qi, ki: (b, h, qi, ki)),
        compiler_params=pltpu.CompilerParams(
            dimension_semantics=("parallel", "parallel", "parallel", "parallel")),
    )(mask_col, mask_row, qw, kw)


# ---------------------------------------------------------------------------
# JAX glue (embeddings, RoPE, head reshapes)
# ---------------------------------------------------------------------------

def layer_norm(x, gamma, beta, eps=1e-12):
    mu = jnp.mean(x, axis=-1, keepdims=True)
    var = jnp.mean((x - mu) ** 2, axis=-1, keepdims=True)
    return (x - mu) * lax.rsqrt(var + eps) * gamma + beta


def sinusoidal_rope(x):
    # x: (B, L, heads, D) — interleaved RoPE exactly as in GlobalPointer.
    B, L, H, D = x.shape
    pos = jnp.arange(L, dtype=jnp.float32)[:, None]
    idx = jnp.arange(D // 2, dtype=jnp.float32)
    theta = jnp.power(10000.0, -2.0 * idx / D)
    ang = pos * theta
    sin = jnp.repeat(jnp.sin(ang), 2, axis=-1)[None, :, None, :]
    cos = jnp.repeat(jnp.cos(ang), 2, axis=-1)[None, :, None, :]
    x2 = jnp.stack([-x[..., 1::2], x[..., 0::2]], axis=-1).reshape(x.shape)
    return x * cos + x2 * sin


def bert_encoder(params, tok, msk, typ, cfg):
    B, LP = tok.shape
    H, nH, dh = cfg["hidden"], cfg["num_heads"], cfg["head_dim"]
    assert LP <= params["pos_emb"].shape[0]

    emb = (params["word_emb"][tok]
           + params["pos_emb"][jnp.arange(LP)][None]
           + params["type_emb"][typ])
    h = layer_norm(emb, params["emb_ln_g"], params["emb_ln_b"])  # (B, LP, H) f32

    mask_row = msk[:, None, :]          # (B, 1, LP) — only per-key vector in HBM

    for layer in params["layers"]:
        # Fused QKV projection: one (H, 3H) matmul, bf16 output for the MXU.
        qkv = pallas_dense(h.reshape(B * LP, H), layer["w_qkv"], layer["b_qkv"],
                           out_dtype=jnp.bfloat16)
        qkv = qkv.reshape(B, LP, 3, nH, dh).transpose(2, 0, 3, 1, 4)
        q, k, v = qkv[0], qkv[1], qkv[2]                      # (B, nH, LP, dh)

        ctx = pallas_flash_attention(q, k, v, mask_row, 1.0 / (dh ** 0.5))
        ctx = ctx.transpose(0, 2, 1, 3).reshape(B * LP, H)

        # Output projection + residual + LayerNorm fused.
        h = pallas_dense_res_ln(ctx, layer["wo"], layer["bo"],
                                h.reshape(B * LP, H),
                                layer["ln1_g"], layer["ln1_b"]).reshape(B, LP, H)

        # FFN: matmul + bias + GELU fused, then matmul + residual + LN fused.
        ffn = pallas_dense(h.reshape(B * LP, H), layer["w1"], layer["b1"],
                           activation="gelu", out_dtype=jnp.bfloat16)
        h = pallas_dense_res_ln(ffn, layer["w2"], layer["b2"],
                                h.reshape(B * LP, H),
                                layer["ln2_g"], layer["ln2_b"]).reshape(B, LP, H)
    return h  # last_hidden_state, (B, LP, H)


def global_pointer_heads(params, hidden, msk, cfg):
    B, LP, H = hidden.shape
    inner = cfg["inner_dim"]
    ent, rels = cfg["ent_type_size"], cfg["num_rels"]
    heads_total = ent + 2 * rels
    scale = 1.0 / (inner ** 0.5)

    # All three head projections fused into one (H, heads_total*2*inner) matmul.
    proj = pallas_dense(hidden.reshape(B * LP, H), params["gp"]["w"],
                        params["gp"]["b"], out_dtype=jnp.bfloat16)
    proj = proj.reshape(B, LP, heads_total, 2 * inner)
    qw, kw = proj[..., :inner], proj[..., inner:]

    # mention_detect head: RoPE on qw/kw (host-side; tiny tensors).
    qw_m = sinusoidal_rope(qw[:, :, :ent].astype(jnp.float32)).astype(jnp.bfloat16)
    kw_m = sinusoidal_rope(kw[:, :, :ent].astype(jnp.float32)).astype(jnp.bfloat16)
    qw_so, kw_so = qw[:, :, ent:], kw[:, :, ent:]

    mask_row = msk[:, None, :]          # (B, 1, LP)
    mask_col = msk[:, :, None]          # (B, LP, 1)

    mention = pallas_gp_scores(qw_m.transpose(0, 2, 1, 3),
                               kw_m.transpose(0, 2, 1, 3),
                               mask_col, mask_row, scale, tril=True)
    # s_o_head and s_o_tail merged into one scoring call over 2*num_rels heads.
    so = pallas_gp_scores(qw_so.transpose(0, 2, 1, 3),
                          kw_so.transpose(0, 2, 1, 3),
                          mask_col, mask_row, scale, tril=False)
    return mention, so


def ere_net_forward(params, batch_token_ids, batch_mask_ids,
                    batch_token_type_ids, cfg):
    B, L = batch_token_ids.shape
    LP = _round_up(L, SEQ_TILE)          # lane-dense sequence padding
    pad = LP - L
    tok = jnp.pad(batch_token_ids, ((0, 0), (0, pad)))
    typ = jnp.pad(batch_token_type_ids, ((0, 0), (0, pad)))
    msk = jnp.pad(batch_mask_ids.astype(jnp.float32), ((0, 0), (0, pad)))

    hidden = bert_encoder(params["encoder"], tok, msk, typ, cfg)
    mention, so = global_pointer_heads(params, hidden, msk, cfg)

    rels = cfg["num_rels"]
    mention_outputs = mention[:, :, :L, :L]
    so_head_outputs = so[:, :rels, :L, :L]
    so_tail_outputs = so[:, rels:, :L, :L]
    return mention_outputs, so_head_outputs, so_tail_outputs


# ---------------------------------------------------------------------------
# Deterministic parameter init (stands in for BertModel.from_pretrained)
# ---------------------------------------------------------------------------

def init_params(key, cfg):
    H, I = cfg["hidden"], cfg["ffn"]
    heads_total = cfg["ent_type_size"] + 2 * cfg["num_rels"]
    n_gp = heads_total * cfg["inner_dim"] * 2

    def norm(k, shape, scale=0.02):
        return scale * jax.random.normal(k, shape, jnp.float32)

    keys = iter(jax.random.split(key, 64))
    enc = dict(
        word_emb=norm(next(keys), (cfg["vocab"], H)),
        pos_emb=norm(next(keys), (cfg["max_pos"], H)),
        type_emb=norm(next(keys), (cfg["type_vocab"], H)),
        emb_ln_g=jnp.ones((H,), jnp.float32),
        emb_ln_b=jnp.zeros((H,), jnp.float32),
        layers=[],
    )
    for _ in range(cfg["num_layers"]):
        enc["layers"].append(dict(
            w_qkv=norm(next(keys), (H, 3 * H)).astype(jnp.bfloat16),
            b_qkv=jnp.zeros((3 * H,), jnp.float32),
            wo=norm(next(keys), (H, H)).astype(jnp.bfloat16),
            bo=jnp.zeros((H,), jnp.float32),
            ln1_g=jnp.ones((H,), jnp.float32), ln1_b=jnp.zeros((H,), jnp.float32),
            w1=norm(next(keys), (H, I)).astype(jnp.bfloat16),
            b1=jnp.zeros((I,), jnp.float32),
            w2=norm(next(keys), (I, H)).astype(jnp.bfloat16),
            b2=jnp.zeros((H,), jnp.float32),
            ln2_g=jnp.ones((H,), jnp.float32), ln2_b=jnp.zeros((H,), jnp.float32),
        ))
    gp = dict(w=norm(next(keys), (H, n_gp)).astype(jnp.bfloat16),
              b=jnp.zeros((n_gp,), jnp.float32))
    return dict(encoder=enc, gp=gp)


# ---------------------------------------------------------------------------
# Main
# ---------------------------------------------------------------------------

if __name__ == "__main__":
    cfg = dict(
        vocab=100, hidden=128, num_layers=2, num_heads=2, head_dim=64,
        ffn=256, max_pos=SEQ_TILE, type_vocab=2,
        ent_type_size=2, num_rels=3, inner_dim=64,
    )
    B, L = 2, 8

    params = init_params(jax.random.PRNGKey(0), cfg)

    k_tok, _ = jax.random.split(jax.random.PRNGKey(0))
    batch_token_ids = jax.random.randint(k_tok, (B, L), 0, cfg["vocab"], jnp.int32)
    batch_token_type_ids = jnp.zeros((B, L), jnp.int32)
    batch_mask_ids = jnp.array(
        [[1, 1, 1, 1, 1, 1, 1, 1],
         [1, 1, 1, 1, 1, 1, 0, 0]], jnp.float32)

    fwd = jax.jit(lambda p, t, m, ty: ere_net_forward(p, t, m, ty, cfg))
    mention, so_head, so_tail = fwd(
        params, batch_token_ids, batch_mask_ids, batch_token_type_ids
    )
    jax.block_until_ready((mention, so_head, so_tail))

    assert mention.shape == (B, cfg["ent_type_size"], L, L)
    assert so_head.shape == (B, cfg["num_rels"], L, L)
    assert so_tail.shape == (B, cfg["num_rels"], L, L)
    assert bool(jnp.all(jnp.isfinite(mention)))
    assert bool(jnp.all(jnp.isfinite(so_head)))
    assert bool(jnp.all(jnp.isfinite(so_tail)))
    print("KERNEL_OK")
</pallas_src>

<mosaic_0001>
module attributes {stable_mosaic.version = 11 : i64} {
  func.func @_dense_kernel(%arg0: i32, %arg1: i32, %arg2: i32, %arg3: memref<128x128xbf16, #tpu.memory_space<vmem>>, %arg4: memref<128x128xbf16, #tpu.memory_space<vmem>>, %arg5: memref<1x128xf32, #tpu.memory_space<vmem>>, %arg6: memref<128x128xbf16, #tpu.memory_space<vmem>>, %arg7: memref<128x128xf32, #tpu.memory_space<vmem>>) attributes {dimension_semantics = [#tpu.dimension_semantics<parallel>, #tpu.dimension_semantics<parallel>, #tpu.dimension_semantics<arbitrary>], iteration_bounds = array<i64: 2, 3, 1>, scalar_prefetch = 0 : i64, scratch_operands = 1 : i64, tpu.core_type = #tpu.core_type<tc>, window_params = [{transform_indices = @transform_0, window_bounds = array<i64: 128, 128>}, {transform_indices = @transform_1, window_bounds = array<i64: 128, 128>}, {transform_indices = @transform_2, window_bounds = array<i64: 1, 128>}, {transform_indices = @transform_3, window_bounds = array<i64: 128, 128>}]} {
    %c0_i32 = arith.constant 0 : i32
    %0 = arith.cmpi eq, %arg2, %c0_i32 : i32
    %1 = arith.extui %0 : i1 to i32
    %c0_i32_0 = arith.constant 0 : i32
    %2 = arith.cmpi ne, %1, %c0_i32_0 : i32
    scf.if %2 {
      %cst_10 = arith.constant 0.000000e+00 : f32
      %12 = vector.broadcast %cst_10 : f32 to vector<128x128xf32>
      %c0_11 = arith.constant 0 : index
      %c0_12 = arith.constant 0 : index
      %13 = vector.load %arg7[%c0_11, %c0_12] : memref<128x128xf32, #tpu.memory_space<vmem>>, vector<128x128xf32>
      tpu.vector_store %arg7[%c0_11, %c0_12], %12 {strides = array<i32>} : memref<128x128xf32, #tpu.memory_space<vmem>>, vector<128x128xf32>,
    } else {
    }
    %c0 = arith.constant 0 : index
    %c0_1 = arith.constant 0 : index
    %3 = vector.load %arg7[%c0, %c0_1] : memref<128x128xf32, #tpu.memory_space<vmem>>, vector<128x128xf32>
    %c0_2 = arith.constant 0 : index
    %c0_3 = arith.constant 0 : index
    %4 = vector.load %arg3[%c0_2, %c0_3] : memref<128x128xbf16, #tpu.memory_space<vmem>>, vector<128x128xbf16>
    %c0_4 = arith.constant 0 : index
    %c0_5 = arith.constant 0 : index
    %5 = vector.load %arg4[%c0_4, %c0_5] : memref<128x128xbf16, #tpu.memory_space<vmem>>, vector<128x128xbf16>
    %cst = arith.constant dense<0.000000e+00> : vector<128x128xf32>
    %6 = tpu.matmul %4, %5, %cst {dimension_numbers = #tpu.dot_dimension_numbers<[1], [0], [0], [1], [0, 0, 1, 1], [], []>} : vector<128x128xbf16>, vector<128x128xbf16>, vector<128x128xf32> -> vector<128x128xf32>
    %7 = arith.addf %3, %6 : vector<128x128xf32>
    %c0_6 = arith.constant 0 : index
    %c0_7 = arith.constant 0 : index
    %8 = vector.load %arg7[%c0_6, %c0_7] : memref<128x128xf32, #tpu.memory_space<vmem>>, vector<128x128xf32>
    tpu.vector_store %arg7[%c0_6, %c0_7], %7 {strides = array<i32>} : memref<128x128xf32, #tpu.memory_space<vmem>>, vector<128x128xf32>,
    %c0_i32_8 = arith.constant 0 : i32
    %9 = arith.cmpi eq, %arg2, %c0_i32_8 : i32
    %10 = arith.extui %9 : i1 to i32
    %c0_i32_9 = arith.constant 0 : i32
    %11 = arith.cmpi ne, %10, %c0_i32_9 : i32
    scf.if %11 {
      %c0_10 = arith.constant 0 : index
      %c0_11 = arith.constant 0 : index
      %12 = vector.load %arg7[%c0_10, %c0_11] : memref<128x128xf32, #tpu.memory_space<vmem>>, vector<128x128xf32>
      %c0_12 = arith.constant 0 : index
      %c0_13 = arith.constant 0 : index
      %13 = vector.load %arg5[%c0_12, %c0_13] : memref<1x128xf32, #tpu.memory_space<vmem>>, vector<1x128xf32>
      %14 = vector.broadcast %13 : vector<1x128xf32> to vector<128x128xf32>
      %15 = arith.addf %12, %14 : vector<128x128xf32>
      %16 = arith.truncf %15 : vector<128x128xf32> to vector<128x128xbf16>
      %c0_14 = arith.constant 0 : index
      %c0_15 = arith.constant 0 : index
      %17 = vector.load %arg6[%c0_14, %c0_15] : memref<128x128xbf16, #tpu.memory_space<vmem>>, vector<128x128xbf16>
      tpu.vector_store %arg6[%c0_14, %c0_15], %16 {strides = array<i32>} : memref<128x128xbf16, #tpu.memory_space<vmem>>, vector<128x128xbf16>,
    } else {
    }
    return
  }
  func.func @transform_0(%arg0: i32, %arg1: i32, %arg2: i32) -> (i32, i32) {
    %c0_i32 = arith.constant 0 : i32
    return %arg0, %arg2 : i32, i32
  }
  func.func @transform_1(%arg0: i32, %arg1: i32, %arg2: i32) -> (i32, i32) {
    %c0_i32 = arith.constant 0 : i32
    return %arg2, %arg1 : i32, i32
  }
  func.func @transform_2(%arg0: i32, %arg1: i32, %arg2: i32) -> (i32, i32) {
    %c0_i32 = arith.constant 0 : i32
    %c0_i32_0 = arith.constant 0 : i32
    return %c0_i32, %arg1 : i32, i32
  }
  func.func @transform_3(%arg0: i32, %arg1: i32, %arg2: i32) -> (i32, i32) {
    %c0_i32 = arith.constant 0 : i32
    return %arg0, %arg1 : i32, i32
  }
}

module attributes {stable_mosaic.version = 11 : i64} {
  func.func @_flash_attn_kernel(%arg0: i32, %arg1: i32, %arg2: i32, %arg3: i32, %arg4: memref<1x1x128xf32, #tpu.memory_space<vmem>>, %arg5: memref<1x1x128x64xbf16, #tpu.memory_space<vmem>>, %arg6: memref<1x1x128x64xbf16, #tpu.memory_space<vmem>>, %arg7: memref<1x1x128x64xbf16, #tpu.memory_space<vmem>>, %arg8: memref<1x1x128x64xbf16, #tpu.memory_space<vmem>>, %arg9: memref<128x1xf32, #tpu.memory_space<vmem>>, %arg10: memref<128x1xf32, #tpu.memory_space<vmem>>, %arg11: memref<128x64xf32, #tpu.memory_space<vmem>>) attributes {dimension_semantics = [#tpu.dimension_semantics<parallel>, #tpu.dimension_semantics<parallel>, #tpu.dimension_semantics<parallel>, #tpu.dimension_semantics<arbitrary>], iteration_bounds = array<i64: 2, 2, 1, 1>, scalar_prefetch = 0 : i64, scratch_operands = 3 : i64, tpu.core_type = #tpu.core_type<tc>, window_params = [{transform_indices = @transform_0, window_bounds = array<i64: 1, 1, 128>}, {transform_indices = @transform_1, window_bounds = array<i64: 1, 1, 128, 64>}, {transform_indices = @transform_2, window_bounds = array<i64: 1, 1, 128, 64>}, {transform_indices = @transform_3, window_bounds = array<i64: 1, 1, 128, 64>}, {transform_indices = @transform_4, window_bounds = array<i64: 1, 1, 128, 64>}]} {
    %c0_i32 = arith.constant 0 : i32
    %0 = arith.cmpi eq, %arg3, %c0_i32 : i32
    %1 = arith.extui %0 : i1 to i32
    %c0_i32_0 = arith.constant 0 : i32
    %2 = arith.cmpi ne, %1, %c0_i32_0 : i32
    scf.if %2 {
      %cst_35 = arith.constant -1.000000e+30 : f32
      %46 = vector.broadcast %cst_35 : f32 to vector<128x1xf32>
      %c0_36 = arith.constant 0 : index
      %c0_37 = arith.constant 0 : index
      %47 = vector.load %arg9[%c0_36, %c0_37] : memref<128x1xf32, #tpu.memory_space<vmem>>, vector<128x1xf32>
      tpu.vector_store %arg9[%c0_36, %c0_37], %46 {strides = array<i32>} : memref<128x1xf32, #tpu.memory_space<vmem>>, vector<128x1xf32>,
      %cst_38 = arith.constant 0.000000e+00 : f32
      %48 = vector.broadcast %cst_38 : f32 to vector<128x1xf32>
      %c0_39 = arith.constant 0 : index
      %c0_40 = arith.constant 0 : index
      %49 = vector.load %arg10[%c0_39, %c0_40] : memref<128x1xf32, #tpu.memory_space<vmem>>, vector<128x1xf32>
      tpu.vector_store %arg10[%c0_39, %c0_40], %48 {strides = array<i32>} : memref<128x1xf32, #tpu.memory_space<vmem>>, vector<128x1xf32>,
      %cst_41 = arith.constant 0.000000e+00 : f32
      %50 = vector.broadcast %cst_41 : f32 to vector<128x64xf32>
      %c0_42 = arith.constant 0 : index
      %c0_43 = arith.constant 0 : index
      %51 = vector.load %arg11[%c0_42, %c0_43] : memref<128x64xf32, #tpu.memory_space<vmem>>, vector<128x64xf32>
      tpu.vector_store %arg11[%c0_42, %c0_43], %50 {strides = array<i32>} : memref<128x64xf32, #tpu.memory_space<vmem>>, vector<128x64xf32>,
    } else {
    }
    %c0 = arith.constant 0 : index
    %c0_1 = arith.constant 0 : index
    %c0_2 = arith.constant 0 : index
    %c0_3 = arith.constant 0 : index
    %3 = vector.load %arg5[%c0, %c0_1, %c0_2, %c0_3] : memref<1x1x128x64xbf16, #tpu.memory_space<vmem>>, vector<1x1x128x64xbf16>
    %4 = vector.shape_cast %3 : vector<1x1x128x64xbf16> to vector<128x64xbf16>
    %c0_4 = arith.constant 0 : index
    %c0_5 = arith.constant 0 : index
    %c0_6 = arith.constant 0 : index
    %c0_7 = arith.constant 0 : index
    %5 = vector.load %arg6[%c0_4, %c0_5, %c0_6, %c0_7] : memref<1x1x128x64xbf16, #tpu.memory_space<vmem>>, vector<1x1x128x64xbf16>
    %6 = vector.shape_cast %5 : vector<1x1x128x64xbf16> to vector<128x64xbf16>
    %cst = arith.constant dense<0.000000e+00> : vector<128x128xf32>
    %7 = tpu.matmul %4, %6, %cst {dimension_numbers = #tpu.dot_dimension_numbers<[1], [1], [0], [0], [0, 0, 1, 0], [], []>} : vector<128x64xbf16>, vector<128x64xbf16>, vector<128x128xf32> -> vector<128x128xf32>
    %cst_8 = arith.constant 1.250000e-01 : f32
    %8 = vector.broadcast %cst_8 : f32 to vector<128x128xf32>
    %9 = arith.mulf %7, %8 : vector<128x128xf32>
    %c0_9 = arith.constant 0 : index
    %c0_10 = arith.constant 0 : index
    %c0_11 = arith.constant 0 : index
    %10 = vector.load %arg4[%c0_9, %c0_10, %c0_11] : memref<1x1x128xf32, #tpu.memory_space<vmem>>, vector<1x1x128xf32>
    %11 = vector.shape_cast %10 : vector<1x1x128xf32> to vector<1x128xf32>
    %cst_12 = arith.constant 1.000000e+00 : f32
    %12 = vector.broadcast %cst_12 : f32 to vector<1x128xf32>
    %13 = arith.subf %12, %11 : vector<1x128xf32>
    %cst_13 = arith.constant -1.000000e+04 : f32
    %14 = vector.broadcast %cst_13 : f32 to vector<1x128xf32>
    %15 = arith.mulf %13, %14 : vector<1x128xf32>
    %16 = vector.broadcast %15 : vector<1x128xf32> to vector<128x128xf32>
    %17 = arith.addf %9, %16 : vector<128x128xf32>
    %c0_14 = arith.constant 0 : index
    %c0_15 = arith.constant 0 : index
    %18 = vector.load %arg9[%c0_14, %c0_15] : memref<128x1xf32, #tpu.memory_space<vmem>>, vector<128x1xf32>
    %cst_16 = arith.constant dense<0xFF800000> : vector<128xf32>
    %19 = vector.multi_reduction <maximumf>, %17, %cst_16 [1] : vector<128x128xf32> to vector<128xf32>
    %20 = vector.shape_cast %19 : vector<128xf32> to vector<128x1xf32>
    %21 = arith.maximumf %18, %20 : vector<128x1xf32>
    %22 = arith.subf %18, %21 : vector<128x1xf32>
    %23 = math.exp %22 : vector<128x1xf32>
    %24 = vector.broadcast %21 : vector<128x1xf32> to vector<128x128xf32>
    %25 = arith.subf %17, %24 : vector<128x128xf32>
    %26 = math.exp %25 : vector<128x128xf32>
    %c0_17 = arith.constant 0 : index
    %c0_18 = arith.constant 0 : index
    %27 = vector.load %arg10[%c0_17, %c0_18] : memref<128x1xf32, #tpu.memory_space<vmem>>, vector<128x1xf32>
    %28 = arith.mulf %23, %27 : vector<128x1xf32>
    %cst_19 = arith.constant dense<0.000000e+00> : vector<128xf32>
    %29 = vector.multi_reduction <add>, %26, %cst_19 [1] : vector<128x128xf32> to vector<128xf32>
    %30 = vector.shape_cast %29 : vector<128xf32> to vector<128x1xf32>
    %31 = arith.addf %28, %30 : vector<128x1xf32>
    %c0_20 = arith.constant 0 : index
    %c0_21 = arith.constant 0 : index
    %32 = vector.load %arg10[%c0_20, %c0_21] : memref<128x1xf32, #tpu.memory_space<vmem>>, vector<128x1xf32>
    tpu.vector_store %arg10[%c0_20, %c0_21], %31 {strides = array<i32>} : memref<128x1xf32, #tpu.memory_space<vmem>>, vector<128x1xf32>,
    %c0_22 = arith.constant 0 : index
    %c0_23 = arith.constant 0 : index
    %33 = vector.load %arg11[%c0_22, %c0_23] : memref<128x64xf32, #tpu.memory_space<vmem>>, vector<128x64xf32>
    %34 = vector.broadcast %23 : vector<128x1xf32> to vector<128x64xf32>
    %35 = arith.mulf %34, %33 : vector<128x64xf32>
    %36 = arith.truncf %26 : vector<128x128xf32> to vector<128x128xbf16>
    %c0_24 = arith.constant 0 : index
    %c0_25 = arith.constant 0 : index
    %c0_26 = arith.constant 0 : index
    %c0_27 = arith.constant 0 : index
    %37 = vector.load %arg7[%c0_24, %c0_25, %c0_26, %c0_27] : memref<1x1x128x64xbf16, #tpu.memory_space<vmem>>, vector<1x1x128x64xbf16>
    %38 = vector.shape_cast %37 : vector<1x1x128x64xbf16> to vector<128x64xbf16>
    %cst_28 = arith.constant dense<0.000000e+00> : vector<128x64xf32>
    %39 = tpu.matmul %36, %38, %cst_28 {dimension_numbers = #tpu.dot_dimension_numbers<[1], [0], [0], [1], [0, 0, 1, 1], [], []>} : vector<128x128xbf16>, vector<128x64xbf16>, vector<128x64xf32> -> vector<128x64xf32>
    %40 = arith.addf %35, %39 : vector<128x64xf32>
    %c0_29 = arith.constant 0 : index
    %c0_30 = arith.constant 0 : index
    %41 = vector.load %arg11[%c0_29, %c0_30] : memref<128x64xf32, #tpu.memory_space<vmem>>, vector<128x64xf32>
    tpu.vector_store %arg11[%c0_29, %c0_30], %40 {strides = array<i32>} : memref<128x64xf32, #tpu.memory_space<vmem>>, vector<128x64xf32>,
    %c0_31 = arith.constant 0 : index
    %c0_32 = arith.constant 0 : index
    %42 = vector.load %arg9[%c0_31, %c0_32] : memref<128x1xf32, #tpu.memory_space<vmem>>, vector<128x1xf32>
    tpu.vector_store %arg9[%c0_31, %c0_32], %21 {strides = array<i32>} : memref<128x1xf32, #tpu.memory_space<vmem>>, vector<128x1xf32>,
    %c0_i32_33 = arith.constant 0 : i32
    %43 = arith.cmpi eq, %arg3, %c0_i32_33 : i32
    %44 = arith.extui %43 : i1 to i32
    %c0_i32_34 = arith.constant 0 : i32
    %45 = arith.cmpi ne, %44, %c0_i32_34 : i32
    scf.if %45 {
      %c0_35 = arith.constant 0 : index
      %c0_36 = arith.constant 0 : index
      %46 = vector.load %arg11[%c0_35, %c0_36] : memref<128x64xf32, #tpu.memory_space<vmem>>, vector<128x64xf32>
      %c0_37 = arith.constant 0 : index
      %c0_38 = arith.constant 0 : index
      %47 = vector.load %arg10[%c0_37, %c0_38] : memref<128x1xf32, #tpu.memory_space<vmem>>, vector<128x1xf32>
      %48 = tpu.reciprocal %47 {approx = true} : vector<128x1xf32> -> vector<128x1xf32>
      %49 = vector.broadcast %48 : vector<128x1xf32> to vector<128x64xf32>
      %50 = arith.mulf %46, %49 : vector<128x64xf32>
      %51 = arith.truncf %50 : vector<128x64xf32> to vector<128x64xbf16>
      %c0_39 = arith.constant 0 : index
      %c0_40 = arith.constant 0 : index
      %c0_41 = arith.constant 0 : index
      %c0_42 = arith.constant 0 : index
      %52 = vector.load %arg8[%c0_39, %c0_40, %c0_41, %c0_42] : memref<1x1x128x64xbf16, #tpu.memory_space<vmem>>, vector<1x1x128x64xbf16>
      %53 = vector.shape_cast %52 : vector<1x1x128x64xbf16> to vector<128x64xbf16>
      %54 = vector.shape_cast %51 : vector<128x64xbf16> to vector<1x1x128x64xbf16>
      tpu.vector_store %arg8[%c0_39, %c0_40, %c0_41, %c0_42], %54 {strides = array<i32>} : memref<1x1x128x64xbf16, #tpu.memory_space<vmem>>, vector<1x1x128x64xbf16>,
    } else {
    }
    return
  }
  func.func @transform_0(%arg0: i32, %arg1: i32, %arg2: i32, %arg3: i32) -> (i32, i32, i32) {
    %c0_i32 = arith.constant 0 : i32
    %c0_i32_0 = arith.constant 0 : i32
    return %arg0, %c0_i32, %arg3 : i32, i32, i32
  }
  func.func @transform_1(%arg0: i32, %arg1: i32, %arg2: i32, %arg3: i32) -> (i32, i32, i32, i32) {
    %c0_i32 = arith.constant 0 : i32
    %c0_i32_0 = arith.constant 0 : i32
    return %arg0, %arg1, %arg2, %c0_i32 : i32, i32, i32, i32
  }
  func.func @transform_2(%arg0: i32, %arg1: i32, %arg2: i32, %arg3: i32) -> (i32, i32, i32, i32) {
    %c0_i32 = arith.constant 0 : i32
    %c0_i32_0 = arith.constant 0 : i32
    return %arg0, %arg1, %arg3, %c0_i32 : i32, i32, i32, i32
  }
  func.func @transform_3(%arg0: i32, %arg1: i32, %arg2: i32, %arg3: i32) -> (i32, i32, i32, i32) {
    %c0_i32 = arith.constant 0 : i32
    %c0_i32_0 = arith.constant 0 : i32
    return %arg0, %arg1, %arg3, %c0_i32 : i32, i32, i32, i32
  }
  func.func @transform_4(%arg0: i32, %arg1: i32, %arg2: i32, %arg3: i32) -> (i32, i32, i32, i32) {
    %c0_i32 = arith.constant 0 : i32
    %c0_i32_0 = arith.constant 0 : i32
    return %arg0, %arg1, %arg2, %c0_i32 : i32, i32, i32, i32
  }
}

module attributes {stable_mosaic.version = 11 : i64} {
  func.func @_dense_res_ln_kernel(%arg0: i32, %arg1: i32, %arg2: memref<128x128xbf16, #tpu.memory_space<vmem>>, %arg3: memref<128x128xbf16, #tpu.memory_space<vmem>>, %arg4: memref<1x128xf32, #tpu.memory_space<vmem>>, %arg5: memref<128x128xf32, #tpu.memory_space<vmem>>, %arg6: memref<1x128xf32, #tpu.memory_space<vmem>>, %arg7: memref<1x128xf32, #tpu.memory_space<vmem>>, %arg8: memref<128x128xf32, #tpu.memory_space<vmem>>, %arg9: memref<128x128xf32, #tpu.memory_space<vmem>>) attributes {dimension_semantics = [#tpu.dimension_semantics<parallel>, #tpu.dimension_semantics<arbitrary>], iteration_bounds = array<i64: 2, 1>, scalar_prefetch = 0 : i64, scratch_operands = 1 : i64, tpu.core_type = #tpu.core_type<tc>, window_params = [{transform_indices = @transform_0, window_bounds = array<i64: 128, 128>}, {transform_indices = @transform_1, window_bounds = array<i64: 128, 128>}, {pipeline_mode = #tpu.pipeline_mode<synchronous>, transform_indices = @transform_2, window_bounds = array<i64: 1, 128>}, {transform_indices = @transform_3, window_bounds = array<i64: 128, 128>}, {pipeline_mode = #tpu.pipeline_mode<synchronous>, transform_indices = @transform_4, window_bounds = array<i64: 1, 128>}, {pipeline_mode = #tpu.pipeline_mode<synchronous>, transform_indices = @transform_5, window_bounds = array<i64: 1, 128>}, {transform_indices = @transform_6, window_bounds = array<i64: 128, 128>}]} {
    %c0_i32 = arith.constant 0 : i32
    %0 = arith.cmpi eq, %arg1, %c0_i32 : i32
    %1 = arith.extui %0 : i1 to i32
    %c0_i32_0 = arith.constant 0 : i32
    %2 = arith.cmpi ne, %1, %c0_i32_0 : i32
    scf.if %2 {
      %cst_10 = arith.constant 0.000000e+00 : f32
      %12 = vector.broadcast %cst_10 : f32 to vector<128x128xf32>
      %c0_11 = arith.constant 0 : index
      %c0_12 = arith.constant 0 : index
      %13 = vector.load %arg9[%c0_11, %c0_12] : memref<128x128xf32, #tpu.memory_space<vmem>>, vector<128x128xf32>
      tpu.vector_store %arg9[%c0_11, %c0_12], %12 {strides = array<i32>} : memref<128x128xf32, #tpu.memory_space<vmem>>, vector<128x128xf32>,
    } else {
    }
    %c0 = arith.constant 0 : index
    %c0_1 = arith.constant 0 : index
    %3 = vector.load %arg9[%c0, %c0_1] : memref<128x128xf32, #tpu.memory_space<vmem>>, vector<128x128xf32>
    %c0_2 = arith.constant 0 : index
    %c0_3 = arith.constant 0 : index
    %4 = vector.load %arg2[%c0_2, %c0_3] : memref<128x128xbf16, #tpu.memory_space<vmem>>, vector<128x128xbf16>
    %c0_4 = arith.constant 0 : index
    %c0_5 = arith.constant 0 : index
    %5 = vector.load %arg3[%c0_4, %c0_5] : memref<128x128xbf16, #tpu.memory_space<vmem>>, vector<128x128xbf16>
    %cst = arith.constant dense<0.000000e+00> : vector<128x128xf32>
    %6 = tpu.matmul %4, %5, %cst {dimension_numbers = #tpu.dot_dimension_numbers<[1], [0], [0], [1], [0, 0, 1, 1], [], []>} : vector<128x128xbf16>, vector<128x128xbf16>, vector<128x128xf32> -> vector<128x128xf32>
    %7 = arith.addf %3, %6 : vector<128x128xf32>
    %c0_6 = arith.constant 0 : index
    %c0_7 = arith.constant 0 : index
    %8 = vector.load %arg9[%c0_6, %c0_7] : memref<128x128xf32, #tpu.memory_space<vmem>>, vector<128x128xf32>
    tpu.vector_store %arg9[%c0_6, %c0_7], %7 {strides = array<i32>} : memref<128x128xf32, #tpu.memory_space<vmem>>, vector<128x128xf32>,
    %c0_i32_8 = arith.constant 0 : i32
    %9 = arith.cmpi eq, %arg1, %c0_i32_8 : i32
    %10 = arith.extui %9 : i1 to i32
    %c0_i32_9 = arith.constant 0 : i32
    %11 = arith.cmpi ne, %10, %c0_i32_9 : i32
    scf.if %11 {
      %c0_10 = arith.constant 0 : index
      %c0_11 = arith.constant 0 : index
      %12 = vector.load %arg9[%c0_10, %c0_11] : memref<128x128xf32, #tpu.memory_space<vmem>>, vector<128x128xf32>
      %c0_12 = arith.constant 0 : index
      %c0_13 = arith.constant 0 : index
      %13 = vector.load %arg4[%c0_12, %c0_13] : memref<1x128xf32, #tpu.memory_space<vmem>>, vector<1x128xf32>
      %14 = vector.broadcast %13 : vector<1x128xf32> to vector<128x128xf32>
      %15 = arith.addf %12, %14 : vector<128x128xf32>
      %c0_14 = arith.constant 0 : index
      %c0_15 = arith.constant 0 : index
      %16 = vector.load %arg5[%c0_14, %c0_15] : memref<128x128xf32, #tpu.memory_space<vmem>>, vector<128x128xf32>
      %17 = arith.addf %15, %16 : vector<128x128xf32>
      %cst_16 = arith.constant dense<0.000000e+00> : vector<128xf32>
      %18 = vector.multi_reduction <add>, %17, %cst_16 [1] : vector<128x128xf32> to vector<128xf32>
      %19 = vector.shape_cast %18 : vector<128xf32> to vector<128x1xf32>
      %cst_17 = arith.constant 1.280000e+02 : f32
      %20 = vector.broadcast %cst_17 : f32 to vector<128x1xf32>
      %21 = arith.divf %19, %20 : vector<128x1xf32>
      %22 = vector.broadcast %21 : vector<128x1xf32> to vector<128x128xf32>
      %23 = arith.subf %17, %22 : vector<128x128xf32>
      %24 = arith.mulf %23, %23 : vector<128x128xf32>
      %cst_18 = arith.constant dense<0.000000e+00> : vector<128xf32>
      %25 = vector.multi_reduction <add>, %24, %cst_18 [1] : vector<128x128xf32> to vector<128xf32>
      %26 = vector.shape_cast %25 : vector<128xf32> to vector<128x1xf32>
      %cst_19 = arith.constant 1.280000e+02 : f32
      %27 = vector.broadcast %cst_19 : f32 to vector<128x1xf32>
      %28 = arith.divf %26, %27 : vector<128x1xf32>
      %29 = vector.broadcast %21 : vector<128x1xf32> to vector<128x128xf32>
      %30 = arith.subf %17, %29 : vector<128x128xf32>
      %cst_20 = arith.constant 9.99999996E-13 : f32
      %31 = vector.broadcast %cst_20 : f32 to vector<128x1xf32>
      %32 = arith.addf %28, %31 : vector<128x1xf32>
      %33 = math.rsqrt %32 : vector<128x1xf32>
      %34 = vector.broadcast %33 : vector<128x1xf32> to vector<128x128xf32>
      %35 = arith.mulf %30, %34 : vector<128x128xf32>
      %c0_21 = arith.constant 0 : index
      %c0_22 = arith.constant 0 : index
      %36 = vector.load %arg6[%c0_21, %c0_22] : memref<1x128xf32, #tpu.memory_space<vmem>>, vector<1x128xf32>
      %37 = vector.broadcast %36 : vector<1x128xf32> to vector<128x128xf32>
      %38 = arith.mulf %35, %37 : vector<128x128xf32>
      %c0_23 = arith.constant 0 : index
      %c0_24 = arith.constant 0 : index
      %39 = vector.load %arg7[%c0_23, %c0_24] : memref<1x128xf32, #tpu.memory_space<vmem>>, vector<1x128xf32>
      %40 = vector.broadcast %39 : vector<1x128xf32> to vector<128x128xf32>
      %41 = arith.addf %38, %40 : vector<128x128xf32>
      %c0_25 = arith.constant 0 : index
      %c0_26 = arith.constant 0 : index
      %42 = vector.load %arg8[%c0_25, %c0_26] : memref<128x128xf32, #tpu.memory_space<vmem>>, vector<128x128xf32>
      tpu.vector_store %arg8[%c0_25, %c0_26], %41 {strides = array<i32>} : memref<128x128xf32, #tpu.memory_space<vmem>>, vector<128x128xf32>,
    } else {
    }
    return
  }
  func.func @transform_0(%arg0: i32, %arg1: i32) -> (i32, i32) {
    %c0_i32 = arith.constant 0 : i32
    return %arg0, %arg1 : i32, i32
  }
  func.func @transform_1(%arg0: i32, %arg1: i32) -> (i32, i32) {
    %c0_i32 = arith.constant 0 : i32
    %c0_i32_0 = arith.constant 0 : i32
    return %arg1, %c0_i32 : i32, i32
  }
  func.func @transform_2(%arg0: i32, %arg1: i32) -> (i32, i32) {
    %c0_i32 = arith.constant 0 : i32
    %c0_i32_0 = arith.constant 0 : i32
    %c0_i32_1 = arith.constant 0 : i32
    return %c0_i32, %c0_i32_0 : i32, i32
  }
  func.func @transform_3(%arg0: i32, %arg1: i32) -> (i32, i32) {
    %c0_i32 = arith.constant 0 : i32
    %c0_i32_0 = arith.constant 0 : i32
    return %arg0, %c0_i32 : i32, i32
  }
  func.func @transform_4(%arg0: i32, %arg1: i32) -> (i32, i32) {
    %c0_i32 = arith.constant 0 : i32
    %c0_i32_0 = arith.constant 0 : i32
    %c0_i32_1 = arith.constant 0 : i32
    return %c0_i32, %c0_i32_0 : i32, i32
  }
  func.func @transform_5(%arg0: i32, %arg1: i32) -> (i32, i32) {
    %c0_i32 = arith.constant 0 : i32
    %c0_i32_0 = arith.constant 0 : i32
    %c0_i32_1 = arith.constant 0 : i32
    return %c0_i32, %c0_i32_0 : i32, i32
  }
  func.func @transform_6(%arg0: i32, %arg1: i32) -> (i32, i32) {
    %c0_i32 = arith.constant 0 : i32
    %c0_i32_0 = arith.constant 0 : i32
    return %arg0, %c0_i32 : i32, i32
  }
}

module attributes {stable_mosaic.version = 11 : i64} {
  func.func @_dense_res_ln_kernel(%arg0: i32, %arg1: i32, %arg2: memref<128x128xbf16, #tpu.memory_space<vmem>>, %arg3: memref<128x128xbf16, #tpu.memory_space<vmem>>, %arg4: memref<1x128xf32, #tpu.memory_space<vmem>>, %arg5: memref<128x128xf32, #tpu.memory_space<vmem>>, %arg6: memref<1x128xf32, #tpu.memory_space<vmem>>, %arg7: memref<1x128xf32, #tpu.memory_space<vmem>>, %arg8: memref<128x128xf32, #tpu.memory_space<vmem>>, %arg9: memref<128x128xf32, #tpu.memory_space<vmem>>) attributes {dimension_semantics = [#tpu.dimension_semantics<parallel>, #tpu.dimension_semantics<arbitrary>], iteration_bounds = array<i64: 2, 2>, scalar_prefetch = 0 : i64, scratch_operands = 1 : i64, tpu.core_type = #tpu.core_type<tc>, window_params = [{transform_indices = @transform_0, window_bounds = array<i64: 128, 128>}, {transform_indices = @transform_1, window_bounds = array<i64: 128, 128>}, {pipeline_mode = #tpu.pipeline_mode<synchronous>, transform_indices = @transform_2, window_bounds = array<i64: 1, 128>}, {transform_indices = @transform_3, window_bounds = array<i64: 128, 128>}, {pipeline_mode = #tpu.pipeline_mode<synchronous>, transform_indices = @transform_4, window_bounds = array<i64: 1, 128>}, {pipeline_mode = #tpu.pipeline_mode<synchronous>, transform_indices = @transform_5, window_bounds = array<i64: 1, 128>}, {transform_indices = @transform_6, window_bounds = array<i64: 128, 128>}]} {
    %c0_i32 = arith.constant 0 : i32
    %0 = arith.cmpi eq, %arg1, %c0_i32 : i32
    %1 = arith.extui %0 : i1 to i32
    %c0_i32_0 = arith.constant 0 : i32
    %2 = arith.cmpi ne, %1, %c0_i32_0 : i32
    scf.if %2 {
      %cst_9 = arith.constant 0.000000e+00 : f32
      %12 = vector.broadcast %cst_9 : f32 to vector<128x128xf32>
      %c0_10 = arith.constant 0 : index
      %c0_11 = arith.constant 0 : index
      %13 = vector.load %arg9[%c0_10, %c0_11] : memref<128x128xf32, #tpu.memory_space<vmem>>, vector<128x128xf32>
      tpu.vector_store %arg9[%c0_10, %c0_11], %12 {strides = array<i32>} : memref<128x128xf32, #tpu.memory_space<vmem>>, vector<128x128xf32>,
    } else {
    }
    %c0 = arith.constant 0 : index
    %c0_1 = arith.constant 0 : index
    %3 = vector.load %arg9[%c0, %c0_1] : memref<128x128xf32, #tpu.memory_space<vmem>>, vector<128x128xf32>
    %c0_2 = arith.constant 0 : index
    %c0_3 = arith.constant 0 : index
    %4 = vector.load %arg2[%c0_2, %c0_3] : memref<128x128xbf16, #tpu.memory_space<vmem>>, vector<128x128xbf16>
    %c0_4 = arith.constant 0 : index
    %c0_5 = arith.constant 0 : index
    %5 = vector.load %arg3[%c0_4, %c0_5] : memref<128x128xbf16, #tpu.memory_space<vmem>>, vector<128x128xbf16>
    %cst = arith.constant dense<0.000000e+00> : vector<128x128xf32>
    %6 = tpu.matmul %4, %5, %cst {dimension_numbers = #tpu.dot_dimension_numbers<[1], [0], [0], [1], [0, 0, 1, 1], [], []>} : vector<128x128xbf16>, vector<128x128xbf16>, vector<128x128xf32> -> vector<128x128xf32>
    %7 = arith.addf %3, %6 : vector<128x128xf32>
    %c0_6 = arith.constant 0 : index
    %c0_7 = arith.constant 0 : index
    %8 = vector.load %arg9[%c0_6, %c0_7] : memref<128x128xf32, #tpu.memory_space<vmem>>, vector<128x128xf32>
    tpu.vector_store %arg9[%c0_6, %c0_7], %7 {strides = array<i32>} : memref<128x128xf32, #tpu.memory_space<vmem>>, vector<128x128xf32>,
    %c1_i32 = arith.constant 1 : i32
    %9 = arith.cmpi eq, %arg1, %c1_i32 : i32
    %10 = arith.extui %9 : i1 to i32
    %c0_i32_8 = arith.constant 0 : i32
    %11 = arith.cmpi ne, %10, %c0_i32_8 : i32
    scf.if %11 {
      %c0_9 = arith.constant 0 : index
      %c0_10 = arith.constant 0 : index
      %12 = vector.load %arg9[%c0_9, %c0_10] : memref<128x128xf32, #tpu.memory_space<vmem>>, vector<128x128xf32>
      %c0_11 = arith.constant 0 : index
      %c0_12 = arith.constant 0 : index
      %13 = vector.load %arg4[%c0_11, %c0_12] : memref<1x128xf32, #tpu.memory_space<vmem>>, vector<1x128xf32>
      %14 = vector.broadcast %13 : vector<1x128xf32> to vector<128x128xf32>
      %15 = arith.addf %12, %14 : vector<128x128xf32>
      %c0_13 = arith.constant 0 : index
      %c0_14 = arith.constant 0 : index
      %16 = vector.load %arg5[%c0_13, %c0_14] : memref<128x128xf32, #tpu.memory_space<vmem>>, vector<128x128xf32>
      %17 = arith.addf %15, %16 : vector<128x128xf32>
      %cst_15 = arith.constant dense<0.000000e+00> : vector<128xf32>
      %18 = vector.multi_reduction <add>, %17, %cst_15 [1] : vector<128x128xf32> to vector<128xf32>
      %19 = vector.shape_cast %18 : vector<128xf32> to vector<128x1xf32>
      %cst_16 = arith.constant 1.280000e+02 : f32
      %20 = vector.broadcast %cst_16 : f32 to vector<128x1xf32>
      %21 = arith.divf %19, %20 : vector<128x1xf32>
      %22 = vector.broadcast %21 : vector<128x1xf32> to vector<128x128xf32>
      %23 = arith.subf %17, %22 : vector<128x128xf32>
      %24 = arith.mulf %23, %23 : vector<128x128xf32>
      %cst_17 = arith.constant dense<0.000000e+00> : vector<128xf32>
      %25 = vector.multi_reduction <add>, %24, %cst_17 [1] : vector<128x128xf32> to vector<128xf32>
      %26 = vector.shape_cast %25 : vector<128xf32> to vector<128x1xf32>
      %cst_18 = arith.constant 1.280000e+02 : f32
      %27 = vector.broadcast %cst_18 : f32 to vector<128x1xf32>
      %28 = arith.divf %26, %27 : vector<128x1xf32>
      %29 = vector.broadcast %21 : vector<128x1xf32> to vector<128x128xf32>
      %30 = arith.subf %17, %29 : vector<128x128xf32>
      %cst_19 = arith.constant 9.99999996E-13 : f32
      %31 = vector.broadcast %cst_19 : f32 to vector<128x1xf32>
      %32 = arith.addf %28, %31 : vector<128x1xf32>
      %33 = math.rsqrt %32 : vector<128x1xf32>
      %34 = vector.broadcast %33 : vector<128x1xf32> to vector<128x128xf32>
      %35 = arith.mulf %30, %34 : vector<128x128xf32>
      %c0_20 = arith.constant 0 : index
      %c0_21 = arith.constant 0 : index
      %36 = vector.load %arg6[%c0_20, %c0_21] : memref<1x128xf32, #tpu.memory_space<vmem>>, vector<1x128xf32>
      %37 = vector.broadcast %36 : vector<1x128xf32> to vector<128x128xf32>
      %38 = arith.mulf %35, %37 : vector<128x128xf32>
      %c0_22 = arith.constant 0 : index
      %c0_23 = arith.constant 0 : index
      %39 = vector.load %arg7[%c0_22, %c0_23] : memref<1x128xf32, #tpu.memory_space<vmem>>, vector<1x128xf32>
      %40 = vector.broadcast %39 : vector<1x128xf32> to vector<128x128xf32>
      %41 = arith.addf %38, %40 : vector<128x128xf32>
      %c0_24 = arith.constant 0 : index
      %c0_25 = arith.constant 0 : index
      %42 = vector.load %arg8[%c0_24, %c0_25] : memref<128x128xf32, #tpu.memory_space<vmem>>, vector<128x128xf32>
      tpu.vector_store %arg8[%c0_24, %c0_25], %41 {strides = array<i32>} : memref<128x128xf32, #tpu.memory_space<vmem>>, vector<128x128xf32>,
    } else {
    }
    return
  }
  func.func @transform_0(%arg0: i32, %arg1: i32) -> (i32, i32) {
    %c0_i32 = arith.constant 0 : i32
    return %arg0, %arg1 : i32, i32
  }
  func.func @transform_1(%arg0: i32, %arg1: i32) -> (i32, i32) {
    %c0_i32 = arith.constant 0 : i32
    %c0_i32_0 = arith.constant 0 : i32
    return %arg1, %c0_i32 : i32, i32
  }
  func.func @transform_2(%arg0: i32, %arg1: i32) -> (i32, i32) {
    %c0_i32 = arith.constant 0 : i32
    %c0_i32_0 = arith.constant 0 : i32
    %c0_i32_1 = arith.constant 0 : i32
    return %c0_i32, %c0_i32_0 : i32, i32
  }
  func.func @transform_3(%arg0: i32, %arg1: i32) -> (i32, i32) {
    %c0_i32 = arith.constant 0 : i32
    %c0_i32_0 = arith.constant 0 : i32
    return %arg0, %c0_i32 : i32, i32
  }
  func.func @transform_4(%arg0: i32, %arg1: i32) -> (i32, i32) {
    %c0_i32 = arith.constant 0 : i32
    %c0_i32_0 = arith.constant 0 : i32
    %c0_i32_1 = arith.constant 0 : i32
    return %c0_i32, %c0_i32_0 : i32, i32
  }
  func.func @transform_5(%arg0: i32, %arg1: i32) -> (i32, i32) {
    %c0_i32 = arith.constant 0 : i32
    %c0_i32_0 = arith.constant 0 : i32
    %c0_i32_1 = arith.constant 0 : i32
    return %c0_i32, %c0_i32_0 : i32, i32
  }
  func.func @transform_6(%arg0: i32, %arg1: i32) -> (i32, i32) {
    %c0_i32 = arith.constant 0 : i32
    %c0_i32_0 = arith.constant 0 : i32
    return %arg0, %c0_i32 : i32, i32
  }
}

module attributes {stable_mosaic.version = 11 : i64} {
  func.func @_dense_kernel(%arg0: i32, %arg1: i32, %arg2: i32, %arg3: memref<128x128xbf16, #tpu.memory_space<vmem>>, %arg4: memref<128x128xbf16, #tpu.memory_space<vmem>>, %arg5: memref<1x128xf32, #tpu.memory_space<vmem>>, %arg6: memref<128x128xbf16, #tpu.memory_space<vmem>>, %arg7: memref<128x128xf32, #tpu.memory_space<vmem>>) attributes {dimension_semantics = [#tpu.dimension_semantics<parallel>, #tpu.dimension_semantics<parallel>, #tpu.dimension_semantics<arbitrary>], iteration_bounds = array<i64: 2, 2, 1>, scalar_prefetch = 0 : i64, scratch_operands = 1 : i64, tpu.core_type = #tpu.core_type<tc>, window_params = [{transform_indices = @transform_0, window_bounds = array<i64: 128, 128>}, {transform_indices = @transform_1, window_bounds = array<i64: 128, 128>}, {transform_indices = @transform_2, window_bounds = array<i64: 1, 128>}, {transform_indices = @transform_3, window_bounds = array<i64: 128, 128>}]} {
    %c0_i32 = arith.constant 0 : i32
    %0 = arith.cmpi eq, %arg2, %c0_i32 : i32
    %1 = arith.extui %0 : i1 to i32
    %c0_i32_0 = arith.constant 0 : i32
    %2 = arith.cmpi ne, %1, %c0_i32_0 : i32
    scf.if %2 {
      %cst_10 = arith.constant 0.000000e+00 : f32
      %12 = vector.broadcast %cst_10 : f32 to vector<128x128xf32>
      %c0_11 = arith.constant 0 : index
      %c0_12 = arith.constant 0 : index
      %13 = vector.load %arg7[%c0_11, %c0_12] : memref<128x128xf32, #tpu.memory_space<vmem>>, vector<128x128xf32>
      tpu.vector_store %arg7[%c0_11, %c0_12], %12 {strides = array<i32>} : memref<128x128xf32, #tpu.memory_space<vmem>>, vector<128x128xf32>,
    } else {
    }
    %c0 = arith.constant 0 : index
    %c0_1 = arith.constant 0 : index
    %3 = vector.load %arg7[%c0, %c0_1] : memref<128x128xf32, #tpu.memory_space<vmem>>, vector<128x128xf32>
    %c0_2 = arith.constant 0 : index
    %c0_3 = arith.constant 0 : index
    %4 = vector.load %arg3[%c0_2, %c0_3] : memref<128x128xbf16, #tpu.memory_space<vmem>>, vector<128x128xbf16>
    %c0_4 = arith.constant 0 : index
    %c0_5 = arith.constant 0 : index
    %5 = vector.load %arg4[%c0_4, %c0_5] : memref<128x128xbf16, #tpu.memory_space<vmem>>, vector<128x128xbf16>
    %cst = arith.constant dense<0.000000e+00> : vector<128x128xf32>
    %6 = tpu.matmul %4, %5, %cst {dimension_numbers = #tpu.dot_dimension_numbers<[1], [0], [0], [1], [0, 0, 1, 1], [], []>} : vector<128x128xbf16>, vector<128x128xbf16>, vector<128x128xf32> -> vector<128x128xf32>
    %7 = arith.addf %3, %6 : vector<128x128xf32>
    %c0_6 = arith.constant 0 : index
    %c0_7 = arith.constant 0 : index
    %8 = vector.load %arg7[%c0_6, %c0_7] : memref<128x128xf32, #tpu.memory_space<vmem>>, vector<128x128xf32>
    tpu.vector_store %arg7[%c0_6, %c0_7], %7 {strides = array<i32>} : memref<128x128xf32, #tpu.memory_space<vmem>>, vector<128x128xf32>,
    %c0_i32_8 = arith.constant 0 : i32
    %9 = arith.cmpi eq, %arg2, %c0_i32_8 : i32
    %10 = arith.extui %9 : i1 to i32
    %c0_i32_9 = arith.constant 0 : i32
    %11 = arith.cmpi ne, %10, %c0_i32_9 : i32
    scf.if %11 {
      %c0_10 = arith.constant 0 : index
      %c0_11 = arith.constant 0 : index
      %12 = vector.load %arg7[%c0_10, %c0_11] : memref<128x128xf32, #tpu.memory_space<vmem>>, vector<128x128xf32>
      %c0_12 = arith.constant 0 : index
      %c0_13 = arith.constant 0 : index
      %13 = vector.load %arg5[%c0_12, %c0_13] : memref<1x128xf32, #tpu.memory_space<vmem>>, vector<1x128xf32>
      %14 = vector.broadcast %13 : vector<1x128xf32> to vector<128x128xf32>
      %15 = arith.addf %12, %14 : vector<128x128xf32>
      %16 = arith.mulf %15, %15 : vector<128x128xf32>
      %17 = arith.mulf %15, %16 : vector<128x128xf32>
      %cst_14 = arith.constant 4.471500e-02 : f32
      %18 = vector.broadcast %cst_14 : f32 to vector<128x128xf32>
      %19 = arith.mulf %18, %17 : vector<128x128xf32>
      %20 = arith.addf %15, %19 : vector<128x128xf32>
      %cst_15 = arith.constant 0.797884583 : f32
      %21 = vector.broadcast %cst_15 : f32 to vector<128x128xf32>
      %22 = arith.mulf %21, %20 : vector<128x128xf32>
      %23 = math.tanh %22 : vector<128x128xf32>
      %cst_16 = arith.constant 1.000000e+00 : f32
      %24 = vector.broadcast %cst_16 : f32 to vector<128x128xf32>
      %25 = arith.addf %24, %23 : vector<128x128xf32>
      %cst_17 = arith.constant 5.000000e-01 : f32
      %26 = vector.broadcast %cst_17 : f32 to vector<128x128xf32>
      %27 = arith.mulf %26, %25 : vector<128x128xf32>
      %28 = arith.mulf %15, %27 : vector<128x128xf32>
      %29 = arith.truncf %28 : vector<128x128xf32> to vector<128x128xbf16>
      %c0_18 = arith.constant 0 : index
      %c0_19 = arith.constant 0 : index
      %30 = vector.load %arg6[%c0_18, %c0_19] : memref<128x128xbf16, #tpu.memory_space<vmem>>, vector<128x128xbf16>
      tpu.vector_store %arg6[%c0_18, %c0_19], %29 {strides = array<i32>} : memref<128x128xbf16, #tpu.memory_space<vmem>>, vector<128x128xbf16>,
    } else {
    }
    return
  }
  func.func @transform_0(%arg0: i32, %arg1: i32, %arg2: i32) -> (i32, i32) {
    %c0_i32 = arith.constant 0 : i32
    return %arg0, %arg2 : i32, i32
  }
  func.func @transform_1(%arg0: i32, %arg1: i32, %arg2: i32) -> (i32, i32) {
    %c0_i32 = arith.constant 0 : i32
    return %arg2, %arg1 : i32, i32
  }
  func.func @transform_2(%arg0: i32, %arg1: i32, %arg2: i32) -> (i32, i32) {
    %c0_i32 = arith.constant 0 : i32
    %c0_i32_0 = arith.constant 0 : i32
    return %c0_i32, %arg1 : i32, i32
  }
  func.func @transform_3(%arg0: i32, %arg1: i32, %arg2: i32) -> (i32, i32) {
    %c0_i32 = arith.constant 0 : i32
    return %arg0, %arg1 : i32, i32
  }
}

module attributes {stable_mosaic.version = 11 : i64} {
  func.func @_dense_kernel(%arg0: i32, %arg1: i32, %arg2: i32, %arg3: memref<128x128xbf16, #tpu.memory_space<vmem>>, %arg4: memref<128x128xbf16, #tpu.memory_space<vmem>>, %arg5: memref<1x128xf32, #tpu.memory_space<vmem>>, %arg6: memref<128x128xbf16, #tpu.memory_space<vmem>>, %arg7: memref<128x128xf32, #tpu.memory_space<vmem>>) attributes {dimension_semantics = [#tpu.dimension_semantics<parallel>, #tpu.dimension_semantics<parallel>, #tpu.dimension_semantics<arbitrary>], iteration_bounds = array<i64: 2, 8, 1>, scalar_prefetch = 0 : i64, scratch_operands = 1 : i64, tpu.core_type = #tpu.core_type<tc>, window_params = [{transform_indices = @transform_0, window_bounds = array<i64: 128, 128>}, {transform_indices = @transform_1, window_bounds = array<i64: 128, 128>}, {transform_indices = @transform_2, window_bounds = array<i64: 1, 128>}, {transform_indices = @transform_3, window_bounds = array<i64: 128, 128>}]} {
    %c0_i32 = arith.constant 0 : i32
    %0 = arith.cmpi eq, %arg2, %c0_i32 : i32
    %1 = arith.extui %0 : i1 to i32
    %c0_i32_0 = arith.constant 0 : i32
    %2 = arith.cmpi ne, %1, %c0_i32_0 : i32
    scf.if %2 {
      %cst_10 = arith.constant 0.000000e+00 : f32
      %12 = vector.broadcast %cst_10 : f32 to vector<128x128xf32>
      %c0_11 = arith.constant 0 : index
      %c0_12 = arith.constant 0 : index
      %13 = vector.load %arg7[%c0_11, %c0_12] : memref<128x128xf32, #tpu.memory_space<vmem>>, vector<128x128xf32>
      tpu.vector_store %arg7[%c0_11, %c0_12], %12 {strides = array<i32>} : memref<128x128xf32, #tpu.memory_space<vmem>>, vector<128x128xf32>,
    } else {
    }
    %c0 = arith.constant 0 : index
    %c0_1 = arith.constant 0 : index
    %3 = vector.load %arg7[%c0, %c0_1] : memref<128x128xf32, #tpu.memory_space<vmem>>, vector<128x128xf32>
    %c0_2 = arith.constant 0 : index
    %c0_3 = arith.constant 0 : index
    %4 = vector.load %arg3[%c0_2, %c0_3] : memref<128x128xbf16, #tpu.memory_space<vmem>>, vector<128x128xbf16>
    %c0_4 = arith.constant 0 : index
    %c0_5 = arith.constant 0 : index
    %5 = vector.load %arg4[%c0_4, %c0_5] : memref<128x128xbf16, #tpu.memory_space<vmem>>, vector<128x128xbf16>
    %cst = arith.constant dense<0.000000e+00> : vector<128x128xf32>
    %6 = tpu.matmul %4, %5, %cst {dimension_numbers = #tpu.dot_dimension_numbers<[1], [0], [0], [1], [0, 0, 1, 1], [], []>} : vector<128x128xbf16>, vector<128x128xbf16>, vector<128x128xf32> -> vector<128x128xf32>
    %7 = arith.addf %3, %6 : vector<128x128xf32>
    %c0_6 = arith.constant 0 : index
    %c0_7 = arith.constant 0 : index
    %8 = vector.load %arg7[%c0_6, %c0_7] : memref<128x128xf32, #tpu.memory_space<vmem>>, vector<128x128xf32>
    tpu.vector_store %arg7[%c0_6, %c0_7], %7 {strides = array<i32>} : memref<128x128xf32, #tpu.memory_space<vmem>>, vector<128x128xf32>,
    %c0_i32_8 = arith.constant 0 : i32
    %9 = arith.cmpi eq, %arg2, %c0_i32_8 : i32
    %10 = arith.extui %9 : i1 to i32
    %c0_i32_9 = arith.constant 0 : i32
    %11 = arith.cmpi ne, %10, %c0_i32_9 : i32
    scf.if %11 {
      %c0_10 = arith.constant 0 : index
      %c0_11 = arith.constant 0 : index
      %12 = vector.load %arg7[%c0_10, %c0_11] : memref<128x128xf32, #tpu.memory_space<vmem>>, vector<128x128xf32>
      %c0_12 = arith.constant 0 : index
      %c0_13 = arith.constant 0 : index
      %13 = vector.load %arg5[%c0_12, %c0_13] : memref<1x128xf32, #tpu.memory_space<vmem>>, vector<1x128xf32>
      %14 = vector.broadcast %13 : vector<1x128xf32> to vector<128x128xf32>
      %15 = arith.addf %12, %14 : vector<128x128xf32>
      %16 = arith.truncf %15 : vector<128x128xf32> to vector<128x128xbf16>
      %c0_14 = arith.constant 0 : index
      %c0_15 = arith.constant 0 : index
      %17 = vector.load %arg6[%c0_14, %c0_15] : memref<128x128xbf16, #tpu.memory_space<vmem>>, vector<128x128xbf16>
      tpu.vector_store %arg6[%c0_14, %c0_15], %16 {strides = array<i32>} : memref<128x128xbf16, #tpu.memory_space<vmem>>, vector<128x128xbf16>,
    } else {
    }
    return
  }
  func.func @transform_0(%arg0: i32, %arg1: i32, %arg2: i32) -> (i32, i32) {
    %c0_i32 = arith.constant 0 : i32
    return %arg0, %arg2 : i32, i32
  }
  func.func @transform_1(%arg0: i32, %arg1: i32, %arg2: i32) -> (i32, i32) {
    %c0_i32 = arith.constant 0 : i32
    return %arg2, %arg1 : i32, i32
  }
  func.func @transform_2(%arg0: i32, %arg1: i32, %arg2: i32) -> (i32, i32) {
    %c0_i32 = arith.constant 0 : i32
    %c0_i32_0 = arith.constant 0 : i32
    return %c0_i32, %arg1 : i32, i32
  }
  func.func @transform_3(%arg0: i32, %arg1: i32, %arg2: i32) -> (i32, i32) {
    %c0_i32 = arith.constant 0 : i32
    return %arg0, %arg1 : i32, i32
  }
}

module attributes {stable_mosaic.version = 11 : i64} {
  func.func @_gp_kernel(%arg0: i32, %arg1: i32, %arg2: i32, %arg3: i32, %arg4: memref<1x128x1xf32, #tpu.memory_space<vmem>>, %arg5: memref<1x1x128xf32, #tpu.memory_space<vmem>>, %arg6: memref<1x1x128x64xbf16, #tpu.memory_space<vmem>>, %arg7: memref<1x1x128x64xbf16, #tpu.memory_space<vmem>>, %arg8: memref<1x1x128x128xf32, #tpu.memory_space<vmem>>) attributes {dimension_semantics = [#tpu.dimension_semantics<parallel>, #tpu.dimension_semantics<parallel>, #tpu.dimension_semantics<parallel>, #tpu.dimension_semantics<parallel>], iteration_bounds = array<i64: 2, 2, 1, 1>, scalar_prefetch = 0 : i64, scratch_operands = 0 : i64, tpu.core_type = #tpu.core_type<tc>, window_params = [{transform_indices = @transform_0, window_bounds = array<i64: 1, 128, 1>}, {transform_indices = @transform_1, window_bounds = array<i64: 1, 1, 128>}, {transform_indices = @transform_2, window_bounds = array<i64: 1, 1, 128, 64>}, {transform_indices = @transform_3, window_bounds = array<i64: 1, 1, 128, 64>}, {transform_indices = @transform_4, window_bounds = array<i64: 1, 1, 128, 128>}]} {
    %c0 = arith.constant 0 : index
    %c0_0 = arith.constant 0 : index
    %c0_1 = arith.constant 0 : index
    %c0_2 = arith.constant 0 : index
    %0 = vector.load %arg6[%c0, %c0_0, %c0_1, %c0_2] : memref<1x1x128x64xbf16, #tpu.memory_space<vmem>>, vector<1x1x128x64xbf16>
    %1 = vector.shape_cast %0 : vector<1x1x128x64xbf16> to vector<128x64xbf16>
    %c0_3 = arith.constant 0 : index
    %c0_4 = arith.constant 0 : index
    %c0_5 = arith.constant 0 : index
    %c0_6 = arith.constant 0 : index
    %2 = vector.load %arg7[%c0_3, %c0_4, %c0_5, %c0_6] : memref<1x1x128x64xbf16, #tpu.memory_space<vmem>>, vector<1x1x128x64xbf16>
    %3 = vector.shape_cast %2 : vector<1x1x128x64xbf16> to vector<128x64xbf16>
    %cst = arith.constant dense<0.000000e+00> : vector<128x128xf32>
    %4 = tpu.matmul %1, %3, %cst {dimension_numbers = #tpu.dot_dimension_numbers<[1], [1], [0], [0], [0, 0, 1, 0], [], []>} : vector<128x64xbf16>, vector<128x64xbf16>, vector<128x128xf32> -> vector<128x128xf32>
    %cst_7 = arith.constant 1.250000e-01 : f32
    %5 = vector.broadcast %cst_7 : f32 to vector<128x128xf32>
    %6 = arith.mulf %4, %5 : vector<128x128xf32>
    %c0_8 = arith.constant 0 : index
    %c0_9 = arith.constant 0 : index
    %c0_10 = arith.constant 0 : index
    %7 = vector.load %arg4[%c0_8, %c0_9, %c0_10] : memref<1x128x1xf32, #tpu.memory_space<vmem>>, vector<1x128x1xf32>
    %8 = vector.shape_cast %7 : vector<1x128x1xf32> to vector<128x1xf32>
    %c0_11 = arith.constant 0 : index
    %c0_12 = arith.constant 0 : index
    %c0_13 = arith.constant 0 : index
    %9 = vector.load %arg5[%c0_11, %c0_12, %c0_13] : memref<1x1x128xf32, #tpu.memory_space<vmem>>, vector<1x1x128xf32>
    %10 = vector.shape_cast %9 : vector<1x1x128xf32> to vector<1x128xf32>
    %11 = vector.broadcast %8 : vector<128x1xf32> to vector<128x128xf32>
    %12 = vector.broadcast %10 : vector<1x128xf32> to vector<128x128xf32>
    %13 = arith.mulf %11, %12 : vector<128x128xf32>
    %14 = arith.mulf %6, %13 : vector<128x128xf32>
    %cst_14 = arith.constant 1.000000e+00 : f32
    %15 = vector.broadcast %cst_14 : f32 to vector<128x128xf32>
    %16 = arith.subf %15, %13 : vector<128x128xf32>
    %cst_15 = arith.constant 9.99999995E+11 : f32
    %17 = vector.broadcast %cst_15 : f32 to vector<128x128xf32>
    %18 = arith.mulf %16, %17 : vector<128x128xf32>
    %19 = arith.subf %14, %18 : vector<128x128xf32>
    %20 = tpu.iota {dimensions = array<i32: 0>} : vector<128x128xi32>
    %c128_i32 = arith.constant 128 : i32
    %21 = arith.muli %arg2, %c128_i32 : i32
    %22 = vector.broadcast %21 : i32 to vector<128x128xi32>
    %23 = arith.addi %20, %22 : vector<128x128xi32>
    %24 = tpu.iota {dimensions = array<i32: 1>} : vector<128x128xi32>
    %c128_i32_16 = arith.constant 128 : i32
    %25 = arith.muli %arg3, %c128_i32_16 : i32
    %26 = vector.broadcast %25 : i32 to vector<128x128xi32>
    %27 = arith.addi %24, %26 : vector<128x128xi32>
    %28 = arith.cmpi sgt, %23, %27 : vector<128x128xi32>
    %29 = arith.extui %28 : vector<128x128xi1> to vector<128x128xi32>
    %30 = arith.sitofp %29 : vector<128x128xi32> to vector<128x128xf32>
    %cst_17 = arith.constant 9.99999995E+11 : f32
    %31 = vector.broadcast %cst_17 : f32 to vector<128x128xf32>
    %32 = arith.mulf %30, %31 : vector<128x128xf32>
    %33 = arith.subf %19, %32 : vector<128x128xf32>
    %c0_18 = arith.constant 0 : index
    %c0_19 = arith.constant 0 : index
    %c0_20 = arith.constant 0 : index
    %c0_21 = arith.constant 0 : index
    %34 = vector.load %arg8[%c0_18, %c0_19, %c0_20, %c0_21] : memref<1x1x128x128xf32, #tpu.memory_space<vmem>>, vector<1x1x128x128xf32>
    %35 = vector.shape_cast %34 : vector<1x1x128x128xf32> to vector<128x128xf32>
    %36 = vector.shape_cast %33 : vector<128x128xf32> to vector<1x1x128x128xf32>
    tpu.vector_store %arg8[%c0_18, %c0_19, %c0_20, %c0_21], %36 {strides = array<i32>} : memref<1x1x128x128xf32, #tpu.memory_space<vmem>>, vector<1x1x128x128xf32>,
    return
  }
  func.func @transform_0(%arg0: i32, %arg1: i32, %arg2: i32, %arg3: i32) -> (i32, i32, i32) {
    %c0_i32 = arith.constant 0 : i32
    %c0_i32_0 = arith.constant 0 : i32
    return %arg0, %arg2, %c0_i32 : i32, i32, i32
  }
  func.func @transform_1(%arg0: i32, %arg1: i32, %arg2: i32, %arg3: i32) -> (i32, i32, i32) {
    %c0_i32 = arith.constant 0 : i32
    %c0_i32_0 = arith.constant 0 : i32
    return %arg0, %c0_i32, %arg3 : i32, i32, i32
  }
  func.func @transform_2(%arg0: i32, %arg1: i32, %arg2: i32, %arg3: i32) -> (i32, i32, i32, i32) {
    %c0_i32 = arith.constant 0 : i32
    %c0_i32_0 = arith.constant 0 : i32
    return %arg0, %arg1, %arg2, %c0_i32 : i32, i32, i32, i32
  }
  func.func @transform_3(%arg0: i32, %arg1: i32, %arg2: i32, %arg3: i32) -> (i32, i32, i32, i32) {
    %c0_i32 = arith.constant 0 : i32
    %c0_i32_0 = arith.constant 0 : i32
    return %arg0, %arg1, %arg3, %c0_i32 : i32, i32, i32, i32
  }
  func.func @transform_4(%arg0: i32, %arg1: i32, %arg2: i32, %arg3: i32) -> (i32, i32, i32, i32) {
    %c0_i32 = arith.constant 0 : i32
    return %arg0, %arg1, %arg2, %arg3 : i32, i32, i32, i32
  }
}

module attributes {stable_mosaic.version = 11 : i64} {
  func.func @_gp_kernel(%arg0: i32, %arg1: i32, %arg2: i32, %arg3: i32, %arg4: memref<1x128x1xf32, #tpu.memory_space<vmem>>, %arg5: memref<1x1x128xf32, #tpu.memory_space<vmem>>, %arg6: memref<1x1x128x64xbf16, #tpu.memory_space<vmem>>, %arg7: memref<1x1x128x64xbf16, #tpu.memory_space<vmem>>, %arg8: memref<1x1x128x128xf32, #tpu.memory_space<vmem>>) attributes {dimension_semantics = [#tpu.dimension_semantics<parallel>, #tpu.dimension_semantics<parallel>, #tpu.dimension_semantics<parallel>, #tpu.dimension_semantics<parallel>], iteration_bounds = array<i64: 2, 6, 1, 1>, scalar_prefetch = 0 : i64, scratch_operands = 0 : i64, tpu.core_type = #tpu.core_type<tc>, window_params = [{transform_indices = @transform_0, window_bounds = array<i64: 1, 128, 1>}, {transform_indices = @transform_1, window_bounds = array<i64: 1, 1, 128>}, {transform_indices = @transform_2, window_bounds = array<i64: 1, 1, 128, 64>}, {transform_indices = @transform_3, window_bounds = array<i64: 1, 1, 128, 64>}, {transform_indices = @transform_4, window_bounds = array<i64: 1, 1, 128, 128>}]} {
    %c0 = arith.constant 0 : index
    %c0_0 = arith.constant 0 : index
    %c0_1 = arith.constant 0 : index
    %c0_2 = arith.constant 0 : index
    %0 = vector.load %arg6[%c0, %c0_0, %c0_1, %c0_2] : memref<1x1x128x64xbf16, #tpu.memory_space<vmem>>, vector<1x1x128x64xbf16>
    %1 = vector.shape_cast %0 : vector<1x1x128x64xbf16> to vector<128x64xbf16>
    %c0_3 = arith.constant 0 : index
    %c0_4 = arith.constant 0 : index
    %c0_5 = arith.constant 0 : index
    %c0_6 = arith.constant 0 : index
    %2 = vector.load %arg7[%c0_3, %c0_4, %c0_5, %c0_6] : memref<1x1x128x64xbf16, #tpu.memory_space<vmem>>, vector<1x1x128x64xbf16>
    %3 = vector.shape_cast %2 : vector<1x1x128x64xbf16> to vector<128x64xbf16>
    %cst = arith.constant dense<0.000000e+00> : vector<128x128xf32>
    %4 = tpu.matmul %1, %3, %cst {dimension_numbers = #tpu.dot_dimension_numbers<[1], [1], [0], [0], [0, 0, 1, 0], [], []>} : vector<128x64xbf16>, vector<128x64xbf16>, vector<128x128xf32> -> vector<128x128xf32>
    %cst_7 = arith.constant 1.250000e-01 : f32
    %5 = vector.broadcast %cst_7 : f32 to vector<128x128xf32>
    %6 = arith.mulf %4, %5 : vector<128x128xf32>
    %c0_8 = arith.constant 0 : index
    %c0_9 = arith.constant 0 : index
    %c0_10 = arith.constant 0 : index
    %7 = vector.load %arg4[%c0_8, %c0_9, %c0_10] : memref<1x128x1xf32, #tpu.memory_space<vmem>>, vector<1x128x1xf32>
    %8 = vector.shape_cast %7 : vector<1x128x1xf32> to vector<128x1xf32>
    %c0_11 = arith.constant 0 : index
    %c0_12 = arith.constant 0 : index
    %c0_13 = arith.constant 0 : index
    %9 = vector.load %arg5[%c0_11, %c0_12, %c0_13] : memref<1x1x128xf32, #tpu.memory_space<vmem>>, vector<1x1x128xf32>
    %10 = vector.shape_cast %9 : vector<1x1x128xf32> to vector<1x128xf32>
    %11 = vector.broadcast %8 : vector<128x1xf32> to vector<128x128xf32>
    %12 = vector.broadcast %10 : vector<1x128xf32> to vector<128x128xf32>
    %13 = arith.mulf %11, %12 : vector<128x128xf32>
    %14 = arith.mulf %6, %13 : vector<128x128xf32>
    %cst_14 = arith.constant 1.000000e+00 : f32
    %15 = vector.broadcast %cst_14 : f32 to vector<128x128xf32>
    %16 = arith.subf %15, %13 : vector<128x128xf32>
    %cst_15 = arith.constant 9.99999995E+11 : f32
    %17 = vector.broadcast %cst_15 : f32 to vector<128x128xf32>
    %18 = arith.mulf %16, %17 : vector<128x128xf32>
    %19 = arith.subf %14, %18 : vector<128x128xf32>
    %c0_16 = arith.constant 0 : index
    %c0_17 = arith.constant 0 : index
    %c0_18 = arith.constant 0 : index
    %c0_19 = arith.constant 0 : index
    %20 = vector.load %arg8[%c0_16, %c0_17, %c0_18, %c0_19] : memref<1x1x128x128xf32, #tpu.memory_space<vmem>>, vector<1x1x128x128xf32>
    %21 = vector.shape_cast %20 : vector<1x1x128x128xf32> to vector<128x128xf32>
    %22 = vector.shape_cast %19 : vector<128x128xf32> to vector<1x1x128x128xf32>
    tpu.vector_store %arg8[%c0_16, %c0_17, %c0_18, %c0_19], %22 {strides = array<i32>} : memref<1x1x128x128xf32, #tpu.memory_space<vmem>>, vector<1x1x128x128xf32>,
    return
  }
  func.func @transform_0(%arg0: i32, %arg1: i32, %arg2: i32, %arg3: i32) -> (i32, i32, i32) {
    %c0_i32 = arith.constant 0 : i32
    %c0_i32_0 = arith.constant 0 : i32
    return %arg0, %arg2, %c0_i32 : i32, i32, i32
  }
  func.func @transform_1(%arg0: i32, %arg1: i32, %arg2: i32, %arg3: i32) -> (i32, i32, i32) {
    %c0_i32 = arith.constant 0 : i32
    %c0_i32_0 = arith.constant 0 : i32
    return %arg0, %c0_i32, %arg3 : i32, i32, i32
  }
  func.func @transform_2(%arg0: i32, %arg1: i32, %arg2: i32, %arg3: i32) -> (i32, i32, i32, i32) {
    %c0_i32 = arith.constant 0 : i32
    %c0_i32_0 = arith.constant 0 : i32
    return %arg0, %arg1, %arg2, %c0_i32 : i32, i32, i32, i32
  }
  func.func @transform_3(%arg0: i32, %arg1: i32, %arg2: i32, %arg3: i32) -> (i32, i32, i32, i32) {
    %c0_i32 = arith.constant 0 : i32
    %c0_i32_0 = arith.constant 0 : i32
    return %arg0, %arg1, %arg3, %c0_i32 : i32, i32, i32, i32
  }
  func.func @transform_4(%arg0: i32, %arg1: i32, %arg2: i32, %arg3: i32) -> (i32, i32, i32, i32) {
    %c0_i32 = arith.constant 0 : i32
    return %arg0, %arg1, %arg2, %arg3 : i32, i32, i32, i32
  }
}

</mosaic_0001>

<bundles_post_ra>
// kernel: _lambda_.13
= control target key start
LH: loop header
LB: loop body
LE: loop exit
PB: predicated region body
PF: predicated region fallthrough
CT: control target
= control target key end

     0   :  { %s1329_s12 = smov 0   ;;  %s1331_s13 = smov 0   ;;  %s1520_s0 = inlined_call_operand.vmem [shape: bf16[256,128], index: 0, kind: input, shape index: {}]   ;;  %s1521_s1 = inlined_call_operand.vmem [shape: bf16[128,384], index: 1, kind: input, shape index: {}]   ;;  %s1522_s2 = inlined_call_operand.vmem [shape: f32[1,384], index: 2, kind: input, shape index: {}]   ;;  %s1523_s3 = inlined_call_operand.vmem [shape: bf16[256,384], index: 3, kind: output, shape index: {}]  }
   0x1   :  { %s1333_s14 = smov 0   ;;  %s1335_s15 = smov 0  }
   0x2   :  { %s1337_s16 = smov 0   ;;  %s1339_s17 = smov 0  }
   0x3   :  { %s1341_s18 = smov 0   ;;  %s1343_s19 = smov 0  }
   0x4   :  { %s1345_s20 = smov 0  }
   0x5 LB: > { %s971_s21 = sadd.s32 4294967295, %s1307_s20   ;;  %s28_s22 = sadd.s32 1, %s1299_s18  ;;  %s1307_s20 = sphi %s1345_s20, %s13_s20   ;;  %s1303_s19 = sphi %s1343_s19, %s1532_s19   ;;  %s1299_s18 = sphi %s1341_s18, %s1531_s18   ;;  %s1295_s17 = sphi %s1339_s17, %s1530_s17   ;;  %s1291_s16 = sphi %s1337_s16, %s1529_s16   ;;  %s1287_s15 = sphi %s1335_s15, %s1528_s15   ;;  %s1283_s14 = sphi %s1333_s14, %s1527_s14   ;;  %s1279_s13 = sphi %s1331_s13, %s1526_s13   ;;  %s1275_s12 = sphi %s1329_s12, %s1525_s12  }
   0x6   : > { %p30_p0 = scmp.ge.s32.totalorder %s28_s22, 3  ;;  %s32_s23 = sadd.s32 1, %s1303_s19 }
   0x7   : > { %s69_s24 = sadd.s32 1, %s1287_s15  ;;  %p76_p1 = scmp.ne.s32.totalorder %s1287_s15, %s1283_s14 }
   0x8   : > { %s1534_s22 = smov (%p30_p0, %s28_s22), 0  ;;  %s1536_s23 = smov (!%p30_p0, %s32_s23), %s1303_s19 }
   0x9   : > { %s65_s25 = ssub.s32 %s1299_s18, %s1534_s22  ;;  %p77_p2 = scmp.eq.s32.totalorder %s1307_s20, 0 }
   0xa   : > { %p34_p3 = scmp.ge.s32.totalorder %s1536_s23, 2  ;;  %p67_p4 = scmp.eq.s32.totalorder %s65_s25, 0 }
   0xb   : > { %p78_p5 = por %p77_p2, %p76_p1  ;;  %s123_s26 = sadd.s32 1, %s1279_s13 }
   0xc   : > { %s1538_s23 = smov (%p34_p3, %s1536_s23), 0  ;;  %p133_p6 = scmp.ne.s32.totalorder %s1279_s13, %s1275_s12 }
   0xd   : > { %s1390_s27 = scalar_select %p67_p4, %s1287_s15, %s69_s24  }
   0xe   : > { %s118_s28 = ssub.s32 %s1303_s19, %s1538_s23  ;;  %p134_p7 = scmp.eq.s32.totalorder %s971_s21, 5 }
   0xf   : > { %s120_s29 = sor.u32 %s118_s28, %s65_s25  ;;  %p974_p10 = scmp.ge.s32.totalorder %s1307_s20, 6 }
  0x10   : > { %p121_p8 = scmp.eq.s32.totalorder %s120_s29, 0  ;;  %p1396_p9 = por %p134_p7, %p133_p6 }
  0x11   : > { %156 = sbr.rel (%p974_p10) target bundleno = 36 (0x24), region = 16 }
  0x12   : > { %s1401_s4 = scalar_select %p121_p8, %s1279_s13, %s123_s26  }
  0x16   : > { %171 = sbr.rel (!%p78_p5) target bundleno = 36 (0x24), region = 24  ;;  %s173_s5 = sand.u32 (%p78_p5), 1, %s1287_s15  }
  0x17   : > { %s976_s6 = sshll.u32 (%p78_p5), %s1299_s18, 2  ;;  %s975_s7 = sshll.u32 (%p78_p5), %s173_s5, 6 }
  0x18   : > { %s1409_s10 = scalar_lea.vmem (%p78_p5), %s1521_s1, %s976_s6  ;;  %s175_s11 = scalar_lea.vmem (%p78_p5), [#allocation3], %s975_s7 }
  0x19   : > { %v197_v0 = vld [vmem:[%s1409_s10] sm:$0xf] (%p78_p5)  ;;  %v199_v1 = vld [vmem:[%s1409_s10 + $0xc] sm:$0xf] (%p78_p5)  ;;  %v201_v2 = vld [vmem:[%s1409_s10 + $0x18] sm:$0xf] (%p78_p5) }
  0x1a   : > { %198 = vst [vmem:[%s175_s11] sm:$0xf] (%p78_p5), %v197_v0  ;;  %200 = vst [vmem:[%s175_s11 + $0x4] sm:$0xf] (%p78_p5), %v199_v1  ;;  %v203_v3 = vld [vmem:[%s1409_s10 + $0x24] sm:$0xf] (%p78_p5) }
  0x1b   : > { %v205_v4 = vld [vmem:[%s1409_s10 + $0x30] sm:$0xf]  ;;  %202 = vst [vmem:[%s175_s11 + $0x8] sm:$0xf] %v201_v2  ;;  %204 = vst [vmem:[%s175_s11 + $0xc] sm:$0xf] %v203_v3 }
  0x1c   : > { %206 = vst [vmem:[%s175_s11 + $0x10] sm:$0xf] %v205_v4  ;;  %v207_v5 = vld [vmem:[%s1409_s10 + $0x3c] sm:$0xf]  ;;  %v209_v6 = vld [vmem:[%s1409_s10 + $0x48] sm:$0xf] }
  0x1d   : > { %v211_v7 = vld [vmem:[%s1409_s10 + $0x54] sm:$0xf]  ;;  %208 = vst [vmem:[%s175_s11 + $0x14] sm:$0xf] %v207_v5  ;;  %210 = vst [vmem:[%s175_s11 + $0x18] sm:$0xf] %v209_v6 }
  0x1e   : > { %212 = vst [vmem:[%s175_s11 + $0x1c] sm:$0xf] %v211_v7  ;;  %v213_v8 = vld [vmem:[%s1409_s10 + $0x60] sm:$0xf]  ;;  %v215_v9 = vld [vmem:[%s1409_s10 + $0x6c] sm:$0xf] }
  0x1f   : > { %v217_v10 = vld [vmem:[%s1409_s10 + $0x78] sm:$0xf]  ;;  %214 = vst [vmem:[%s175_s11 + $0x20] sm:$0xf] %v213_v8  ;;  %216 = vst [vmem:[%s175_s11 + $0x24] sm:$0xf] %v215_v9 }
  0x20   : > { %218 = vst [vmem:[%s175_s11 + $0x28] sm:$0xf] %v217_v10  ;;  %v219_v11 = vld [vmem:[%s1409_s10 + $0x84] sm:$0xf]  ;;  %v221_v12 = vld [vmem:[%s1409_s10 + $0x90] sm:$0xf] }
  0x21   : > { %v223_v13 = vld [vmem:[%s1409_s10 + $0x9c] sm:$0xf]  ;;  %220 = vst [vmem:[%s175_s11 + $0x2c] sm:$0xf] %v219_v11  ;;  %222 = vst [vmem:[%s175_s11 + $0x30] sm:$0xf] %v221_v12 }
  0x22   : > { %224 = vst [vmem:[%s175_s11 + $0x34] sm:$0xf] %v223_v13  ;;  %v225_v14 = vld [vmem:[%s1409_s10 + $0xa8] sm:$0xf]  ;;  %v227_v15 = vld [vmem:[%s1409_s10 + $0xb4] sm:$0xf] }
  0x23   : > { %226 = vst [vmem:[%s175_s11 + $0x38] sm:$0xf] %v225_v14  ;;  %228 = vst [vmem:[%s175_s11 + $0x3c] sm:$0xf] %v227_v15 }
  0x24 PF: > { %p977_p11 = scmp.ge.s32.totalorder %s1307_s20, 1  ;;  %p289_p12 = scmp.lt.s32.totalorder %s1307_s20, 7 }
  0x26   : > { %p290_p13 = pnand %p977_p11, %p289_p12 }
  0x27   : > { %s296_s21 = sand.u32 (!%p290_p13), 1, %s1283_s14   ;;  %s980_s24 = sshll.u32 (!%p290_p13), %s1295_s17, 4 }
  0x28   : > { %293 = sbr.rel (%p290_p13) target bundleno = 300 (0x12c), region = 69  ;;  %s978_s25 = sshll.u32 (!%p290_p13), %s296_s21, 6 }
  0x29   : > { %p330_p0 = scmp.lt.s32.totalorder (!%p290_p13), %s980_s24, 31  ;;  %s1431_s26 = scalar_lea.vmem (!%p290_p13), [#allocation3], %s978_s25 }
  0x2a   : > { %p339_p1 = scmp.lt.s32.totalorder (!%p290_p13), %s1291_s16, 2  ;;  %s326_s10 = sand.u32 (!%p290_p13), 1, %s1275_s12  }
  0x2b   : > { %s979_s11 = sshll.u32 (!%p290_p13), %s326_s10, 6 }
  0x2c   : > { %s1460_s12 = scalar_lea.vmem (!%p290_p13), [#allocation4], %s979_s11 }
  0x2d   : > { %v1221_v16 = vld [vmem:[%s1431_s26 + $0x38] sm:$0xff]   ;;  %s1540_s24 = smov (!%p330_p0, %s980_s24), 31  ;;  %v1222_v17 = vld [vmem:[%s1431_s26 + $0x30] sm:$0xff]   ;;  %v1223_v18 = vld [vmem:[%s1431_s26 + $0x28] sm:$0xff]   ;;  %s1148_s21 = smul.u32 (%p1396_p9), 48, %s1295_s17 }
  0x2e   : > { %1100 = vmatprep.subr.bf16.mxu0 %v1221_v16  ;;  %1132 = vmatprep.subr.bf16.mxu1 %v1221_v16  ;;  %s981_s28 = sshll.u32 %s1540_s24, 2  ;;  %v1224_v19 = vld [vmem:[%s1431_s26 + $0x20] sm:$0xff]   ;;  %v1225_v22 = vld [vmem:[%s1431_s26 + $0x18] sm:$0xff]   ;;  %v1226_v23 = vld [vmem:[%s1431_s26 + $0x10] sm:$0xff]  }
  0x2f   : > { %1101 = vmatpush3.bf16.msra.mxu0 %v1221_v16  ;;  %1140 = vmatpush3.bf16.msra.mxu1 %v1221_v16  ;;  %s1439_s5 = scalar_lea.vmem %s1520_s0, %s981_s28  ;;  %v1227_v24 = vld [vmem:[%s1431_s26 + $0x8] sm:$0xff]   ;;  %v1228_v25 = vld [vmem:[%s1431_s26] sm:$0xff]   ;;  %s768_s30 = sadd.s32 (%p1396_p9), %s1291_s16, %s1148_s21 }
  0x30   : > { %1102 = vmatprep.subr.bf16.mxu0 %v1222_v17  ;;  %1133 = vmatprep.subr.bf16.mxu1 %v1222_v17  ;;  %v1229_v20 = vld [vmem:[%s1439_s5] sm:$0xff]   ;;  %v1231_v26 = vld [vmem:[%s1439_s5 + $0x8] sm:$0xff]   ;;  %v1233_v28 = vld [vmem:[%s1439_s5 + $0x10] sm:$0xff]   ;;  %s340_s6 = scalar_select %p339_p1, %s1291_s16, 2 }
  0x31   : > { %v1230_v21 = vld [vmem:[%s1439_s5 + $0x20] sm:$0xff]   ;;  %1116 = vmatprep.mubr.bf16.mxu0 %v1229_v20  ;;  %v1232_v27 = vld [vmem:[%s1439_s5 + $0x28] sm:$0xff]   ;;  %v1234_v29 = vld [vmem:[%s1439_s5 + $0x30] sm:$0xff]   ;;  %s1018_s24 = sshll.u32 (%p1396_p9), %s768_s30, 2 }
  0x32   : > { %1124 = vmatprep.mubr.bf16.mxu1 %v1230_v21  ;;  %v1235_v30 = vld [vmem:[%s1439_s5 + $0x18] sm:$0xff]   ;;  %s341_s9 = scalar_lea.vmem %s1522_s2, %s340_s6  ;;  %s770_s28 = scalar_lea.vmem (%p1396_p9), %s1523_s3, %s1018_s24 }
  0x33   : > { %1103 = vmatpush3.bf16.msra.mxu0 %v1222_v17  ;;  %1141 = vmatpush3.bf16.msra.mxu1 %v1222_v17  ;;  %v1236_v31 = vld [vmem:[%s1439_s5 + $0x38] sm:$0xff]   ;;  %v998_v34 = vld [vmem:[%s341_s9] ss:$0 sm:$0xff] }
  0x34   : > { %1104 = vmatprep.subr.bf16.mxu0 %v1223_v18  ;;  %1134 = vmatprep.subr.bf16.mxu1 %v1223_v18 }
  0x37   : > { %1105 = vmatpush3.bf16.msra.mxu0 %v1223_v18  ;;  %1142 = vmatpush3.bf16.msra.mxu1 %v1223_v18 }
  0x38   : > { %1106 = vmatprep.subr.bf16.mxu0 %v1224_v19  ;;  %1135 = vmatprep.subr.bf16.mxu1 %v1224_v19 }
  0x3b   : > { %1107 = vmatpush3.bf16.msra.mxu0 %v1224_v19  ;;  %1143 = vmatpush3.bf16.msra.mxu1 %v1224_v19 }
  0x3c   : > { %1108 = vmatprep.subr.bf16.mxu0 %v1225_v22  ;;  %1136 = vmatprep.subr.bf16.mxu1 %v1225_v22 }
  0x3f   : > { %1109 = vmatpush3.bf16.msra.mxu0 %v1225_v22  ;;  %1144 = vmatpush3.bf16.msra.mxu1 %v1225_v22 }
  0x40   : > { %1110 = vmatprep.subr.bf16.mxu0 %v1226_v23  ;;  %1137 = vmatprep.subr.bf16.mxu1 %v1226_v23 }
  0x43   : > { %1111 = vmatpush3.bf16.msra.mxu0 %v1226_v23  ;;  %1145 = vmatpush3.bf16.msra.mxu1 %v1226_v23 }
  0x44   : > { %1112 = vmatprep.subr.bf16.mxu0 %v1227_v24  ;;  %1138 = vmatprep.subr.bf16.mxu1 %v1227_v24 }
  0x47   : > { %1113 = vmatpush3.bf16.msra.mxu0 %v1227_v24  ;;  %1146 = vmatpush3.bf16.msra.mxu1 %v1227_v24 }
  0x48   : > { %1114 = vmatprep.subr.bf16.mxu0 %v1228_v25  ;;  %1139 = vmatprep.subr.bf16.mxu1 %v1228_v25 }
  0x4b   : > { %1115 = vmatpush3.bf16.msra.mxu0 %v1228_v25  ;;  %1147 = vmatpush3.bf16.msra.mxu1 %v1228_v25 }
  0x4e   : > { %1117 = vmatmul.mubr.bf16.vlgmr.msra.gmra.mxu0 %v1231_v26  ;;  %1125 = vmatmul.mubr.bf16.vlgmr.msra.gmra.mxu1 %v1232_v27 }
  0x4f   : > { %1120 = vmatprep.mubr.bf16.mxu0 %v1233_v28  ;;  %1128 = vmatprep.mubr.bf16.mxu1 %v1234_v29 }
  0x56   : > { %1121 = vmatmul.mubr.bf16.gmra.mxu0 %v1235_v30  ;;  %1129 = vmatmul.mubr.bf16.gmra.mxu1 %v1236_v31 }
 0x10e   : > { %v1118_v32 = vpop.f32.mrf.mxu0  ;;  %v1126_v33 = vpop.f32.mrf.mxu1 }
 0x10f   : > { %v665_v39 = vadd.f32 %v1118_v32, %v998_v34  ;;  %v673_v40 = vadd.f32 %v1126_v33, %v998_v34 }
 0x110   : > { %v542_v35 = vpop.f32.mrf.mxu0  ;;  %v574_v36 = vpop.f32.mrf.mxu1 }
 0x111   : > { %v663_v43 = vadd.f32 %v998_v34, %v542_v35  ;;  %v671_v44 = vadd.f32 %v998_v34, %v574_v36 }
 0x112   : > { %v1119_v37 = vpop.f32.mrf.mxu0  ;;  %v1127_v38 = vpop.f32.mrf.mxu1 }
 0x113   : > { %v666_v41 = vadd.f32 %v1119_v37, %v998_v34  ;;  %v674_v42 = vadd.f32 %v1127_v38, %v998_v34 }
 0x114   : > { %v545_v45 = vpop.f32.mrf.mxu0  ;;  %v577_v46 = vpop.f32.mrf.mxu1 }
 0x115   : > { %v1045_v47 = vpack.c.bf16 %v666_v41, %v665_v39  ;;  %v1065_v48 = vpack.c.bf16 %v674_v42, %v673_v40  ;;  %v664_v49 = vadd.f32 %v998_v34, %v545_v45  ;;  %v672_v50 = vadd.f32 %v998_v34, %v577_v46 }
 0x116   : > { %v1122_v51 = vpop.f32.mrf.mxu0  ;;  %v1130_v52 = vpop.f32.mrf.mxu1 }
 0x117   : > { %1077 = vst [vmem:[%s1460_s12 + $0x8] sm:$0xff] %v1045_v47   ;;  %1081 = vst [vmem:[%s1460_s12 + $0x28] sm:$0xff] %v1065_v48   ;;  %v1040_v53 = vpack.c.bf16 %v664_v49, %v663_v43  ;;  %v1060_v54 = vpack.c.bf16 %v672_v50, %v671_v44  ;;  %v669_v59 = vadd.f32 %v1122_v51, %v998_v34 }
 0x118   : > { %v558_v55 = vpop.f32.mrf.mxu0  ;;  %v590_v56 = vpop.f32.mrf.mxu1  ;;  %v677_v60 = vadd.f32 %v1130_v52, %v998_v34 }
 0x119   : > { %1041 = vst [vmem:[%s1460_s12] sm:$0xff] %v1040_v53   ;;  %1080 = vst [vmem:[%s1460_s12 + $0x20] sm:$0xff] %v1060_v54   ;;  %v667_v63 = vadd.f32 %v998_v34, %v558_v55  ;;  %v675_v0 = vadd.f32 %v998_v34, %v590_v56 }
 0x11a   : > { %v1123_v57 = vpop.f32.mrf.mxu0  ;;  %v1131_v58 = vpop.f32.mrf.mxu1 }
 0x11b   : > { %v670_v61 = vadd.f32 %v1123_v57, %v998_v34  ;;  %v678_v62 = vadd.f32 %v1131_v58, %v998_v34 }
 0x11c   : > { %v561_v1 = vpop.f32.mrf.mxu0  ;;  %v593_v2 = vpop.f32.mrf.mxu1 }
 0x11d   : > { %v1055_v3 = vpack.c.bf16 %v670_v61, %v669_v59  ;;  %v1075_v4 = vpack.c.bf16 %v678_v62, %v677_v60  ;;  %v668_v5 = vadd.f32 %v998_v34, %v561_v1  ;;  %v676_v6 = vadd.f32 %v998_v34, %v593_v2  ;;  %765 = sbr.rel (!%p1396_p9) target bundleno = 300 (0x12c), region = 85 }
 0x11e   : > { %v791_v11 = vld [vmem:[%s1460_s12 + $0x8] sm:$0xf] (%p1396_p9)  ;;  %v793_v12 = vld [vmem:[%s1460_s12 + $0xc] sm:$0xf] (%p1396_p9) }
 0x11f   : > { %1079 = vst [vmem:[%s1460_s12 + $0x18] sm:$0xff] %v1055_v3   ;;  %1083 = vst [vmem:[%s1460_s12 + $0x38] sm:$0xff] %v1075_v4   ;;  %v1050_v7 = vpack.c.bf16 %v668_v5, %v667_v63  ;;  %v1070_v8 = vpack.c.bf16 %v676_v6, %v675_v0  ;;  %v807_v19 = vld [vmem:[%s1460_s12 + $0x28] sm:$0xf] (%p1396_p9)  ;;  %v809_v20 = vld [vmem:[%s1460_s12 + $0x2c] sm:$0xf] (%p1396_p9) }
 0x120   : > { %v787_v9 = vld [vmem:[%s1460_s12] sm:$0xf] (%p1396_p9)  ;;  %v789_v10 = vld [vmem:[%s1460_s12 + $0x4] sm:$0xf] (%p1396_p9)  ;;  %792 = vst [vmem:[%s770_s28 + $0x18] sm:$0xf] (%p1396_p9), %v791_v11 }
 0x121   : > { %1078 = vst [vmem:[%s1460_s12 + $0x10] sm:$0xff] %v1050_v7   ;;  %1082 = vst [vmem:[%s1460_s12 + $0x30] sm:$0xff] %v1070_v8   ;;  %v803_v17 = vld [vmem:[%s1460_s12 + $0x20] sm:$0xf] (%p1396_p9)  ;;  %v805_v18 = vld [vmem:[%s1460_s12 + $0x24] sm:$0xf] (%p1396_p9) }
 0x122   : > { %788 = vst [vmem:[%s770_s28] sm:$0xf] %v787_v9  ;;  %790 = vst [vmem:[%s770_s28 + $0xc] sm:$0xf] %v789_v10 }
 0x123   : > { %794 = vst [vmem:[%s770_s28 + $0x24] sm:$0xf] %v793_v12  ;;  %804 = vst [vmem:[%s770_s28 + $0x60] sm:$0xf] %v803_v17 }
 0x124   : > { %806 = vst [vmem:[%s770_s28 + $0x6c] sm:$0xf] %v805_v18  ;;  %808 = vst [vmem:[%s770_s28 + $0x78] sm:$0xf] %v807_v19 }
 0x125   : > { %810 = vst [vmem:[%s770_s28 + $0x84] sm:$0xf] %v809_v20 }
 0x126   : > { %v799_v15 = vld [vmem:[%s1460_s12 + $0x18] sm:$0xf]  ;;  %v801_v16 = vld [vmem:[%s1460_s12 + $0x1c] sm:$0xf] }
 0x127   : > { %800 = vst [vmem:[%s770_s28 + $0x48] sm:$0xf] %v799_v15  ;;  %802 = vst [vmem:[%s770_s28 + $0x54] sm:$0xf] %v801_v16  ;;  %v815_v23 = vld [vmem:[%s1460_s12 + $0x38] sm:$0xf] }
 0x128   : > { %v795_v13 = vld [vmem:[%s1460_s12 + $0x10] sm:$0xf]  ;;  %v797_v14 = vld [vmem:[%s1460_s12 + $0x14] sm:$0xf]  ;;  %v817_v24 = vld [vmem:[%s1460_s12 + $0x3c] sm:$0xf] }
 0x129   : > { %v811_v21 = vld [vmem:[%s1460_s12 + $0x30] sm:$0xf]  ;;  %796 = vst [vmem:[%s770_s28 + $0x30] sm:$0xf] %v795_v13  ;;  %798 = vst [vmem:[%s770_s28 + $0x3c] sm:$0xf] %v797_v14 }
 0x12a   : > { %812 = vst [vmem:[%s770_s28 + $0x90] sm:$0xf] %v811_v21  ;;  %v813_v22 = vld [vmem:[%s1460_s12 + $0x34] sm:$0xf]  ;;  %816 = vst [vmem:[%s770_s28 + $0xa8] sm:$0xf] %v815_v23 }
 0x12b   : > { %814 = vst [vmem:[%s770_s28 + $0x9c] sm:$0xf] %v813_v22  ;;  %818 = vst [vmem:[%s770_s28 + $0xb4] sm:$0xf] %v817_v24 }
 0x12c PF: > { %s13_s20 = sadd.s32 1, %s1307_s20   ;;  %s1525_s12 = smov %s1279_s13 }
 0x12d   : > { %p10_p2 = scmp.ge.s32.totalorder %s13_s20, 8   ;;  %s1526_s13 = smov %s1401_s4 }
 0x12e   : > { %s1527_s14 = smov %s1287_s15  ;;  %s1528_s15 = smov %s1390_s27 }
 0x12f   : > { %s1529_s16 = smov %s1299_s18  ;;  %s1530_s17 = smov %s1303_s19 }
 0x130   : > { %s1531_s18 = smov %s1534_s22  ;;  %s1532_s19 = smov %s1538_s23 }
 0x131   :  { %12 = sbr.rel (!%p10_p2) target bundleno = 5 (0x5), region = 163 }

// kernel: _lambda_.14
= control target key start
LH: loop header
LB: loop body
LE: loop exit
PB: predicated region body
PF: predicated region fallthrough
CT: control target
= control target key end

     0   :  { %s2246_s15 = smov 0   ;;  %s2248_s16 = smov 0   ;;  %s2818_s0 = inlined_call_operand.vmem [shape: f32[2,1,128], index: 0, kind: input, shape index: {}]   ;;  %s2819_s1 = inlined_call_operand.vmem [shape: bf16[2,2,128,64], index: 1, kind: input, shape index: {}]   ;;  %s2820_s2 = inlined_call_operand.vmem [shape: bf16[2,2,128,64], index: 2, kind: input, shape index: {}]   ;;  %s2821_s3 = inlined_call_operand.vmem [shape: bf16[2,2,128,64], index: 3, kind: input, shape index: {}]   ;;  %s2822_s4 = inlined_call_operand.vmem [shape: bf16[2,2,128,64], index: 4, kind: output, shape index: {}]  }
   0x1   :  { %s2250_s17 = smov 0   ;;  %s2252_s18 = smov 0  }
   0x2   :  { %s2254_s19 = smov 0  }
   0x3 LB: > { %s36_s20 = sadd.s32 1, %s2208_s17  ;;  %s40_s21 = sadd.s32 1, %s2212_s18  ;;  %s2216_s19 = sphi %s2254_s19, %s14_s19   ;;  %s2212_s18 = sphi %s2252_s18, %s2840_s18   ;;  %s2208_s17 = sphi %s2250_s17, %s2839_s17   ;;  %s2204_s16 = sphi %s2248_s16, %s2838_s16   ;;  %s2200_s15 = sphi %s2246_s15, %s2837_s15  }
   0x4   : > { %p38_p0 = scmp.ge.s32.totalorder %s36_s20, 2  ;;  %p1830_p1 = scmp.ge.s32.totalorder %s2216_s19, 1 }
   0x5   : > { %p264_p2 = scmp.lt.s32.totalorder %s2216_s19, 5 }
   0x6   : > { %s2842_s20 = smov (%p38_p0, %s36_s20), 0  ;;  %s2844_s21 = smov (!%p38_p0, %s40_s21), %s2212_s18 }
   0x7   : > { %p265_p3 = pnand %p1830_p1, %p264_p2  ;;  %p42_p4 = scmp.ge.s32.totalorder %s2844_s21, 2 }
   0x8   : > { %p338_p5 = scmp.lt.s32.totalorder (!%p265_p3), %s2204_s16, 1  ;;  %p347_p6 = scmp.lt.s32.totalorder (!%p265_p3), %s2200_s15, 1 }
   0x9   : > { %s2846_s21 = smov (%p42_p4, %s2844_s21), 0  ;;  %268 = sbr.rel (%p265_p3) target bundleno = 904 (0x388), region = 36 }
   0xe   : > { %s2848_s16 = smov (!%p338_p5, %s2204_s16), 1  ;;  %s2850_s15 = smov (!%p347_p6, %s2200_s15), 1  ;;  %vm438_vm0 = vcmask 523264   ;;  %vm405_vm1 = vcmask 7168   ;;  %v2218_v24 = vmov -1e+30   ;;  %v733_v25 = vlaneseq }
   0xf   : > { %s1832_s22 = sshll.u32 %s2848_s16, 5  ;;  %s1831_s23 = sshll.u32 %s2850_s15, 4  ;;  %408 = vst.msk [vmem:[#allocation2 + $0x10] sm:$0xff] %vm405_vm1, %v2218_v24  ;;  %406 = vst.msk [vmem:[#allocation2] sm:$0xff] %vm405_vm1, %v2218_v24  ;;  %v2219_v55 = vmov 0   ;;  %vm1631_vm2 = vcmask 519168  }
  0x10   : > { %s354_s24 = sadd.s32 %s1832_s22, %s1831_s23  ;;  %407 = vst.msk [vmem:[#allocation2 + $0x8] sm:$0xff] %vm405_vm1, %v2218_v24  ;;  %409 = vst.msk [vmem:[#allocation2 + $0x18] sm:$0xff] %vm405_vm1, %v2218_v24  ;;  %s343_s8 = scalar_lea.vmem %s2818_s0, %s2848_s16  ;;  %v734_v28 = vshrl.u32 %v733_v25, 7  ;;  %2057 = vset.pattern.permute.xlu1 %v2219_v55  ;;  %2056 = vset.pattern.permute.xlu0 %v2219_v55 }
  0x11   : > { %s2279_s25 = sshll.u32 %s354_s24, 2  ;;  %410 = vst.msk [vmem:[#allocation2 + $0x20] sm:$0xff] %vm405_vm1, %v2218_v24  ;;  %411 = vst.msk [vmem:[#allocation2 + $0x28] sm:$0xff] %vm405_vm1, %v2218_v24  ;;  %v729_v26 = vld [vmem:[%s343_s8] sm:$0x1] }
  0x12   : > { %s2285_s28 = scalar_lea.vmem %s2820_s2, %s2279_s25  ;;  %s2296_s5 = scalar_lea.vmem %s2819_s1, %s2279_s25  ;;  %412 = vst.msk [vmem:[#allocation2 + $0x30] sm:$0xff] %vm405_vm1, %v2218_v24  ;;  %413 = vst.msk [vmem:[#allocation2 + $0x38] sm:$0xff] %vm405_vm1, %v2218_v24  ;;  %v730_v27 = vsub.f32 1.0, %v729_v26  ;;  %v735_v30 = vsub.s32 0, %v734_v28 }
  0x13   : > { %v2058_v0 = vld [vmem:[%s2285_s28 + $0x38] sm:$0xff]   ;;  %v2059_v1 = vld [vmem:[%s2285_s28 + $0x30] sm:$0xff]   ;;  %v2060_v3 = vld [vmem:[%s2285_s28 + $0x28] sm:$0xff]   ;;  %414 = vst.msk [vmem:[#allocation2 + $0x40] sm:$0xff] %vm405_vm1, %v2218_v24  ;;  %s2455_s11 = scalar_lea.vmem %s2821_s3, %s2279_s25  ;;  %s2769_s14 = scalar_lea.vmem %s2822_s4, %s2279_s25 }
  0x14   : > { %2005 = vmatprep.subr.msk.bf16.mxu0 %vm438_vm0, %v2058_v0  ;;  %v614_v2 = vsel %vm438_vm0, %v2058_v0, 0  ;;  %v611_v4 = vsel %vm438_vm0, %v2059_v1, 0  ;;  %v2066_v5 = vld [vmem:[%s2296_s5] sm:$0xff]   ;;  %v608_v6 = vsel %vm438_vm0, %v2060_v3, 0  ;;  %v2062_v9 = vld [vmem:[%s2285_s28 + $0x18] sm:$0xff]   ;;  %v2063_v11 = vld [vmem:[%s2285_s28 + $0x10] sm:$0xff]  }
  0x15   : > { %1942 = vmatpush3.bf16.xpose.msra.mxu0 %v614_v2  ;;  %1957 = vmatprep.mubr.msk.bf16.mxu0 %vm438_vm0, %v2066_v5  ;;  %v2061_v7 = vld [vmem:[%s2285_s28 + $0x20] sm:$0xff]   ;;  %v602_v10 = vsel %vm438_vm0, %v2062_v9, 0  ;;  %v599_v12 = vsel %vm438_vm0, %v2063_v11, 0  ;;  %v2064_v13 = vld [vmem:[%s2285_s28 + $0x8] sm:$0xff]   ;;  %v2068_v18 = vld [vmem:[%s2296_s5 + $0x10] sm:$0xff]   ;;  %415 = vst.msk [vmem:[#allocation2 + $0x48] sm:$0xff] %vm405_vm1, %v2218_v24 }
  0x16   : > { %2006 = vmatprep.subr.msk.bf16.mxu0 %vm438_vm0, %v2059_v1  ;;  %v605_v8 = vsel %vm438_vm0, %v2061_v7, 0  ;;  %v596_v14 = vsel %vm438_vm0, %v2064_v13, 0  ;;  %v2065_v15 = vld [vmem:[%s2285_s28] sm:$0xff]   ;;  %v2067_v17 = vld [vmem:[%s2296_s5 + $0x8] sm:$0xff]   ;;  %v2069_v19 = vld [vmem:[%s2296_s5 + $0x18] sm:$0xff]   ;;  %416 = vst.msk [vmem:[#allocation2 + $0x50] sm:$0xff] %vm405_vm1, %v2218_v24 }
  0x17   : > { %v593_v16 = vsel %vm438_vm0, %v2065_v15, 0  ;;  %v2070_v20 = vld [vmem:[%s2296_s5 + $0x20] sm:$0xff]   ;;  %v2071_v21 = vld [vmem:[%s2296_s5 + $0x28] sm:$0xff]   ;;  %v2072_v22 = vld [vmem:[%s2296_s5 + $0x30] sm:$0xff]   ;;  %417 = vst.msk [vmem:[#allocation2 + $0x58] sm:$0xff] %vm405_vm1, %v2218_v24  ;;  %v731_v29 = vmul.f32 -10000.0, %v730_v27 }
  0x18   : > { %v2073_v23 = vld [vmem:[%s2296_s5 + $0x38] sm:$0xff]   ;;  %418 = vst.msk [vmem:[#allocation2 + $0x60] sm:$0xff] %vm405_vm1, %v2218_v24  ;;  %419 = vst.msk [vmem:[#allocation2 + $0x68] sm:$0xff] %vm405_vm1, %v2218_v24  ;;  %v2076_v26 = vld [vmem:[%s2455_s11 + $0x28] sm:$0xff]  }
  0x19   : > { %420 = vst.msk [vmem:[#allocation2 + $0x70] sm:$0xff] %vm405_vm1, %v2218_v24  ;;  %421 = vst.msk [vmem:[#allocation2 + $0x78] sm:$0xff] %vm405_vm1, %v2218_v24  ;;  %v2353_v31 = vrot.slane %v731_v29, %v735_v30  ;;  %v2466_v25 = vld [vmem:[#allocation2 + $0x18] sm:$0xff]  ;;  %v2477_v30 = vld [vmem:[#allocation2 + $0x8] sm:$0xff] }
  0x1a   : > { %v2079_v55 = vld [vmem:[%s2455_s11 + $0x10] sm:$0xff]  }
  0x1d   : > { %1944 = vmatpush3.bf16.xpose.msra.mxu0 %v611_v4 }
  0x1e   : > { %2007 = vmatprep.subr.msk.bf16.mxu0 %vm438_vm0, %v2060_v3 }
  0x25   : > { %1946 = vmatpush3.bf16.xpose.msra.mxu0 %v608_v6 }
  0x26   : > { %2008 = vmatprep.subr.msk.bf16.mxu0 %vm438_vm0, %v2061_v7 }
  0x2d   : > { %1948 = vmatpush3.bf16.xpose.msra.mxu0 %v605_v8 }
  0x2e   : > { %2009 = vmatprep.subr.msk.bf16.mxu0 %vm438_vm0, %v2062_v9  ;;  %v2220_v9 = vmov 0.0  }
  0x2f   : > { %424 = vst.msk [vmem:[#allocation3 + $0x10] sm:$0xff] %vm405_vm1, %v2220_v9  ;;  %422 = vst.msk [vmem:[#allocation3] sm:$0xff] %vm405_vm1, %v2220_v9 }
  0x30   : > { %423 = vst.msk [vmem:[#allocation3 + $0x8] sm:$0xff] %vm405_vm1, %v2220_v9  ;;  %425 = vst.msk [vmem:[#allocation3 + $0x18] sm:$0xff] %vm405_vm1, %v2220_v9 }
  0x31   : > { %426 = vst.msk [vmem:[#allocation3 + $0x20] sm:$0xff] %vm405_vm1, %v2220_v9  ;;  %427 = vst.msk [vmem:[#allocation3 + $0x28] sm:$0xff] %vm405_vm1, %v2220_v9 }
  0x32   : > { %428 = vst.msk [vmem:[#allocation3 + $0x30] sm:$0xff] %vm405_vm1, %v2220_v9  ;;  %429 = vst.msk [vmem:[#allocation3 + $0x38] sm:$0xff] %vm405_vm1, %v2220_v9 }
  0x33   : > { %430 = vst.msk [vmem:[#allocation3 + $0x40] sm:$0xff] %vm405_vm1, %v2220_v9  ;;  %431 = vst.msk [vmem:[#allocation3 + $0x48] sm:$0xff] %vm405_vm1, %v2220_v9 }
  0x34   : > { %432 = vst.msk [vmem:[#allocation3 + $0x50] sm:$0xff] %vm405_vm1, %v2220_v9  ;;  %433 = vst.msk [vmem:[#allocation3 + $0x58] sm:$0xff] %vm405_vm1, %v2220_v9 }
  0x35   : > { %1950 = vmatpush3.bf16.xpose.msra.mxu0 %v602_v10  ;;  %434 = vst.msk [vmem:[#allocation3 + $0x60] sm:$0xff] %vm405_vm1, %v2220_v9  ;;  %435 = vst.msk [vmem:[#allocation3 + $0x68] sm:$0xff] %vm405_vm1, %v2220_v9 }
  0x36   : > { %2010 = vmatprep.subr.msk.bf16.mxu0 %vm438_vm0, %v2063_v11  ;;  %436 = vst.msk [vmem:[#allocation3 + $0x70] sm:$0xff] %vm405_vm1, %v2220_v9  ;;  %437 = vst.msk [vmem:[#allocation3 + $0x78] sm:$0xff] %vm405_vm1, %v2220_v9 }
  0x37   : > { %439 = vst.msk [vmem:[#allocation4] sm:$0xff] %vm438_vm0, %v2220_v9  ;;  %440 = vst.msk [vmem:[#allocation4 + $0x8] sm:$0xff] %vm438_vm0, %v2220_v9 }
  0x38   : > { %441 = vst.msk [vmem:[#allocation4 + $0x10] sm:$0xff] %vm438_vm0, %v2220_v9  ;;  %442 = vst.msk [vmem:[#allocation4 + $0x18] sm:$0xff] %vm438_vm0, %v2220_v9 }
  0x39   : > { %443 = vst.msk [vmem:[#allocation4 + $0x20] sm:$0xff] %vm438_vm0, %v2220_v9  ;;  %444 = vst.msk [vmem:[#allocation4 + $0x28] sm:$0xff] %vm438_vm0, %v2220_v9 }
  0x3a   : > { %445 = vst.msk [vmem:[#allocation4 + $0x30] sm:$0xff] %vm438_vm0, %v2220_v9  ;;  %446 = vst.msk [vmem:[#allocation4 + $0x38] sm:$0xff] %vm438_vm0, %v2220_v9 }
  0x3b   : > { %447 = vst.msk [vmem:[#allocation4 + $0x40] sm:$0xff] %vm438_vm0, %v2220_v9  ;;  %448 = vst.msk [vmem:[#allocation4 + $0x48] sm:$0xff] %vm438_vm0, %v2220_v9 }
  0x3c   : > { %449 = vst.msk [vmem:[#allocation4 + $0x50] sm:$0xff] %vm438_vm0, %v2220_v9  ;;  %450 = vst.msk [vmem:[#allocation4 + $0x58] sm:$0xff] %vm438_vm0, %v2220_v9 }
  0x3d   : > { %1952 = vmatpush3.bf16.xpose.msra.mxu0 %v599_v12  ;;  %451 = vst.msk [vmem:[#allocation4 + $0x60] sm:$0xff] %vm438_vm0, %v2220_v9  ;;  %452 = vst.msk [vmem:[#allocation4 + $0x68] sm:$0xff] %vm438_vm0, %v2220_v9 }
  0x3e   : > { %2011 = vmatprep.subr.msk.bf16.mxu0 %vm438_vm0, %v2064_v13  ;;  %453 = vst.msk [vmem:[#allocation4 + $0x70] sm:$0xff] %vm438_vm0, %v2220_v9  ;;  %454 = vst.msk [vmem:[#allocation4 + $0x78] sm:$0xff] %vm438_vm0, %v2220_v9 }
  0x45   : > { %1954 = vmatpush3.bf16.xpose.msra.mxu0 %v596_v14 }
  0x46   : > { %2012 = vmatprep.subr.msk.bf16.mxu0 %vm438_vm0, %v2065_v15 }
  0x4d   : > { %1956 = vmatpush3.bf16.xpose.msra.mxu0 %v593_v16 }
  0x54   : > { %1958 = vmatmul.mubr.msk.bf16.vlgmr.msra.gmra.mxu0 %vm438_vm0, %v2067_v17 }
  0x55   : > { %1961 = vmatprep.mubr.msk.bf16.mxu0 %vm438_vm0, %v2068_v18  ;;  %v2074_v18 = vld [vmem:[%s2455_s11 + $0x38] sm:$0xff]  }
  0x56   : > { %1973 = vmatprep.subr.bf16.mxu1 %v2074_v18 }
  0x57   : > { %1974 = vmatpush3.bf16.msra.mxu1 %v2074_v18  ;;  %v2558_v18 = vld [vmem:[#allocation2 + $0x48] sm:$0xff] }
  0x5c   : > { %1962 = vmatmul.mubr.msk.bf16.gmra.mxu0 %vm438_vm0, %v2069_v19  ;;  %v2458_v19 = vld [vmem:[#allocation2 + $0x10] sm:$0xff] }
  0x5d   : > { %1965 = vmatprep.mubr.msk.bf16.mxu0 %vm438_vm0, %v2070_v20  ;;  %v2075_v20 = vld [vmem:[%s2455_s11 + $0x30] sm:$0xff]  }
  0x5e   : > { %1975 = vmatprep.subr.bf16.mxu1 %v2075_v20 }
  0x5f   : > { %1976 = vmatpush3.bf16.msra.mxu1 %v2075_v20  ;;  %v2081_v20 = vld [vmem:[%s2455_s11] sm:$0xff]  }
  0x60   : > { %1977 = vmatprep.subr.bf16.mxu1 %v2076_v26 }
  0x63   : > { %1978 = vmatpush3.bf16.msra.mxu1 %v2076_v26 }
  0x64   : > { %1966 = vmatmul.mubr.msk.bf16.gmra.mxu0 %vm438_vm0, %v2071_v21 }
  0x65   : > { %1969 = vmatprep.mubr.msk.bf16.mxu0 %vm438_vm0, %v2072_v22  ;;  %v2461_v22 = vld [vmem:[#allocation2] sm:$0xff] }
  0x6c   : > { %1970 = vmatmul.mubr.msk.bf16.gmra.mxu0 %vm438_vm0, %v2073_v23 }
 0x114   : > { %v1959_v32 = vpop.f32.mrf.mxu0 }
 0x115   : > { %v715_v33 = vmul.f32 0.125, %v1959_v32 }
 0x116   : > { %v650_v34 = vpop.f32.mrf.mxu0 }
 0x117   : > { %v713_v35 = vmul.f32 0.125, %v650_v34  ;;  %v2356_v36 = vadd.f32 %v2353_v31, %v715_v33  ;;  %v2077_v34 = vld [vmem:[%s2455_s11 + $0x20] sm:$0xff]  }
 0x118   : > { %v1960_v37 = vpop.f32.mrf.mxu0  ;;  %1979 = vmatprep.subr.bf16.mxu1 %v2077_v34 }
 0x119   : > { %v716_v38 = vmul.f32 0.125, %v1960_v37  ;;  %774 = vmax.xlane.f32.xlu1 %v2356_v36  ;;  %v2360_v39 = vadd.f32 %v2353_v31, %v713_v35  ;;  %1980 = vmatpush3.bf16.msra.mxu1 %v2077_v34 }
 0x11a   : > { %v653_v40 = vpop.f32.mrf.mxu0 }
 0x11b   : > { %v714_v41 = vmul.f32 0.125, %v653_v40  ;;  %770 = vmax.xlane.f32.xlu0 %v2360_v39  ;;  %v2364_v42 = vadd.f32 %v2353_v31, %v716_v38  ;;  %v2496_v38 = vld [vmem:[#allocation2 + $0x20] sm:$0xff] }
 0x11c   : > { %v1963_v43 = vpop.f32.mrf.mxu0 }
 0x11d   : > { %776 = vmax.xlane.f32.xlu1 %v2364_v42  ;;  %v2368_v44 = vadd.f32 %v2353_v31, %v714_v41  ;;  %v719_v48 = vmul.f32 0.125, %v1963_v43  ;;  %v2502_v43 = vld [vmem:[#allocation2 + $0x38] sm:$0xff] }
 0x11e   : > { %v666_v45 = vpop.f32.mrf.mxu0 }
 0x11f   : > { %v717_v46 = vmul.f32 0.125, %v666_v45  ;;  %772 = vmax.xlane.f32.xlu0 %v2368_v44  ;;  %v2380_v56 = vadd.f32 %v2353_v31, %v719_v48  ;;  %v2078_v45 = vld [vmem:[%s2455_s11 + $0x18] sm:$0xff]   ;;  %v2509_v48 = vld [vmem:[#allocation2 + $0x30] sm:$0xff] }
 0x120   : > { %v1964_v47 = vpop.f32.mrf.mxu0  ;;  %1981 = vmatprep.subr.bf16.mxu1 %v2078_v45 }
 0x121   : > { %v720_v49 = vmul.f32 0.125, %v1964_v47  ;;  %v2372_v50 = vadd.f32 %v2353_v31, %v717_v46  ;;  %1982 = vmatpush3.bf16.msra.mxu1 %v2078_v45  ;;  %v2578_v45 = vld [vmem:[#allocation2 + $0x78] sm:$0xff] }
 0x122   : > { %v669_v51 = vpop.f32.mrf.mxu0  ;;  %1983 = vmatprep.subr.bf16.mxu1 %v2079_v55 }
 0x123   : > { %v718_v52 = vmul.f32 0.125, %v669_v51  ;;  %778 = vmax.xlane.f32.xlu0 %v2372_v50  ;;  %v2376_v53 = vadd.f32 %v2353_v31, %v720_v49 }
 0x124   : > { %v1967_v54 = vpop.f32.mrf.mxu0 }
 0x125   : > { %784 = vmax.xlane.f32.xlu1 %v2376_v53  ;;  %v723_v58 = vmul.f32 0.125, %v1967_v54  ;;  %v2384_v60 = vadd.f32 %v2353_v31, %v718_v52  ;;  %v2518_v54 = vld [vmem:[#allocation2 + $0x28] sm:$0xff]  ;;  %1984 = vmatpush3.bf16.msra.mxu1 %v2079_v55 }
 0x126   : > { %v682_v57 = vpop.f32.mrf.mxu0 }
 0x127   : > { %v721_v59 = vmul.f32 0.125, %v682_v57  ;;  %782 = vmax.xlane.f32.xlu0 %v2380_v56  ;;  %v2395_v3 = vadd.f32 %v2353_v31, %v723_v58 }
 0x128   : > { %v1968_v61 = vpop.f32.mrf.mxu0 }
 0x129   : > { %v724_v62 = vmul.f32 0.125, %v1968_v61  ;;  %780 = vmax.xlane.f32.xlu1 %v2384_v60  ;;  %v2388_v63 = vadd.f32 %v2353_v31, %v721_v59  ;;  %v2528_v61 = vld [vmem:[#allocation2 + $0x40] sm:$0xff] }
 0x12a   : > { %v685_v0 = vpop.f32.mrf.mxu0 }
 0x12b   : > { %v722_v1 = vmul.f32 0.125, %v685_v0  ;;  %786 = vmax.xlane.f32.xlu0 %v2388_v63  ;;  %v2392_v2 = vadd.f32 %v2353_v31, %v724_v62 }
 0x12c   : > { %v1971_v4 = vpop.f32.mrf.mxu0 }
 0x12d   : > { %792 = vmax.xlane.f32.xlu1 %v2392_v2  ;;  %v727_v6 = vmul.f32 0.125, %v1971_v4  ;;  %v2400_v8 = vadd.f32 %v2353_v31, %v722_v1  ;;  %v2538_v4 = vld [vmem:[#allocation2 + $0x58] sm:$0xff] }
 0x12e   : > { %v698_v5 = vpop.f32.mrf.mxu0 }
 0x12f   : > { %v725_v7 = vmul.f32 0.125, %v698_v5  ;;  %790 = vmax.xlane.f32.xlu0 %v2395_v3  ;;  %v2443_v16 = vadd.f32 %v2353_v31, %v727_v6  ;;  %v2080_v5 = vld [vmem:[%s2455_s11 + $0x8] sm:$0xff]  }
 0x130   : > { %v1972_v10 = vpop.f32.mrf.mxu0  ;;  %1985 = vmatprep.subr.bf16.mxu1 %v2080_v5 }
 0x131   : > { %v728_v11 = vmul.f32 0.125, %v1972_v10  ;;  %788 = vmax.xlane.f32.xlu1 %v2400_v8  ;;  %v2436_v12 = vadd.f32 %v2353_v31, %v725_v7  ;;  %v2548_v10 = vld [vmem:[#allocation2 + $0x50] sm:$0xff]  ;;  %1986 = vmatpush3.bf16.msra.mxu1 %v2080_v5 }
 0x132   : > { %v701_v13 = vpop.f32.mrf.mxu0  ;;  %1987 = vmatprep.subr.bf16.mxu1 %v2081_v20 }
 0x133   : > { %v726_v14 = vmul.f32 0.125, %v701_v13  ;;  %794 = vmax.xlane.f32.xlu0 %v2436_v12  ;;  %v2440_v15 = vadd.f32 %v2353_v31, %v728_v11 }
 0x135   : > { %800 = vmax.xlane.f32.xlu1 %v2440_v15  ;;  %v2448_v17 = vadd.f32 %v2353_v31, %v726_v14  ;;  %1988 = vmatpush3.bf16.msra.mxu1 %v2081_v20 }
 0x137   : > { %798 = vmax.xlane.f32.xlu0 %v2443_v16 }
 0x139   : > { %796 = vmax.xlane.f32.xlu1 %v2448_v17 }
 0x1a2   : > { %v775_v21 = vpop.xlane.xlu1 %774 }
 0x1a3   : > { %v2464_v23 = vmax.f32 %v2458_v19, %v775_v21 }
 0x1a4   : > { %v771_v24 = vpop.xlane.xlu0 %770 }
 0x1a5   : > { %v820_v27 = vsub.f32 %v2458_v19, %v2464_v23  ;;  %1406 = vst.msk [vmem:[#allocation2 + $0x10] sm:$0xff] %vm405_vm1, %v2464_v23  ;;  %v2474_v28 = vmax.f32 %v2461_v22, %v771_v24  ;;  %878 = vperm.xlu1 %2057, %v2464_v23  }
 0x1a6   : > { %v777_v29 = vpop.xlane.xlu1 %776 }
 0x1a7   : > { %1404 = vst.msk [vmem:[#allocation2] sm:$0xff] %vm405_vm1, %v2474_v28  ;;  %v2484_v32 = vmax.f32 %v2466_v25, %v777_v29  ;;  %868 = vperm.xlu0 %2056, %v2474_v28   ;;  %v2568_v29 = vld [vmem:[#allocation2 + $0x60] sm:$0xff] }
 0x1a8   : > { %v773_v33 = vpop.xlane.xlu0 %772 }
 0x1a9   : > { %1407 = vst.msk [vmem:[#allocation2 + $0x18] sm:$0xff] %vm405_vm1, %v2484_v32  ;;  %v2493_v37 = vmax.f32 %v2477_v30, %v773_v33  ;;  %883 = vperm.xlu1 %2057, %v2484_v32  }
 0x1ab   : > { %v819_v40 = vsub.f32 %v2477_v30, %v2493_v37  ;;  %1405 = vst.msk [vmem:[#allocation2 + $0x8] sm:$0xff] %vm405_vm1, %v2493_v37  ;;  %v2825_v30 = vsub.f32 %v2466_v25, %v2484_v32 }
 0x1ac   : > { %v779_v41 = vpop.xlane.xlu0 %778 }
 0x1ad   : > { %v2506_v46 = vmax.f32 %v2496_v38, %v779_v41  ;;  %873 = vperm.xlu1 %2057, %v2493_v37   ;;  %v840_v37 = vmul.f32 1.442695, %v2825_v30 }
 0x1ae   : > { %v785_v47 = vpop.xlane.xlu1 %784 }
 0x1af   : > { %1408 = vst.msk [vmem:[#allocation2 + $0x20] sm:$0xff] %vm405_vm1, %v2506_v46  ;;  %v2516_v51 = vmax.f32 %v2502_v43, %v785_v47 }
 0x1b0   : > { %v783_v52 = vpop.xlane.xlu0 %782 }
 0x1b1   : > { %1411 = vst.msk [vmem:[#allocation2 + $0x38] sm:$0xff] %vm405_vm1, %v2516_v51  ;;  %v2526_v58 = vmax.f32 %v2509_v48, %v783_v52  ;;  %v2829_v25 = vsub.f32 %v2502_v43, %v2516_v51 }
 0x1b2   : > { %v781_v59 = vpop.xlane.xlu1 %780 }
 0x1b3   : > { %1410 = vst.msk [vmem:[#allocation2 + $0x30] sm:$0xff] %vm405_vm1, %v2526_v58  ;;  %v2535_v0 = vmax.f32 %v2518_v54, %v781_v59  ;;  %898 = vperm.xlu1 %2057, %v2526_v58   ;;  %v2588_v59 = vld [vmem:[#allocation2 + $0x70] sm:$0xff]  ;;  %v2826_v19 = vsub.f32 %v2509_v48, %v2526_v58  ;;  %v848_v32 = vmul.f32 1.442695, %v2829_v25  ;;  %v999_v25 = vld [vmem:[#allocation3 + $0x28] sm:$0xff] }
 0x1b4   : > { %v787_v1 = vpop.xlane.xlu0 %786 }
 0x1b5   : > { %1409 = vst.msk [vmem:[#allocation2 + $0x28] sm:$0xff] %vm405_vm1, %v2535_v0  ;;  %v2546_v7 = vmax.f32 %v2528_v61, %v787_v1  ;;  %v846_v23 = vmul.f32 1.442695, %v2826_v19 }
 0x1b6   : > { %v793_v9 = vpop.xlane.xlu1 %792 }
 0x1b7   : > { %1412 = vst.msk [vmem:[#allocation2 + $0x40] sm:$0xff] %vm405_vm1, %v2546_v7  ;;  %v2555_v13 = vmax.f32 %v2538_v4, %v793_v9  ;;  %888 = vperm.xlu1 %2057, %v2506_v46  }
 0x1b8   : > { %v791_v14 = vpop.xlane.xlu0 %790 }
 0x1b9   : > { %1415 = vst.msk [vmem:[#allocation2 + $0x58] sm:$0xff] %vm405_vm1, %v2555_v13  ;;  %v2566_v24 = vmax.f32 %v2548_v10, %v791_v14  ;;  %v2598_v14 = vld [vmem:[#allocation2 + $0x68] sm:$0xff] }
 0x1ba   : > { %v789_v26 = vpop.xlane.xlu1 %788 }
 0x1bb   : > { %1414 = vst.msk [vmem:[#allocation2 + $0x50] sm:$0xff] %vm405_vm1, %v2566_v24  ;;  %v2575_v34 = vmax.f32 %v2558_v18, %v789_v26  ;;  %893 = vperm.xlu1 %2057, %v2535_v0  }
 0x1bc   : > { %v795_v41 = vpop.xlane.xlu0 %794 }
 0x1bd   : > { %1413 = vst.msk [vmem:[#allocation2 + $0x48] sm:$0xff] %vm405_vm1, %v2575_v34  ;;  %v2585_v52 = vmax.f32 %v2568_v29, %v795_v41  ;;  %913 = vperm.xlu0 %2056, %v2575_v34   ;;  %v2831_v58 = vsub.f32 %v2558_v18, %v2575_v34 }
 0x1be   : > { %v801_v55 = vpop.xlane.xlu1 %800 }
 0x1bf   : > { %1416 = vst.msk [vmem:[#allocation2 + $0x60] sm:$0xff] %vm405_vm1, %v2585_v52  ;;  %v2595_v5 = vmax.f32 %v2578_v45, %v801_v55  ;;  %903 = vperm.xlu1 %2057, %v2516_v51   ;;  %v2832_v43 = vsub.f32 %v2568_v29, %v2585_v52 }
 0x1c0   : > { %v799_v9 = vpop.xlane.xlu0 %798 }
 0x1c1   : > { %1419 = vst.msk [vmem:[#allocation2 + $0x78] sm:$0xff] %vm405_vm1, %v2595_v5  ;;  %v2605_v26 = vmax.f32 %v2588_v59, %v799_v9  ;;  %923 = vperm.xlu0 %2056, %v2555_v13   ;;  %v858_v51 = vmul.f32 1.442695, %v2832_v43  ;;  %v1004_v43 = vld [vmem:[#allocation3 + $0x50] sm:$0xff] }
 0x1c2   : > { %v797_v41 = vpop.xlane.xlu1 %796 }
 0x1c3   : > { %1418 = vst.msk [vmem:[#allocation2 + $0x70] sm:$0xff] %vm405_vm1, %v2605_v26  ;;  %v2613_v21 = vmax.f32 %v2598_v14, %v797_v41  ;;  %908 = vperm.xlu1 %2057, %v2546_v7   ;;  %v2834_v18 = vsub.f32 %v2588_v59, %v2605_v26 }
 0x1c5   : > { %1417 = vst.msk [vmem:[#allocation2 + $0x68] sm:$0xff] %vm405_vm1, %v2613_v21  ;;  %933 = vperm.xlu0 %2056, %v2613_v21   ;;  %v862_v34 = vmul.f32 1.442695, %v2834_v18  ;;  %v2835_v29 = vsub.f32 %v2598_v14, %v2613_v21 }
 0x1c7   : > { %918 = vperm.xlu1 %2057, %v2566_v24  }
 0x1c9   : > { %943 = vperm.xlu0 %2056, %v2595_v5  }
 0x1cb   : > { %928 = vperm.xlu1 %2057, %v2585_v52   ;;  %v860_v52 = vmul.f32 1.442695, %v2835_v29 }
 0x1cf   : > { %938 = vperm.xlu1 %2057, %v2605_v26  }
 0x220   : > { %v879_v9 = vpop.permute.xlu1 %878 }
 0x221   : > { %v948_v41 = vsub.f32 %v2356_v36, %v879_v9 }
 0x222   : > { %v869_v55 = vpop.permute.xlu0 %868 }
 0x223   : > { %v966_v1 = vmul.f32 1.442695, %v948_v41  ;;  %v946_v20 = vsub.f32 %v2360_v39, %v869_v55 }
 0x224   : > { %v884_v47 = vpop.permute.xlu1 %883 }
 0x225   : > { %2082 = vpow2.f32 %v966_v1  ;;  %v962_v33 = vmul.f32 1.442695, %v946_v20  ;;  %v949_v57 = vsub.f32 %v2364_v42, %v884_v47 }
 0x227   : > { %2084 = vpow2.f32 %v962_v33  ;;  %v968_v11 = vmul.f32 1.442695, %v949_v57 }
 0x228   : > { %v874_v6 = vpop.permute.xlu1 %873 }
 0x229   : > { %v947_v62 = vsub.f32 %v2368_v44, %v874_v6  ;;  %2086 = vpow2.f32 %v968_v11 }
 0x22b   : > { %v964_v35 = vmul.f32 1.442695, %v947_v62 }
 0x22d   : > { %2088 = vpow2.f32 %v964_v35 }
 0x22e   : > { %v899_v49 = vpop.permute.xlu1 %898 }
 0x22f   : > { %v952_v36 = vsub.f32 %v2380_v56, %v899_v49 }
 0x231   : > { %v974_v9 = vmul.f32 1.442695, %v952_v36 }
 0x232   : > { %v2083_v41 = vpop.eup %2082  ;;  %v889_v31 = vpop.permute.xlu1 %888 }
 0x233   : > { %2090 = vpow2.f32 %v974_v9  ;;  %v950_v39 = vsub.f32 %v2372_v50, %v889_v31  ;;  %1030 = vadd.xlane.f32.xlu0 %v2083_v41 }
 0x234   : > { %v2085_v1 = vpop.eup %2084 }
 0x235   : > { %v970_v42 = vmul.f32 1.442695, %v950_v39  ;;  %1026 = vadd.xlane.f32.xlu1 %v2085_v1 }
 0x236   : > { %v894_v57 = vpop.permute.xlu1 %893  ;;  %v2087_v6 = vpop.eup %2086 }
 0x237   : > { %2092 = vpow2.f32 %v970_v42  ;;  %v951_v44 = vsub.f32 %v2384_v60, %v894_v57  ;;  %v1204_v47 = vpack.c.bf16 %v2087_v6, %v2083_v41 }
 0x238   : > { %v914_v62 = vpop.permute.xlu0 %913 }
 0x239   : > { %v972_v35 = vmul.f32 1.442695, %v951_v44  ;;  %1032 = vadd.xlane.f32.xlu1 %v2087_v6  ;;  %v955_v56 = vsub.f32 %v2400_v8, %v914_v62 }
 0x23a   : > { %v2089_v11 = vpop.eup %2088  ;;  %v904_v49 = vpop.permute.xlu1 %903 }
 0x23b   : > { %2094 = vpow2.f32 %v972_v35  ;;  %v953_v33 = vsub.f32 %v2376_v53, %v904_v49  ;;  %1028 = vadd.xlane.f32.xlu0 %v2089_v11  ;;  %v1203_v50 = vpack.c.bf16 %v2089_v11, %v2085_v1  ;;  %v980_v55 = vmul.f32 1.442695, %v955_v56 }
 0x23c   : > { %v924_v31 = vpop.permute.xlu0 %923 }
 0x23d   : > { %v976_v20 = vmul.f32 1.442695, %v953_v33  ;;  %1989 = vmatprep.mubr.bf16.mxu1 %v1203_v50  ;;  %v957_v60 = vsub.f32 %v2392_v2, %v924_v31 }
 0x23e   : > { %v909_v36 = vpop.permute.xlu1 %908  ;;  %1990 = vmatmul.mubr.bf16.vlgmr.msra.gmra.mxu1 %v1204_v47 }
 0x23f   : > { %2096 = vpow2.f32 %v976_v20  ;;  %v954_v9 = vsub.f32 %v2388_v63, %v909_v36  ;;  %v984_v53 = vmul.f32 1.442695, %v957_v60 }
 0x240   : > { %v2091_v39 = vpop.eup %2090  ;;  %v934_v8 = vpop.permute.xlu0 %933  ;;  %2098 = vpow2.f32 %v980_v55 }
 0x241   : > { %v978_v42 = vmul.f32 1.442695, %v954_v9  ;;  %1038 = vadd.xlane.f32.xlu0 %v2091_v39  ;;  %v959_v1 = vsub.f32 %v2448_v17, %v934_v8 }
 0x242   : > { %v919_v57 = vpop.permute.xlu1 %918 }
 0x243   : > { %2100 = vpow2.f32 %v978_v42  ;;  %v956_v41 = vsub.f32 %v2395_v3, %v919_v57  ;;  %v988_v62 = vmul.f32 1.442695, %v959_v1  ;;  %v836_v57 = vmul.f32 1.442695, %v819_v40 }
 0x244   : > { %v2093_v44 = vpop.eup %2092  ;;  %v944_v6 = vpop.permute.xlu0 %943  ;;  %2102 = vpow2.f32 %v984_v53 }
 0x245   : > { %v982_v2 = vmul.f32 1.442695, %v956_v41  ;;  %1034 = vadd.xlane.f32.xlu0 %v2093_v44  ;;  %v961_v63 = vsub.f32 %v2440_v15, %v944_v6  ;;  %v838_v41 = vmul.f32 1.442695, %v820_v27 }
 0x246   : > { %v929_v35 = vpop.permute.xlu1 %928 }
 0x247   : > { %2104 = vpow2.f32 %v982_v2  ;;  %v958_v11 = vsub.f32 %v2436_v12, %v929_v35  ;;  %v992_v17 = vmul.f32 1.442695, %v961_v63  ;;  %v2824_v2 = vsub.f32 %v2496_v38, %v2506_v46 }
 0x248   : > { %v2095_v56 = vpop.eup %2094  ;;  %2106 = vpow2.f32 %v988_v62  ;;  %v2830_v46 = vsub.f32 %v2548_v10, %v2566_v24  ;;  %v2833_v10 = vsub.f32 %v2538_v4, %v2555_v13  ;;  %v2836_v13 = vsub.f32 %v2578_v45, %v2595_v5 }
 0x249   : > { %v986_v49 = vmul.f32 1.442695, %v958_v11  ;;  %v1205_v33 = vpack.c.bf16 %v2095_v56, %v2093_v44  ;;  %v2823_v44 = vsub.f32 %v2461_v22, %v2474_v28  ;;  %v842_v62 = vmul.f32 1.442695, %v2824_v2 }
 0x24a   : > { %v939_v50 = vpop.permute.xlu1 %938  ;;  %v2827_v22 = vsub.f32 %v2518_v54, %v2535_v0  ;;  %v2828_v28 = vsub.f32 %v2528_v61, %v2546_v7  ;;  %v854_v48 = vmul.f32 1.442695, %v2830_v46  ;;  %v852_v61 = vmul.f32 1.442695, %v2831_v58 }
 0x24b   : > { %2108 = vpow2.f32 %v986_v49  ;;  %v960_v3 = vsub.f32 %v2443_v16, %v939_v50  ;;  %1993 = vmatprep.mubr.bf16.mxu1 %v1205_v33  ;;  %v834_v6 = vmul.f32 1.442695, %v2823_v44  ;;  %v856_v24 = vmul.f32 1.442695, %v2833_v10  ;;  %v994_v50 = vld [vmem:[#allocation3] sm:$0xff] }
 0x24c   : > { %v2097_v31 = vpop.eup %2096  ;;  %2110 = vpow2.f32 %v992_v17  ;;  %v844_v27 = vmul.f32 1.442695, %v2827_v22  ;;  %v850_v38 = vmul.f32 1.442695, %v2828_v28  ;;  %v996_v17 = vld [vmem:[#allocation3 + $0x10] sm:$0xff]  ;;  %v1001_v22 = vld [vmem:[#allocation3 + $0x38] sm:$0xff] }
 0x24d   : > { %v990_v47 = vmul.f32 1.442695, %v960_v3  ;;  %1040 = vadd.xlane.f32.xlu1 %v2097_v31  ;;  %v1206_v20 = vpack.c.bf16 %v2097_v31, %v2091_v39  ;;  %v2099_v15 = vpop.eup %2098 }
 0x24f   : > { %2112 = vpow2.f32 %v990_v47  ;;  %1994 = vmatmul.mubr.bf16.gmra.mxu1 %v1206_v20 }
 0x250   : > { %v2101_v55 = vpop.eup %2100  ;;  %2114 = vpow2.f32 %v836_v57 }
 0x251   : > { %1036 = vadd.xlane.f32.xlu1 %v2095_v56  ;;  %v1207_v12 = vpack.c.bf16 %v2099_v15, %v2101_v55  ;;  %v2103_v60 = vpop.eup %2102  ;;  %2116 = vpow2.f32 %v838_v41  ;;  %v864_v56 = vmul.f32 1.442695, %v2836_v13 }
 0x252   : > { %2118 = vpow2.f32 %v834_v6  ;;  %v998_v6 = vld [vmem:[#allocation3 + $0x20] sm:$0xff] }
 0x253   : > { %1997 = vmatprep.mubr.bf16.mxu1 %v1207_v12  ;;  %2120 = vpow2.f32 %v842_v62 }
 0x254   : > { %v2105_v36 = vpop.eup %2104  ;;  %2122 = vpow2.f32 %v840_v37 }
 0x255   : > { %1046 = vadd.xlane.f32.xlu0 %v2105_v36  ;;  %1048 = vadd.xlane.f32.xlu1 %v2103_v60  ;;  %v1208_v9 = vpack.c.bf16 %v2103_v60, %v2105_v36  ;;  %v2107_v8 = vpop.eup %2106  ;;  %2124 = vpow2.f32 %v846_v23  ;;  %v995_v60 = vld [vmem:[#allocation3 + $0x8] sm:$0xff] }
 0x256   : > { %2126 = vpow2.f32 %v844_v27 }
 0x257   : > { %1998 = vmatmul.mubr.bf16.gmra.mxu1 %v1208_v9  ;;  %2128 = vpow2.f32 %v850_v38 }
 0x258   : > { %v2109_v16 = vpop.eup %2108  ;;  %2130 = vpow2.f32 %v848_v32 }
 0x259   : > { %1042 = vadd.xlane.f32.xlu0 %v2101_v55  ;;  %1044 = vadd.xlane.f32.xlu1 %v2099_v15  ;;  %v1209_v42 = vpack.c.bf16 %v2107_v8, %v2109_v16  ;;  %v2111_v39 = vpop.eup %2110  ;;  %2132 = vpow2.f32 %v854_v48  ;;  %v997_v55 = vld [vmem:[#allocation3 + $0x18] sm:$0xff] }
 0x25a   : > { %2134 = vpow2.f32 %v852_v61 }
 0x25b   : > { %2001 = vmatprep.mubr.bf16.mxu1 %v1209_v42  ;;  %2136 = vpow2.f32 %v858_v51 }
 0x25c   : > { %v2113_v53 = vpop.eup %2112  ;;  %2138 = vpow2.f32 %v856_v24 }
 0x25d   : > { %1050 = vadd.xlane.f32.xlu0 %v2109_v16  ;;  %1056 = vadd.xlane.f32.xlu1 %v2111_v39  ;;  %v1210_v1 = vpack.c.bf16 %v2111_v39, %v2113_v53  ;;  %v2665_v40 = vpop.eup %2114  ;;  %2140 = vpow2.f32 %v862_v34  ;;  %v1003_v34 = vld [vmem:[#allocation3 + $0x48] sm:$0xff] }
 0x25e   : > { %v2117_v54 = vpop.eup %2116  ;;  %2142 = vpow2.f32 %v860_v52  ;;  %v1011_v16 = vmul.f32 %v2665_v40, %v995_v60  ;;  %v1008_v60 = vld [vmem:[#allocation3 + $0x70] sm:$0xff] }
 0x25f   : > { %2002 = vmatmul.mubr.bf16.gmra.mxu1 %v1210_v1  ;;  %v2119_v0 = vpop.eup %2118  ;;  %2144 = vpow2.f32 %v864_v56  ;;  %v1012_v3 = vmul.f32 %v2117_v54, %v996_v17  ;;  %v1009_v17 = vld [vmem:[#allocation3 + $0x78] sm:$0xff] }
 0x260   : > { %v2680_v7 = vpop.eup %2120  ;;  %v1010_v20 = vmul.f32 %v2119_v0, %v994_v50  ;;  %v1006_v50 = vld [vmem:[#allocation3 + $0x60] sm:$0xff] }
 0x261   : > { %1054 = vadd.xlane.f32.xlu0 %v2113_v53  ;;  %1052 = vadd.xlane.f32.xlu1 %v2107_v8  ;;  %v2123_v63 = vpop.eup %2122  ;;  %v1000_v53 = vld [vmem:[#allocation3 + $0x30] sm:$0xff]  ;;  %v1014_v30 = vmul.f32 %v2680_v7, %v998_v6 }
 0x262   : > { %v2125_v35 = vpop.eup %2124  ;;  %v1013_v36 = vmul.f32 %v2123_v63, %v997_v55 }
 0x263   : > { %v2692_v11 = vpop.eup %2126  ;;  %v1016_v41 = vmul.f32 %v2125_v35, %v1000_v53 }
 0x264   : > { %v2695_v4 = vpop.eup %2128 }
 0x265   : > { %v2131_v59 = vpop.eup %2130 }
 0x266   : > { %v2701_v26 = vpop.eup %2132  ;;  %v1017_v38 = vmul.f32 %v2131_v59, %v1001_v22 }
 0x267   : > { %v2703_v21 = vpop.eup %2134  ;;  %v1020_v10 = vmul.f32 %v2701_v26, %v1004_v43  ;;  %v1092_v43 = vld [vmem:[#allocation4 + $0x8] sm:$0xff] }
 0x268   : > { %v2707_v14 = vpop.eup %2136  ;;  %v1019_v13 = vmul.f32 %v2703_v21, %v1003_v34 }
 0x269   : > { %v2709_v49 = vpop.eup %2138 }
 0x26a   : > { %v2713_v45 = vpop.eup %2140 }
 0x26b   : > { %v2715_v5 = vpop.eup %2142 }
 0x26c   : > { %v2719_v33 = vpop.eup %2144 }
 0x272   : > { %1114 = vperm.xlu1 %2057, %v2665_v40  }
 0x276   : > { %1119 = vperm.xlu1 %2057, %v2117_v54   ;;  %v1015_v54 = vmul.f32 %v2692_v11, %v999_v25  ;;  %v1091_v25 = vld [vmem:[#allocation4] sm:$0xff] }
 0x277   : > { %1109 = vperm.xlu0 %2056, %v2119_v0   ;;  %v1005_v0 = vld [vmem:[#allocation3 + $0x58] sm:$0xff] }
 0x27a   : > { %1129 = vperm.xlu1 %2057, %v2680_v7   ;;  %v1021_v7 = vmul.f32 %v2709_v49, %v1005_v0 }
 0x27b   : > { %1124 = vperm.xlu0 %2056, %v2123_v63  }
 0x27e   : > { %1139 = vperm.xlu1 %2057, %v2125_v35   ;;  %v1002_v35 = vld [vmem:[#allocation3 + $0x40] sm:$0xff] }
 0x27f   : > { %1134 = vperm.xlu0 %2056, %v2692_v11   ;;  %v1018_v56 = vmul.f32 %v2695_v4, %v1002_v35 }
 0x282   : > { %1149 = vperm.xlu1 %2057, %v2695_v4  }
 0x283   : > { %1144 = vperm.xlu0 %2056, %v2131_v59  }
 0x286   : > { %1159 = vperm.xlu1 %2057, %v2701_v26  }
 0x287   : > { %1154 = vperm.xlu0 %2056, %v2703_v21   ;;  %v1022_v21 = vmul.f32 %v2707_v14, %v1006_v50 }
 0x28a   : > { %1169 = vperm.xlu1 %2057, %v2707_v14  }
 0x28b   : > { %1164 = vperm.xlu0 %2056, %v2709_v49  }
 0x28e   : > { %1179 = vperm.xlu1 %2057, %v2713_v45  }
 0x28f   : > { %1174 = vperm.xlu0 %2056, %v2715_v5  }
 0x293   : > { %1184 = vperm.xlu0 %2056, %v2719_v33  }
 0x2bc   : > { %v1031_v31 = vpop.xlane.xlu0 %1030 }
 0x2bd   : > { %v1060_v47 = vadd.f32 %v1031_v31, %v1012_v3 }
 0x2be   : > { %v1027_v15 = vpop.xlane.xlu1 %1026 }
 0x2bf   : > { %1077 = vst.msk [vmem:[#allocation3 + $0x10] sm:$0xff] %vm405_vm1, %v1060_v47  ;;  %v1058_v12 = vadd.f32 %v1027_v15, %v1010_v20  ;;  %v1025_v20 = vmul.f32 %v2719_v33, %v1009_v17  ;;  %v1024_v33 = vmul.f32 %v2713_v45, %v1008_v60  ;;  %v1095_v17 = vld [vmem:[#allocation4 + $0x20] sm:$0xff] }
 0x2c1   : > { %1075 = vst.msk [vmem:[#allocation3] sm:$0xff] %vm405_vm1, %v1058_v12  ;;  %v1007_v12 = vld [vmem:[#allocation3 + $0x68] sm:$0xff] }
 0x2c2   : > { %v1033_v9 = vpop.xlane.xlu1 %1032 }
 0x2c3   : > { %v1061_v8 = vadd.f32 %v1033_v9, %v1013_v36 }
 0x2c4   : > { %v1029_v42 = vpop.xlane.xlu0 %1028 }
 0x2c5   : > { %1078 = vst.msk [vmem:[#allocation3 + $0x18] sm:$0xff] %vm405_vm1, %v1061_v8  ;;  %v1059_v39 = vadd.f32 %v1029_v42, %v1011_v16  ;;  %v1023_v42 = vmul.f32 %v2715_v5, %v1007_v12 }
 0x2c6   : > { %v1441_v1 = vld [vmem:[#allocation3 + $0x10] sm:$0xff] }
 0x2c7   : > { %1076 = vst.msk [vmem:[#allocation3 + $0x8] sm:$0xff] %vm405_vm1, %v1059_v39  ;;  %2146 = vrcp.f32 %v1441_v1 }
 0x2c8   : > { %v1439_v57 = vld [vmem:[#allocation3] sm:$0xff] }
 0x2c9   : > { %2148 = vrcp.f32 %v1439_v57 }
 0x2ca   : > { %v1039_v44 = vpop.xlane.xlu0 %1038 }
 0x2cb   : > { %v1064_v2 = vadd.f32 %v1039_v44, %v1016_v41 }
 0x2cc   : > { %v1442_v62 = vld [vmem:[#allocation3 + $0x18] sm:$0xff] }
 0x2cd   : > { %1081 = vst.msk [vmem:[#allocation3 + $0x30] sm:$0xff] %vm405_vm1, %v1064_v2  ;;  %2150 = vrcp.f32 %v1442_v62 }
 0x2ce   : > { %v1035_v37 = vpop.xlane.xlu0 %1034  ;;  %v1440_v19 = vld [vmem:[#allocation3 + $0x8] sm:$0xff] }
 0x2cf   : > { %v1062_v23 = vadd.f32 %v1035_v37, %v1014_v30  ;;  %2152 = vrcp.f32 %v1440_v19 }
 0x2d1   : > { %1079 = vst.msk [vmem:[#allocation3 + $0x20] sm:$0xff] %vm405_vm1, %v1062_v23 }
 0x2d4   : > { %v2147_v27 = vpop.eup %2146  ;;  %v1445_v28 = vld [vmem:[#allocation3 + $0x30] sm:$0xff] }
 0x2d5   : > { %1483 = vperm.xlu1 %2057, %v2147_v27   ;;  %2154 = vrcp.f32 %v1445_v28  ;;  %v1093_v28 = vld [vmem:[#allocation4 + $0x10] sm:$0xff] }
 0x2d6   : > { %v1041_v40 = vpop.xlane.xlu1 %1040  ;;  %v2149_v46 = vpop.eup %2148 }
 0x2d7   : > { %v1065_v32 = vadd.f32 %v1041_v40, %v1017_v38 }
 0x2d8   : > { %v1443_v48 = vld [vmem:[#allocation3 + $0x20] sm:$0xff] }
 0x2d9   : > { %1082 = vst.msk [vmem:[#allocation3 + $0x38] sm:$0xff] %vm405_vm1, %v1065_v32  ;;  %1473 = vperm.xlu1 %2057, %v2149_v46   ;;  %2156 = vrcp.f32 %v1443_v48 }
 0x2da   : > { %v2151_v58 = vpop.eup %2150  ;;  %v1037_v61 = vpop.xlane.xlu1 %1036 }
 0x2db   : > { %v1063_v51 = vadd.f32 %v1037_v61, %v1015_v54  ;;  %1488 = vperm.xlu0 %2056, %v2151_v58   ;;  %v1094_v54 = vld [vmem:[#allocation4 + $0x18] sm:$0xff] }
 0x2dc   : > { %v2153_v24 = vpop.eup %2152 }
 0x2dd   : > { %1080 = vst.msk [vmem:[#allocation3 + $0x28] sm:$0xff] %vm405_vm1, %v1063_v51 }
 0x2de   : > { %v1049_v63 = vpop.xlane.xlu1 %1048  ;;  %v1047_v18 = vpop.xlane.xlu0 %1046 }
 0x2df   : > { %v1069_v29 = vadd.f32 %v1049_v63, %v1021_v7  ;;  %v1068_v52 = vadd.f32 %v1047_v18, %v1020_v10  ;;  %1478 = vperm.xlu0 %2056, %v2153_v24  }
 0x2e0   : > { %v1446_v11 = vld [vmem:[#allocation3 + $0x38] sm:$0xff] }
 0x2e1   : > { %1086 = vst.msk [vmem:[#allocation3 + $0x58] sm:$0xff] %vm405_vm1, %v1069_v29  ;;  %1085 = vst.msk [vmem:[#allocation3 + $0x50] sm:$0xff] %vm405_vm1, %v1068_v52  ;;  %2158 = vrcp.f32 %v1446_v11 }
 0x2e2   : > { %v2155_v59 = vpop.eup %2154  ;;  %v1045_v26 = vpop.xlane.xlu1 %1044 }
 0x2e3   : > { %v1043_v49 = vpop.xlane.xlu0 %1042  ;;  %v1067_v3 = vadd.f32 %v1045_v26, %v1019_v13  ;;  %1503 = vperm.xlu1 %2057, %v2155_v59  }
 0x2e4   : > { %v1066_v31 = vadd.f32 %v1043_v49, %v1018_v56  ;;  %v1444_v47 = vld [vmem:[#allocation3 + $0x28] sm:$0xff]  ;;  %v1097_v49 = vld [vmem:[#allocation4 + $0x30] sm:$0xff] }
 0x2e5   : > { %1084 = vst.msk [vmem:[#allocation3 + $0x48] sm:$0xff] %vm405_vm1, %v1067_v3  ;;  %2160 = vrcp.f32 %v1444_v47 }
 0x2e6   : > { %1083 = vst.msk [vmem:[#allocation3 + $0x40] sm:$0xff] %vm405_vm1, %v1066_v31  ;;  %v2157_v4 = vpop.eup %2156  ;;  %v1057_v15 = vpop.xlane.xlu1 %1056  ;;  %v1098_v31 = vld [vmem:[#allocation4 + $0x38] sm:$0xff] }
 0x2e7   : > { %v1051_v55 = vpop.xlane.xlu0 %1050  ;;  %v1073_v36 = vadd.f32 %v1057_v15, %v1025_v20  ;;  %1493 = vperm.xlu1 %2057, %v2157_v4   ;;  %v1096_v15 = vld [vmem:[#allocation4 + $0x28] sm:$0xff] }
 0x2e8   : > { %v1070_v9 = vadd.f32 %v1051_v55, %v1022_v21  ;;  %v1450_v8 = vld [vmem:[#allocation3 + $0x58] sm:$0xff]  ;;  %v1449_v16 = vld [vmem:[#allocation3 + $0x50] sm:$0xff] }
 0x2e9   : > { %1090 = vst.msk [vmem:[#allocation3 + $0x78] sm:$0xff] %vm405_vm1, %v1073_v36  ;;  %2162 = vrcp.f32 %v1450_v8  ;;  %v1101_v36 = vld [vmem:[#allocation4 + $0x50] sm:$0xff] }
 0x2ea   : > { %1087 = vst.msk [vmem:[#allocation3 + $0x60] sm:$0xff] %vm405_vm1, %v1070_v9  ;;  %v1053_v14 = vpop.xlane.xlu1 %1052  ;;  %2164 = vrcp.f32 %v1449_v16 }
 0x2eb   : > { %v1055_v39 = vpop.xlane.xlu0 %1054  ;;  %v1071_v53 = vadd.f32 %v1053_v14, %v1023_v42 }
 0x2ec   : > { %v1072_v1 = vadd.f32 %v1055_v39, %v1024_v33  ;;  %v1448_v57 = vld [vmem:[#allocation3 + $0x48] sm:$0xff]  ;;  %v1099_v33 = vld [vmem:[#allocation4 + $0x40] sm:$0xff] }
 0x2ed   : > { %v1447_v41 = vld [vmem:[#allocation3 + $0x40] sm:$0xff]  ;;  %1088 = vst.msk [vmem:[#allocation3 + $0x68] sm:$0xff] %vm405_vm1, %v1071_v53  ;;  %2166 = vrcp.f32 %v1448_v57  ;;  %v1102_v57 = vld [vmem:[#allocation4 + $0x58] sm:$0xff] }
 0x2ee   : > { %1089 = vst.msk [vmem:[#allocation3 + $0x70] sm:$0xff] %vm405_vm1, %v1072_v1  ;;  %v2159_v44 = vpop.eup %2158  ;;  %2168 = vrcp.f32 %v1447_v41  ;;  %v1115_v5 = vpop.permute.xlu1 %1114 }
 0x2ef   : > { %1508 = vperm.xlu0 %2056, %v2159_v44   ;;  %v1188_v35 = vmul.f32 %v1115_v5, %v1092_v43  ;;  %v1100_v5 = vld [vmem:[#allocation4 + $0x48] sm:$0xff] }
 0x2f0   : > { %v1454_v19 = vld [vmem:[#allocation3 + $0x78] sm:$0xff] }
 0x2f1   : > { %v1451_v6 = vld [vmem:[#allocation3 + $0x60] sm:$0xff] }
 0x2f2   : > { %2170 = vrcp.f32 %v1451_v6  ;;  %v2161_v45 = vpop.eup %2160  ;;  %v1110_v30 = vpop.permute.xlu0 %1109 }
 0x2f3   : > { %1498 = vperm.xlu0 %2056, %v2161_v45   ;;  %v1120_v22 = vpop.permute.xlu1 %1119  ;;  %v1187_v61 = vmul.f32 %v1110_v30, %v1091_v25 }
 0x2f4   : > { %v1452_v2 = vld [vmem:[#allocation3 + $0x68] sm:$0xff]  ;;  %v1189_v32 = vmul.f32 %v1120_v22, %v1093_v28  ;;  %v1103_v28 = vld [vmem:[#allocation4 + $0x60] sm:$0xff] }
 0x2f5   : > { %v1453_v62 = vld [vmem:[#allocation3 + $0x70] sm:$0xff]  ;;  %2172 = vrcp.f32 %v1452_v2 }
 0x2f6   : > { %v2163_v37 = vpop.eup %2162  ;;  %2174 = vrcp.f32 %v1453_v62  ;;  %v1125_v40 = vpop.permute.xlu0 %1124 }
 0x2f7   : > { %v2165_v23 = vpop.eup %2164  ;;  %1528 = vperm.xlu0 %2056, %v2163_v37   ;;  %2176 = vrcp.f32 %v1454_v19  ;;  %v1130_v46 = vpop.permute.xlu1 %1129  ;;  %v1190_v7 = vmul.f32 %v1125_v40, %v1094_v54  ;;  %v1105_v37 = vld [vmem:[#allocation4 + $0x70] sm:$0xff] }
 0x2f8   : > { %1523 = vperm.xlu1 %2057, %v2165_v23   ;;  %v1191_v21 = vmul.f32 %v1130_v46, %v1095_v17 }
 0x2fa   : > { %v2167_v27 = vpop.eup %2166  ;;  %v1135_v10 = vpop.permute.xlu0 %1134 }
 0x2fb   : > { %v2169_v38 = vpop.eup %2168  ;;  %1518 = vperm.xlu0 %2056, %v2167_v27   ;;  %v1140_v29 = vpop.permute.xlu1 %1139  ;;  %v1192_v16 = vmul.f32 %v1135_v10, %v1096_v15 }
 0x2fc   : > { %1513 = vperm.xlu1 %2057, %v2169_v38   ;;  %v1193_v3 = vmul.f32 %v1140_v29, %v1097_v49 }
 0x2fe   : > { %v1991_v58 = vpop.f32.mrf.mxu1  ;;  %v1145_v59 = vpop.permute.xlu0 %1144 }
 0x2ff   : > { %v2171_v48 = vpop.eup %2170  ;;  %v1374_v0 = vadd.f32 %v1991_v58, %v1189_v32  ;;  %v1150_v26 = vpop.permute.xlu1 %1149  ;;  %v1194_v12 = vmul.f32 %v1145_v59, %v1098_v31  ;;  %v1106_v32 = vld [vmem:[#allocation4 + $0x78] sm:$0xff] }
 0x300   : > { %1533 = vperm.xlu1 %2057, %v2171_v48   ;;  %v1309_v51 = vpop.f32.mrf.mxu1  ;;  %v1195_v44 = vmul.f32 %v1150_v26, %v1099_v33 }
 0x301   : > { %1390 = vst.msk [vmem:[#allocation4 + $0x10] sm:$0xff] %vm438_vm0, %v1374_v0  ;;  %v1372_v24 = vadd.f32 %v1309_v51, %v1187_v61  ;;  %v1104_v61 = vld [vmem:[#allocation4 + $0x68] sm:$0xff] }
 0x302   : > { %v2173_v63 = vpop.eup %2172  ;;  %v1992_v18 = vpop.f32.mrf.mxu1 }
 0x303   : > { %v2175_v34 = vpop.eup %2174  ;;  %1388 = vst.msk [vmem:[#allocation4] sm:$0xff] %vm438_vm0, %v1372_v24  ;;  %v1375_v52 = vadd.f32 %v1992_v18, %v1190_v7  ;;  %1538 = vperm.xlu0 %2056, %v2173_v63   ;;  %v1155_v50 = vpop.permute.xlu0 %1154 }
 0x304   : > { %1543 = vperm.xlu1 %2057, %v2175_v34   ;;  %v1312_v11 = vpop.f32.mrf.mxu1  ;;  %v2177_v56 = vpop.eup %2176  ;;  %v1196_v22 = vmul.f32 %v1155_v50, %v1100_v5 }
 0x305   : > { %1391 = vst.msk [vmem:[#allocation4 + $0x18] sm:$0xff] %vm438_vm0, %v1375_v52  ;;  %v1373_v13 = vadd.f32 %v1312_v11, %v1188_v35  ;;  %v1160_v47 = vpop.permute.xlu1 %1159 }
 0x306   : > { %v1197_v53 = vmul.f32 %v1160_v47, %v1101_v36 }
 0x307   : > { %1389 = vst.msk [vmem:[#allocation4 + $0x8] sm:$0xff] %vm438_vm0, %v1373_v13  ;;  %1548 = vperm.xlu0 %2056, %v2177_v56   ;;  %v1165_v9 = vpop.permute.xlu0 %1164 }
 0x308   : > { %v1198_v62 = vmul.f32 %v1165_v9, %v1102_v57  ;;  %v1425_v34 = vld [vmem:[#allocation4 + $0x10] sm:$0xff] }
 0x309   : > { %v1170_v14 = vpop.permute.xlu1 %1169 }
 0x30a   : > { %v1199_v54 = vmul.f32 %v1170_v14, %v1103_v28  ;;  %v1423_v13 = vld [vmem:[#allocation4] sm:$0xff] }
 0x30b   : > { %v1175_v45 = vpop.permute.xlu0 %1174 }
 0x30c   : > { %v1200_v10 = vmul.f32 %v1175_v45, %v1104_v61  ;;  %v1426_v59 = vld [vmem:[#allocation4 + $0x18] sm:$0xff] }
 0x30d   : > { %v1180_v19 = vpop.permute.xlu1 %1179 }
 0x30e   : > { %v1201_v40 = vmul.f32 %v1180_v19, %v1105_v37 }
 0x30f   : > { %v1995_v20 = vpop.f32.mrf.mxu1  ;;  %v1185_v46 = vpop.permute.xlu0 %1184 }
 0x310   : > { %v1378_v4 = vadd.f32 %v1995_v20, %v1193_v3  ;;  %v1202_v43 = vmul.f32 %v1185_v46, %v1106_v32  ;;  %v1424_v3 = vld [vmem:[#allocation4 + $0x8] sm:$0xff] }
 0x311   : > { %v1325_v55 = vpop.f32.mrf.mxu1 }
 0x312   : > { %1394 = vst.msk [vmem:[#allocation4 + $0x30] sm:$0xff] %vm438_vm0, %v1378_v4  ;;  %v1376_v60 = vadd.f32 %v1325_v55, %v1191_v21 }
 0x313   : > { %v1996_v8 = vpop.f32.mrf.mxu1 }
 0x314   : > { %1392 = vst.msk [vmem:[#allocation4 + $0x20] sm:$0xff] %vm438_vm0, %v1376_v60  ;;  %v1379_v42 = vadd.f32 %v1996_v8, %v1194_v12 }
 0x315   : > { %v1328_v39 = vpop.f32.mrf.mxu1 }
 0x316   : > { %1395 = vst.msk [vmem:[#allocation4 + $0x38] sm:$0xff] %vm438_vm0, %v1379_v42  ;;  %v1377_v1 = vadd.f32 %v1328_v39, %v1192_v16 }
 0x317   : > { %v1999_v41 = vpop.f32.mrf.mxu1 }
 0x318   : > { %1393 = vst.msk [vmem:[#allocation4 + $0x28] sm:$0xff] %vm438_vm0, %v1377_v1  ;;  %v1382_v6 = vadd.f32 %v1999_v41, %v1197_v53 }
 0x319   : > { %v1341_v2 = vpop.f32.mrf.mxu1  ;;  %v1429_v21 = vld [vmem:[#allocation4 + $0x30] sm:$0xff] }
 0x31a   : > { %1398 = vst.msk [vmem:[#allocation4 + $0x50] sm:$0xff] %vm438_vm0, %v1382_v6  ;;  %v1380_v30 = vadd.f32 %v1341_v2, %v1195_v44 }
 0x31b   : > { %v2000_v23 = vpop.f32.mrf.mxu1  ;;  %v1427_v12 = vld [vmem:[#allocation4 + $0x20] sm:$0xff] }
 0x31c   : > { %1396 = vst.msk [vmem:[#allocation4 + $0x40] sm:$0xff] %vm438_vm0, %v1380_v30  ;;  %v1383_v27 = vadd.f32 %v2000_v23, %v1198_v62 }
 0x31d   : > { %v1344_v38 = vpop.f32.mrf.mxu1  ;;  %v1430_v8 = vld [vmem:[#allocation4 + $0x38] sm:$0xff] }
 0x31e   : > { %1399 = vst.msk [vmem:[#allocation4 + $0x58] sm:$0xff] %vm438_vm0, %v1383_v27  ;;  %v1381_v25 = vadd.f32 %v1344_v38, %v1196_v22 }
 0x31f   : > { %v2003_v48 = vpop.f32.mrf.mxu1  ;;  %v1428_v14 = vld [vmem:[#allocation4 + $0x28] sm:$0xff] }
 0x320   : > { %1397 = vst.msk [vmem:[#allocation4 + $0x48] sm:$0xff] %vm438_vm0, %v1381_v25  ;;  %v1386_v58 = vadd.f32 %v2003_v48, %v1201_v40 }
 0x321   : > { %v1357_v0 = vpop.f32.mrf.mxu1  ;;  %v1433_v44 = vld [vmem:[#allocation4 + $0x50] sm:$0xff] }
 0x322   : > { %1402 = vst.msk [vmem:[#allocation4 + $0x70] sm:$0xff] %vm438_vm0, %v1386_v58  ;;  %v1384_v51 = vadd.f32 %v1357_v0, %v1199_v54 }
 0x323   : > { %v2004_v7 = vpop.f32.mrf.mxu1  ;;  %v1431_v19 = vld [vmem:[#allocation4 + $0x40] sm:$0xff] }
 0x324   : > { %1400 = vst.msk [vmem:[#allocation4 + $0x60] sm:$0xff] %vm438_vm0, %v1384_v51  ;;  %v1387_v24 = vadd.f32 %v2004_v7, %v1202_v43 }
 0x325   : > { %v1360_v63 = vpop.f32.mrf.mxu1  ;;  %v1434_v57 = vld [vmem:[#allocation4 + $0x58] sm:$0xff] }
 0x326   : > { %1403 = vst.msk [vmem:[#allocation4 + $0x78] sm:$0xff] %vm438_vm0, %v1387_v24  ;;  %v1385_v18 = vadd.f32 %v1360_v63, %v1200_v10 }
 0x327   : > { %v1432_v30 = vld [vmem:[#allocation4 + $0x48] sm:$0xff] }
 0x328   : > { %1401 = vst.msk [vmem:[#allocation4 + $0x68] sm:$0xff] %vm438_vm0, %v1385_v18 }
 0x329   : > { %v1437_v58 = vld [vmem:[#allocation4 + $0x70] sm:$0xff] }
 0x32b   : > { %v1435_v40 = vld [vmem:[#allocation4 + $0x60] sm:$0xff] }
 0x32d   : > { %v1438_v10 = vld [vmem:[#allocation4 + $0x78] sm:$0xff] }
 0x32f   : > { %v1436_v48 = vld [vmem:[#allocation4 + $0x68] sm:$0xff] }
 0x350   : > { %v1484_v35 = vpop.permute.xlu1 %1483 }
 0x351   : > { %v1553_v29 = vmul.f32 %v1484_v35, %v1425_v34 }
 0x353   : > { %v1895_v52 = vpack.c.bf16 %v1553_v29, %v1553_v29 }
 0x354   : > { %v1474_v11 = vpop.permute.xlu1 %1473 }
 0x355   : > { %1634 = vst.msk [vmem:[%s2769_s14 + $0x8] sm:$0xf] %vm1631_vm2, %v1895_v52  ;;  %v1551_v56 = vmul.f32 %v1474_v11, %v1423_v13 }
 0x356   : > { %v1489_v26 = vpop.permute.xlu0 %1488 }
 0x357   : > { %v1893_v49 = vpack.c.bf16 %v1551_v56, %v1551_v56  ;;  %v1554_v17 = vmul.f32 %v1489_v26, %v1426_v59 }
 0x359   : > { %1632 = vst.msk [vmem:[%s2769_s14] sm:$0xf] %vm1631_vm2, %v1893_v49  ;;  %v1896_v50 = vpack.c.bf16 %v1554_v17, %v1554_v17 }
 0x35a   : > { %v1479_v31 = vpop.permute.xlu0 %1478 }
 0x35b   : > { %1635 = vst.msk [vmem:[%s2769_s14 + $0xc] sm:$0xf] %vm1631_vm2, %v1896_v50  ;;  %v1552_v47 = vmul.f32 %v1479_v31, %v1424_v3 }
 0x35d   : > { %v1894_v20 = vpack.c.bf16 %v1552_v47, %v1552_v47 }
 0x35e   : > { %v1504_v4 = vpop.permute.xlu1 %1503 }
 0x35f   : > { %1633 = vst.msk [vmem:[%s2769_s14 + $0x4] sm:$0xf] %vm1631_vm2, %v1894_v20  ;;  %v1557_v15 = vmul.f32 %v1504_v4, %v1429_v21 }
 0x361   : > { %v1899_v55 = vpack.c.bf16 %v1557_v15, %v1557_v15 }
 0x362   : > { %v1494_v60 = vpop.permute.xlu1 %1493 }
 0x363   : > { %1638 = vst.msk [vmem:[%s2769_s14 + $0x18] sm:$0xf] %vm1631_vm2, %v1899_v55  ;;  %v1555_v36 = vmul.f32 %v1494_v60, %v1427_v12 }
 0x365   : > { %v1897_v9 = vpack.c.bf16 %v1555_v36, %v1555_v36 }
 0x367   : > { %1636 = vst.msk [vmem:[%s2769_s14 + $0x10] sm:$0xf] %vm1631_vm2, %v1897_v9 }
 0x36a   : > { %v1509_v16 = vpop.permute.xlu0 %1508 }
 0x36b   : > { %v1558_v42 = vmul.f32 %v1509_v16, %v1430_v8 }
 0x36d   : > { %v1900_v33 = vpack.c.bf16 %v1558_v42, %v1558_v42 }
 0x36e   : > { %v1499_v39 = vpop.permute.xlu0 %1498 }
 0x36f   : > { %1639 = vst.msk [vmem:[%s2769_s14 + $0x1c] sm:$0xf] %vm1631_vm2, %v1900_v33  ;;  %v1556_v53 = vmul.f32 %v1499_v39, %v1428_v14 }
 0x371   : > { %v1898_v1 = vpack.c.bf16 %v1556_v53, %v1556_v53 }
 0x372   : > { %v1529_v41 = vpop.permute.xlu0 %1528 }
 0x373   : > { %1637 = vst.msk [vmem:[%s2769_s14 + $0x14] sm:$0xf] %vm1631_vm2, %v1898_v1  ;;  %v1524_v6 = vpop.permute.xlu1 %1523  ;;  %v1562_v5 = vmul.f32 %v1529_v41, %v1434_v57 }
 0x374   : > { %v1561_v45 = vmul.f32 %v1524_v6, %v1433_v44 }
 0x375   : > { %v1904_v2 = vpack.c.bf16 %v1562_v5, %v1562_v5 }
 0x376   : > { %v1903_v62 = vpack.c.bf16 %v1561_v45, %v1561_v45  ;;  %v1519_v37 = vpop.permute.xlu0 %1518 }
 0x377   : > { %1643 = vst.msk [vmem:[%s2769_s14 + $0x2c] sm:$0xf] %vm1631_vm2, %v1904_v2  ;;  %v1514_v23 = vpop.permute.xlu1 %1513  ;;  %v1560_v22 = vmul.f32 %v1519_v37, %v1432_v30 }
 0x378   : > { %1642 = vst.msk [vmem:[%s2769_s14 + $0x28] sm:$0xf] %vm1631_vm2, %v1903_v62  ;;  %v1559_v27 = vmul.f32 %v1514_v23, %v1431_v19 }
 0x379   : > { %v1902_v28 = vpack.c.bf16 %v1560_v22, %v1560_v22 }
 0x37a   : > { %v1901_v38 = vpack.c.bf16 %v1559_v27, %v1559_v27 }
 0x37b   : > { %1641 = vst.msk [vmem:[%s2769_s14 + $0x24] sm:$0xf] %vm1631_vm2, %v1902_v28  ;;  %v1534_v25 = vpop.permute.xlu1 %1533 }
 0x37c   : > { %1640 = vst.msk [vmem:[%s2769_s14 + $0x20] sm:$0xf] %vm1631_vm2, %v1901_v38  ;;  %v1563_v32 = vmul.f32 %v1534_v25, %v1435_v40 }
 0x37e   : > { %v1905_v46 = vpack.c.bf16 %v1563_v32, %v1563_v32  ;;  %v1539_v54 = vpop.permute.xlu0 %1538 }
 0x37f   : > { %v1544_v61 = vpop.permute.xlu1 %1543  ;;  %v1564_v0 = vmul.f32 %v1539_v54, %v1436_v48 }
 0x380   : > { %1644 = vst.msk [vmem:[%s2769_s14 + $0x30] sm:$0xf] %vm1631_vm2, %v1905_v46  ;;  %v1565_v43 = vmul.f32 %v1544_v61, %v1437_v58 }
 0x381   : > { %v1906_v51 = vpack.c.bf16 %v1564_v0, %v1564_v0 }
 0x382   : > { %v1907_v7 = vpack.c.bf16 %v1565_v43, %v1565_v43  ;;  %v1549_v24 = vpop.permute.xlu0 %1548 }
 0x383   : > { %1645 = vst.msk [vmem:[%s2769_s14 + $0x34] sm:$0xf] %vm1631_vm2, %v1906_v51  ;;  %v1566_v63 = vmul.f32 %v1549_v24, %v1438_v10 }
 0x384   : > { %1646 = vst.msk [vmem:[%s2769_s14 + $0x38] sm:$0xf] %vm1631_vm2, %v1907_v7 }
 0x385   : > { %v1908_v18 = vpack.c.bf16 %v1566_v63, %v1566_v63 }
 0x387   : > { %1647 = vst.msk [vmem:[%s2769_s14 + $0x3c] sm:$0xf] %vm1631_vm2, %v1908_v18 }
 0x388 PF: > { %s14_s19 = sadd.s32 1, %s2216_s19   ;;  %s2837_s15 = smov %s2208_s17 }
 0x389   : > { %p11_p7 = scmp.ge.s32.totalorder %s14_s19, 6   ;;  %s2838_s16 = smov %s2212_s18 }
 0x38a   : > { %s2839_s17 = smov %s2842_s20  ;;  %s2840_s18 = smov %s2846_s21 }
 0x38b   :  { %13 = sbr.rel (!%p11_p7) target bundleno = 3 (0x3), region = 83 }

// kernel: _lambda_.15
= control target key start
LH: loop header
LB: loop body
LE: loop exit
PB: predicated region body
PF: predicated region fallthrough
CT: control target
= control target key end

     0   :  { %s1252_s21 = smov 0   ;;  %s1254_s22 = smov 0   ;;  %s1573_s0 = inlined_call_operand.vmem [shape: bf16[256,128], index: 0, kind: input, shape index: {}]   ;;  %s1574_s1 = inlined_call_operand.vmem [shape: bf16[128,128], index: 1, kind: input, shape index: {}]   ;;  %s1575_s2 = inlined_call_operand.vmem [shape: f32[1,128], index: 2, kind: input, shape index: {}]   ;;  %s1576_s3 = inlined_call_operand.vmem [shape: f32[256,128], index: 3, kind: input, shape index: {}]   ;;  %s1577_s4 = inlined_call_operand.vmem [shape: f32[1,128], index: 4, kind: input, shape index: {}]   ;;  %s1578_s5 = inlined_call_operand.vmem [shape: f32[1,128], index: 5, kind: input, shape index: {}]   ;;  %s1579_s6 = inlined_call_operand.vmem [shape: f32[256,128], index: 6, kind: output, shape index: {}]  }
   0x1   :  { %s1256_s23 = smov 0  }
   0x2 LB: > { %s28_s24 = sadd.s32 1, %s1211_s22  ;;  %p1029_p0 = scmp.ge.s32.totalorder %s1215_s23, 1  ;;  %s1215_s23 = sphi %s1256_s23, %s16_s23   ;;  %s1211_s22 = sphi %s1254_s22, %s1581_s22   ;;  %s1207_s21 = sphi %s1252_s21, %s1580_s21  }
   0x3   : > { %p30_p1 = scmp.ge.s32.totalorder %s28_s24, 2  ;;  %p252_p2 = scmp.lt.s32.totalorder %s1215_s23, 3 }
   0x5   : > { %s1583_s24 = smov (%p30_p1, %s28_s24), 0  ;;  %p253_p3 = pnand %p1029_p0, %p252_p2 }
   0x6   : > { %s1030_s27 = sshll.u32 (!%p253_p3), %s1207_s21, 4 }
   0x7   : > { %256 = sbr.rel (%p253_p3) target bundleno = 581 (0x245), region = 44  ;;  %p296_p4 = scmp.lt.s32.totalorder (!%p253_p3), %s1030_s27, 31 }
   0xc   : > { %v1145_v0 = vld [vmem:[%s1574_s1 + $0x38] sm:$0xff]   ;;  %v1146_v1 = vld [vmem:[%s1574_s1 + $0x30] sm:$0xff]   ;;  %s1585_s27 = smov (!%p296_p4, %s1030_s27), 31  ;;  %v1147_v2 = vld [vmem:[%s1574_s1 + $0x28] sm:$0xff]  }
   0xd   : > { %1073 = vmatprep.subr.bf16.mxu0 %v1145_v0  ;;  %1105 = vmatprep.subr.bf16.mxu1 %v1145_v0  ;;  %s1031_s8 = sshll.u32 %s1585_s27, 2  ;;  %v1148_v3 = vld [vmem:[%s1574_s1 + $0x20] sm:$0xff]   ;;  %v1149_v6 = vld [vmem:[%s1574_s1 + $0x18] sm:$0xff]   ;;  %v1150_v7 = vld [vmem:[%s1574_s1 + $0x10] sm:$0xff]   ;;  %s1033_s25 = sshll.u32 %s1585_s27, 3 }
   0xe   : > { %1074 = vmatpush3.bf16.msra.mxu0 %v1145_v0  ;;  %1113 = vmatpush3.bf16.msra.mxu1 %v1145_v0  ;;  %s1285_s11 = scalar_lea.vmem %s1573_s0, %s1031_s8  ;;  %v1151_v8 = vld [vmem:[%s1574_s1 + $0x8] sm:$0xff]   ;;  %v1152_v9 = vld [vmem:[%s1574_s1] sm:$0xff]   ;;  %s1316_s29 = scalar_lea.vmem %s1576_s3, %s1033_s25 }
   0xf   : > { %1075 = vmatprep.subr.bf16.mxu0 %v1146_v1  ;;  %1106 = vmatprep.subr.bf16.mxu1 %v1146_v1  ;;  %v1153_v4 = vld [vmem:[%s1285_s11] sm:$0xff]   ;;  %v1155_v10 = vld [vmem:[%s1285_s11 + $0x8] sm:$0xff]   ;;  %v1157_v12 = vld [vmem:[%s1285_s11 + $0x10] sm:$0xff]   ;;  %s1500_s14 = scalar_lea.vmem %s1579_s6, %s1033_s25 }
  0x10   : > { %v1154_v5 = vld [vmem:[%s1285_s11 + $0x20] sm:$0xff]   ;;  %1089 = vmatprep.mubr.bf16.mxu0 %v1153_v4  ;;  %v1156_v11 = vld [vmem:[%s1285_s11 + $0x28] sm:$0xff]   ;;  %v1159_v13 = vld [vmem:[%s1285_s11 + $0x30] sm:$0xff]  }
  0x11   : > { %1097 = vmatprep.mubr.bf16.mxu1 %v1154_v5  ;;  %v1158_v14 = vld [vmem:[%s1285_s11 + $0x18] sm:$0xff]   ;;  %v1321_v16 = vld [vmem:[%s1575_s2] ss:$0 sm:$0xff]  ;;  %v668_v19 = vld [vmem:[%s1316_s29 + $0x50] sm:$0xff] }
  0x12   : > { %1076 = vmatpush3.bf16.msra.mxu0 %v1146_v1  ;;  %1114 = vmatpush3.bf16.msra.mxu1 %v1146_v1  ;;  %v1160_v15 = vld [vmem:[%s1285_s11 + $0x38] sm:$0xff]   ;;  %v660_v20 = vld [vmem:[%s1316_s29 + $0x10] sm:$0xff]  ;;  %v658_v30 = vld [vmem:[%s1316_s29] sm:$0xff] }
  0x13   : > { %1077 = vmatprep.subr.bf16.mxu0 %v1147_v2  ;;  %1107 = vmatprep.subr.bf16.mxu1 %v1147_v2  ;;  %v661_v31 = vld [vmem:[%s1316_s29 + $0x18] sm:$0xff]  ;;  %v666_v40 = vld [vmem:[%s1316_s29 + $0x40] sm:$0xff]  ;;  %v667_v49 = vld [vmem:[%s1316_s29 + $0x48] sm:$0xff] }
  0x14   : > { %v669_v41 = vld [vmem:[%s1316_s29 + $0x58] sm:$0xff]  ;;  %v659_v50 = vld [vmem:[%s1316_s29 + $0x8] sm:$0xff]  ;;  %v664_v54 = vld [vmem:[%s1316_s29 + $0x30] sm:$0xff] }
  0x15   : > { %v665_v55 = vld [vmem:[%s1316_s29 + $0x38] sm:$0xff]  ;;  %v662_v1 = vld [vmem:[%s1316_s29 + $0x20] sm:$0xff] }
  0x16   : > { %1078 = vmatpush3.bf16.msra.mxu0 %v1147_v2  ;;  %1115 = vmatpush3.bf16.msra.mxu1 %v1147_v2  ;;  %v663_v2 = vld [vmem:[%s1316_s29 + $0x28] sm:$0xff] }
  0x17   : > { %1079 = vmatprep.subr.bf16.mxu0 %v1148_v3  ;;  %1108 = vmatprep.subr.bf16.mxu1 %v1148_v3 }
  0x1a   : > { %1080 = vmatpush3.bf16.msra.mxu0 %v1148_v3  ;;  %1116 = vmatpush3.bf16.msra.mxu1 %v1148_v3 }
  0x1b   : > { %1081 = vmatprep.subr.bf16.mxu0 %v1149_v6  ;;  %1109 = vmatprep.subr.bf16.mxu1 %v1149_v6 }
  0x1e   : > { %1082 = vmatpush3.bf16.msra.mxu0 %v1149_v6  ;;  %1117 = vmatpush3.bf16.msra.mxu1 %v1149_v6 }
  0x1f   : > { %1083 = vmatprep.subr.bf16.mxu0 %v1150_v7  ;;  %1110 = vmatprep.subr.bf16.mxu1 %v1150_v7 }
  0x22   : > { %1084 = vmatpush3.bf16.msra.mxu0 %v1150_v7  ;;  %1118 = vmatpush3.bf16.msra.mxu1 %v1150_v7  ;;  %v670_v7 = vld [vmem:[%s1316_s29 + $0x60] sm:$0xff] }
  0x23   : > { %1085 = vmatprep.subr.bf16.mxu0 %v1151_v8  ;;  %1111 = vmatprep.subr.bf16.mxu1 %v1151_v8 }
  0x26   : > { %1086 = vmatpush3.bf16.msra.mxu0 %v1151_v8  ;;  %1119 = vmatpush3.bf16.msra.mxu1 %v1151_v8  ;;  %v671_v8 = vld [vmem:[%s1316_s29 + $0x68] sm:$0xff] }
  0x27   : > { %1087 = vmatprep.subr.bf16.mxu0 %v1152_v9  ;;  %1112 = vmatprep.subr.bf16.mxu1 %v1152_v9 }
  0x2a   : > { %1088 = vmatpush3.bf16.msra.mxu0 %v1152_v9  ;;  %1120 = vmatpush3.bf16.msra.mxu1 %v1152_v9 }
  0x2d   : > { %1090 = vmatmul.mubr.bf16.vlgmr.msra.gmra.mxu0 %v1155_v10  ;;  %1098 = vmatmul.mubr.bf16.vlgmr.msra.gmra.mxu1 %v1156_v11 }
  0x2e   : > { %1093 = vmatprep.mubr.bf16.mxu0 %v1157_v12  ;;  %1101 = vmatprep.mubr.bf16.mxu1 %v1159_v13  ;;  %v672_v13 = vld [vmem:[%s1316_s29 + $0x70] sm:$0xff] }
  0x35   : > { %1094 = vmatmul.mubr.bf16.gmra.mxu0 %v1158_v14  ;;  %1102 = vmatmul.mubr.bf16.gmra.mxu1 %v1160_v15  ;;  %v673_v14 = vld [vmem:[%s1316_s29 + $0x78] sm:$0xff] }
  0xed   : > { %v1091_v17 = vpop.f32.mrf.mxu0  ;;  %v1099_v18 = vpop.f32.mrf.mxu1 }
  0xee   : > { %v644_v21 = vadd.f32 %v1091_v17, %v1321_v16  ;;  %v652_v22 = vadd.f32 %v1099_v18, %v1321_v16 }
  0xef   : > { %v521_v23 = vpop.f32.mrf.mxu0  ;;  %v553_v24 = vpop.f32.mrf.mxu1 }
  0xf0   : > { %v642_v25 = vadd.f32 %v1321_v16, %v521_v23  ;;  %v1328_v26 = vadd.f32 %v668_v19, %v652_v22  ;;  %v1330_v27 = vadd.f32 %v660_v20, %v644_v21  ;;  %v650_v35 = vadd.f32 %v1321_v16, %v553_v24 }
  0xf1   : > { %v1092_v28 = vpop.f32.mrf.mxu0  ;;  %v1100_v29 = vpop.f32.mrf.mxu1 }
  0xf2   : > { %v645_v32 = vadd.f32 %v1092_v28, %v1321_v16  ;;  %710 = vadd.xlane.f32.xlu0 %v1328_v26  ;;  %694 = vadd.xlane.f32.xlu1 %v1330_v27  ;;  %v653_v36 = vadd.f32 %v1100_v29, %v1321_v16  ;;  %v1339_v37 = vadd.f32 %v658_v30, %v642_v25 }
  0xf3   : > { %v524_v33 = vpop.f32.mrf.mxu0  ;;  %v556_v34 = vpop.f32.mrf.mxu1  ;;  %v1349_v46 = vadd.f32 %v666_v40, %v650_v35 }
  0xf4   : > { %v1341_v38 = vadd.f32 %v661_v31, %v645_v32  ;;  %v643_v44 = vadd.f32 %v1321_v16, %v524_v33  ;;  %v651_v45 = vadd.f32 %v1321_v16, %v556_v34  ;;  %v1351_v47 = vadd.f32 %v669_v41, %v653_v36 }
  0xf5   : > { %v1095_v39 = vpop.f32.mrf.mxu0  ;;  %v1103_v42 = vpop.f32.mrf.mxu1 }
  0xf6   : > { %690 = vadd.xlane.f32.xlu0 %v1339_v37  ;;  %696 = vadd.xlane.f32.xlu1 %v1341_v38  ;;  %v648_v52 = vadd.f32 %v1095_v39, %v1321_v16  ;;  %v1361_v56 = vadd.f32 %v667_v49, %v651_v45  ;;  %v1363_v57 = vadd.f32 %v659_v50, %v643_v44 }
  0xf7   : > { %v537_v43 = vpop.f32.mrf.mxu0  ;;  %v569_v51 = vpop.f32.mrf.mxu1  ;;  %v656_v9 = vadd.f32 %v1103_v42, %v1321_v16 }
  0xf8   : > { %v1367_v60 = vadd.f32 %v664_v54, %v648_v52  ;;  %v646_v62 = vadd.f32 %v1321_v16, %v537_v43  ;;  %v654_v3 = vadd.f32 %v1321_v16, %v569_v51 }
  0xf9   : > { %v1096_v48 = vpop.f32.mrf.mxu0  ;;  %v1104_v59 = vpop.f32.mrf.mxu1  ;;  %v1397_v15 = vadd.f32 %v672_v13, %v656_v9 }
  0xfa   : > { %706 = vadd.xlane.f32.xlu0 %v1349_v46  ;;  %712 = vadd.xlane.f32.xlu1 %v1351_v47  ;;  %v649_v53 = vadd.f32 %v1096_v48, %v1321_v16  ;;  %v1379_v5 = vadd.f32 %v662_v1, %v646_v62  ;;  %v657_v10 = vadd.f32 %v1104_v59, %v1321_v16 }
  0xfb   : > { %v540_v58 = vpop.f32.mrf.mxu0  ;;  %v572_v0 = vpop.f32.mrf.mxu1  ;;  %v1389_v11 = vadd.f32 %v670_v7, %v654_v3 }
  0xfc   : > { %v1369_v61 = vadd.f32 %v665_v55, %v649_v53  ;;  %v647_v63 = vadd.f32 %v1321_v16, %v540_v58  ;;  %v655_v4 = vadd.f32 %v1321_v16, %v572_v0  ;;  %v1399_v17 = vadd.f32 %v673_v14, %v657_v10 }
  0xfe   : > { %708 = vadd.xlane.f32.xlu1 %v1361_v56  ;;  %692 = vadd.xlane.f32.xlu0 %v1363_v57  ;;  %v1381_v6 = vadd.f32 %v663_v2, %v647_v63  ;;  %v1391_v12 = vadd.f32 %v671_v8, %v655_v4 }
 0x102   : > { %702 = vadd.xlane.f32.xlu0 %v1367_v60  ;;  %704 = vadd.xlane.f32.xlu1 %v1369_v61 }
 0x106   : > { %698 = vadd.xlane.f32.xlu0 %v1379_v5  ;;  %700 = vadd.xlane.f32.xlu1 %v1381_v6 }
 0x10a   : > { %714 = vadd.xlane.f32.xlu0 %v1389_v11  ;;  %716 = vadd.xlane.f32.xlu1 %v1391_v12 }
 0x10e   : > { %718 = vadd.xlane.f32.xlu0 %v1397_v15  ;;  %720 = vadd.xlane.f32.xlu1 %v1399_v17 }
 0x17b   : > { %v711_v18 = vpop.xlane.xlu0 %710  ;;  %v695_v16 = vpop.xlane.xlu1 %694 }
 0x17c   : > { %v733_v19 = vmul.f32 0.0078125, %v711_v18  ;;  %v725_v20 = vmul.f32 0.0078125, %v695_v16 }
 0x17e   : > { %v1404_v21 = vsub.f32 %v1330_v27, %v725_v20  ;;  %v1407_v24 = vsub.f32 %v1328_v26, %v733_v19 }
 0x17f   : > { %v691_v22 = vpop.xlane.xlu0 %690  ;;  %v697_v23 = vpop.xlane.xlu1 %696 }
 0x180   : > { %v723_v25 = vmul.f32 0.0078125, %v691_v22  ;;  %v726_v28 = vmul.f32 0.0078125, %v697_v23  ;;  %v757_v29 = vmul.f32 %v1404_v21, %v1404_v21  ;;  %v765_v26 = vmul.f32 %v1407_v24, %v1407_v24 }
 0x182   : > { %v1412_v30 = vsub.f32 %v1341_v38, %v726_v28  ;;  %775 = vadd.xlane.f32.xlu0 %v757_v29  ;;  %v1415_v31 = vsub.f32 %v1339_v37, %v723_v25 }
 0x183   : > { %v707_v32 = vpop.xlane.xlu0 %706  ;;  %v713_v27 = vpop.xlane.xlu1 %712 }
 0x184   : > { %v731_v33 = vmul.f32 0.0078125, %v707_v32  ;;  %v734_v34 = vmul.f32 0.0078125, %v713_v27  ;;  %v758_v35 = vmul.f32 %v1412_v30, %v1412_v30  ;;  %v755_v37 = vmul.f32 %v1415_v31, %v1415_v31 }
 0x186   : > { %v1422_v36 = vsub.f32 %v1351_v47, %v734_v34  ;;  %791 = vadd.xlane.f32.xlu0 %v765_v26  ;;  %777 = vadd.xlane.f32.xlu1 %v758_v35  ;;  %v1427_v40 = vsub.f32 %v1349_v46, %v731_v33 }
 0x187   : > { %v709_v38 = vpop.xlane.xlu1 %708  ;;  %v693_v39 = vpop.xlane.xlu0 %692 }
 0x188   : > { %v732_v41 = vmul.f32 0.0078125, %v709_v38  ;;  %v724_v42 = vmul.f32 0.0078125, %v693_v39  ;;  %v766_v43 = vmul.f32 %v1422_v36, %v1422_v36  ;;  %v763_v46 = vmul.f32 %v1427_v40, %v1427_v40 }
 0x18a   : > { %v1432_v44 = vsub.f32 %v1363_v57, %v724_v42  ;;  %771 = vadd.xlane.f32.xlu0 %v755_v37  ;;  %793 = vadd.xlane.f32.xlu1 %v766_v43  ;;  %v1435_v45 = vsub.f32 %v1361_v56, %v732_v41 }
 0x18b   : > { %v703_v47 = vpop.xlane.xlu0 %702  ;;  %v705_v48 = vpop.xlane.xlu1 %704 }
 0x18c   : > { %v729_v49 = vmul.f32 0.0078125, %v703_v47  ;;  %v730_v50 = vmul.f32 0.0078125, %v705_v48  ;;  %v756_v51 = vmul.f32 %v1432_v44, %v1432_v44  ;;  %v764_v55 = vmul.f32 %v1435_v45, %v1435_v45 }
 0x18e   : > { %v1442_v52 = vsub.f32 %v1367_v60, %v729_v49  ;;  %787 = vadd.xlane.f32.xlu0 %v763_v46  ;;  %773 = vadd.xlane.f32.xlu1 %v756_v51  ;;  %v1447_v56 = vsub.f32 %v1369_v61, %v730_v50  ;;  %v1486_v51 = vld [vmem:[%s1577_s4] ss:$0 sm:$0xff] }
 0x18f   : > { %v699_v53 = vpop.xlane.xlu0 %698  ;;  %v701_v54 = vpop.xlane.xlu1 %700 }
 0x190   : > { %v727_v57 = vmul.f32 0.0078125, %v699_v53  ;;  %v728_v58 = vmul.f32 0.0078125, %v701_v54  ;;  %v761_v59 = vmul.f32 %v1442_v52, %v1442_v52  ;;  %v762_v3 = vmul.f32 %v1447_v56, %v1447_v56 }
 0x192   : > { %v1452_v62 = vsub.f32 %v1379_v5, %v727_v57  ;;  %783 = vadd.xlane.f32.xlu0 %v761_v59  ;;  %789 = vadd.xlane.f32.xlu1 %v764_v55  ;;  %v1455_v60 = vsub.f32 %v1381_v6, %v728_v58  ;;  %v1492_v57 = vld [vmem:[%s1578_s5] ss:$0 sm:$0xff] }
 0x193   : > { %v715_v63 = vpop.xlane.xlu0 %714  ;;  %v717_v0 = vpop.xlane.xlu1 %716 }
 0x194   : > { %v735_v1 = vmul.f32 0.0078125, %v715_v63  ;;  %v736_v2 = vmul.f32 0.0078125, %v717_v0  ;;  %v759_v61 = vmul.f32 %v1452_v62, %v1452_v62  ;;  %v760_v6 = vmul.f32 %v1455_v60, %v1455_v60 }
 0x196   : > { %v1462_v4 = vsub.f32 %v1389_v11, %v735_v1  ;;  %779 = vadd.xlane.f32.xlu0 %v759_v61  ;;  %785 = vadd.xlane.f32.xlu1 %v762_v3  ;;  %v1467_v8 = vsub.f32 %v1391_v12, %v736_v2 }
 0x197   : > { %v719_v5 = vpop.xlane.xlu0 %718  ;;  %v721_v7 = vpop.xlane.xlu1 %720 }
 0x198   : > { %v737_v9 = vmul.f32 0.0078125, %v719_v5  ;;  %v738_v10 = vmul.f32 0.0078125, %v721_v7  ;;  %v767_v13 = vmul.f32 %v1462_v4, %v1462_v4  ;;  %v768_v12 = vmul.f32 %v1467_v8, %v1467_v8 }
 0x19a   : > { %v1472_v14 = vsub.f32 %v1397_v15, %v737_v9  ;;  %795 = vadd.xlane.f32.xlu0 %v767_v13  ;;  %781 = vadd.xlane.f32.xlu1 %v760_v6  ;;  %v1475_v11 = vsub.f32 %v1399_v17, %v738_v10 }
 0x19c   : > { %v769_v18 = vmul.f32 %v1472_v14, %v1472_v14  ;;  %v770_v16 = vmul.f32 %v1475_v11, %v1475_v11 }
 0x19e   : > { %799 = vadd.xlane.f32.xlu0 %v769_v18  ;;  %797 = vadd.xlane.f32.xlu1 %v768_v12 }
 0x1a2   : > { %801 = vadd.xlane.f32.xlu1 %v770_v16 }
 0x20b   : > { %v776_v19 = vpop.xlane.xlu0 %775 }
 0x20c   : > { %v805_v15 = vmul.f32 0.0078125, %v776_v19 }
 0x20e   : > { %v821_v20 = vadd.f32 1e-12, %v805_v15 }
 0x20f   : > { %v792_v22 = vpop.xlane.xlu0 %791  ;;  %v778_v23 = vpop.xlane.xlu1 %777 }
 0x210   : > { %1161 = vrsqrt.f32 %v821_v20  ;;  %v813_v17 = vmul.f32 0.0078125, %v792_v22  ;;  %v806_v25 = vmul.f32 0.0078125, %v778_v23 }
 0x212   : > { %v829_v28 = vadd.f32 1e-12, %v813_v17  ;;  %v822_v29 = vadd.f32 1e-12, %v806_v25 }
 0x213   : > { %v772_v32 = vpop.xlane.xlu0 %771  ;;  %v794_v27 = vpop.xlane.xlu1 %793 }
 0x214   : > { %1163 = vrsqrt.f32 %v829_v28  ;;  %v803_v33 = vmul.f32 0.0078125, %v772_v32  ;;  %v814_v34 = vmul.f32 0.0078125, %v794_v27 }
 0x215   : > { %1165 = vrsqrt.f32 %v822_v29 }
 0x216   : > { %v819_v26 = vadd.f32 1e-12, %v803_v33  ;;  %v830_v35 = vadd.f32 1e-12, %v814_v34 }
 0x217   : > { %v788_v38 = vpop.xlane.xlu0 %787  ;;  %v774_v39 = vpop.xlane.xlu1 %773 }
 0x218   : > { %1167 = vrsqrt.f32 %v819_v26  ;;  %v811_v37 = vmul.f32 0.0078125, %v788_v38  ;;  %v804_v41 = vmul.f32 0.0078125, %v774_v39 }
 0x219   : > { %1169 = vrsqrt.f32 %v830_v35 }
 0x21a   : > { %v827_v42 = vadd.f32 1e-12, %v811_v37  ;;  %v820_v43 = vadd.f32 1e-12, %v804_v41 }
 0x21b   : > { %v784_v47 = vpop.xlane.xlu0 %783  ;;  %v790_v48 = vpop.xlane.xlu1 %789 }
 0x21c   : > { %1171 = vrsqrt.f32 %v827_v42  ;;  %v809_v49 = vmul.f32 0.0078125, %v784_v47  ;;  %v812_v50 = vmul.f32 0.0078125, %v790_v48 }
 0x21d   : > { %v1162_v46 = vpop.eup %1161  ;;  %1173 = vrsqrt.f32 %v820_v43 }
 0x21e   : > { %v853_v53 = vmul.f32 %v1162_v46, %v1404_v21  ;;  %v825_v54 = vadd.f32 1e-12, %v809_v49  ;;  %v828_v55 = vadd.f32 1e-12, %v812_v50 }
 0x21f   : > { %v780_v58 = vpop.xlane.xlu0 %779  ;;  %v786_v59 = vpop.xlane.xlu1 %785 }
 0x220   : > { %v876_v63 = vmul.f32 %v1486_v51, %v853_v53  ;;  %1175 = vrsqrt.f32 %v825_v54  ;;  %v807_v0 = vmul.f32 0.0078125, %v780_v58  ;;  %v810_v1 = vmul.f32 0.0078125, %v786_v59 }
 0x221   : > { %v1164_v2 = vpop.eup %1163  ;;  %1177 = vrsqrt.f32 %v828_v55 }
 0x222   : > { %v1166_v21 = vpop.eup %1165  ;;  %v899_v61 = vadd.f32 %v1492_v57, %v876_v63  ;;  %v861_v3 = vmul.f32 %v1164_v2, %v1407_v24  ;;  %v823_v5 = vadd.f32 1e-12, %v807_v0  ;;  %v826_v7 = vadd.f32 1e-12, %v810_v1 }
 0x223   : > { %v854_v6 = vmul.f32 %v1166_v21, %v1412_v30  ;;  %v796_v9 = vpop.xlane.xlu0 %795  ;;  %v782_v10 = vpop.xlane.xlu1 %781 }
 0x224   : > { %915 = vst [vmem:[%s1500_s14 + $0x10] sm:$0xff] %v899_v61  ;;  %v884_v13 = vmul.f32 %v1486_v51, %v861_v3  ;;  %1179 = vrsqrt.f32 %v823_v5  ;;  %v815_v18 = vmul.f32 0.0078125, %v796_v9  ;;  %v808_v12 = vmul.f32 0.0078125, %v782_v10 }
 0x225   : > { %v1168_v16 = vpop.eup %1167  ;;  %v877_v19 = vmul.f32 %v1486_v51, %v854_v6  ;;  %1181 = vrsqrt.f32 %v826_v7 }
 0x226   : > { %v1170_v15 = vpop.eup %1169  ;;  %v907_v24 = vadd.f32 %v1492_v57, %v884_v13  ;;  %v851_v20 = vmul.f32 %v1168_v16, %v1415_v31  ;;  %v831_v30 = vadd.f32 1e-12, %v815_v18  ;;  %v824_v22 = vadd.f32 1e-12, %v808_v12 }
 0x227   : > { %v900_v23 = vadd.f32 %v1492_v57, %v877_v19  ;;  %v862_v17 = vmul.f32 %v1170_v15, %v1422_v36  ;;  %v800_v25 = vpop.xlane.xlu0 %799  ;;  %v798_v28 = vpop.xlane.xlu1 %797 }
 0x228   : > { %923 = vst [vmem:[%s1500_s14 + $0x50] sm:$0xff] %v907_v24  ;;  %v874_v29 = vmul.f32 %v1486_v51, %v851_v20  ;;  %1183 = vrsqrt.f32 %v831_v30  ;;  %v817_v32 = vmul.f32 0.0078125, %v800_v25  ;;  %v816_v27 = vmul.f32 0.0078125, %v798_v28 }
 0x229   : > { %v1172_v33 = vpop.eup %1171  ;;  %916 = vst [vmem:[%s1500_s14 + $0x18] sm:$0xff] %v900_v23  ;;  %v885_v31 = vmul.f32 %v1486_v51, %v862_v17  ;;  %1185 = vrsqrt.f32 %v824_v22 }
 0x22a   : > { %v1174_v34 = vpop.eup %1173  ;;  %v897_v26 = vadd.f32 %v1492_v57, %v874_v29  ;;  %v859_v36 = vmul.f32 %v1172_v33, %v1427_v40  ;;  %v833_v35 = vadd.f32 1e-12, %v817_v32  ;;  %v832_v38 = vadd.f32 1e-12, %v816_v27 }
 0x22b   : > { %v908_v39 = vadd.f32 %v1492_v57, %v885_v31  ;;  %v852_v37 = vmul.f32 %v1174_v34, %v1432_v44  ;;  %v802_v41 = vpop.xlane.xlu1 %801 }
 0x22c   : > { %913 = vst [vmem:[%s1500_s14] sm:$0xff] %v897_v26  ;;  %v882_v42 = vmul.f32 %v1486_v51, %v859_v36  ;;  %1187 = vrsqrt.f32 %v833_v35  ;;  %v818_v43 = vmul.f32 0.0078125, %v802_v41 }
 0x22d   : > { %v1176_v47 = vpop.eup %1175  ;;  %924 = vst [vmem:[%s1500_s14 + $0x58] sm:$0xff] %v908_v39  ;;  %v875_v48 = vmul.f32 %v1486_v51, %v852_v37  ;;  %1189 = vrsqrt.f32 %v832_v38 }
 0x22e   : > { %v1178_v40 = vpop.eup %1177  ;;  %v905_v49 = vadd.f32 %v1492_v57, %v882_v42  ;;  %v857_v50 = vmul.f32 %v1176_v47, %v1442_v52  ;;  %v834_v44 = vadd.f32 1e-12, %v818_v43 }
 0x22f   : > { %v898_v46 = vadd.f32 %v1492_v57, %v875_v48  ;;  %v860_v53 = vmul.f32 %v1178_v40, %v1435_v45 }
 0x230   : > { %921 = vst [vmem:[%s1500_s14 + $0x40] sm:$0xff] %v905_v49  ;;  %v880_v54 = vmul.f32 %v1486_v51, %v857_v50  ;;  %1191 = vrsqrt.f32 %v834_v44 }
 0x231   : > { %v1180_v55 = vpop.eup %1179  ;;  %914 = vst [vmem:[%s1500_s14 + $0x8] sm:$0xff] %v898_v46  ;;  %v883_v58 = vmul.f32 %v1486_v51, %v860_v53 }
 0x232   : > { %v1182_v59 = vpop.eup %1181  ;;  %v903_v63 = vadd.f32 %v1492_v57, %v880_v54  ;;  %v855_v52 = vmul.f32 %v1180_v55, %v1452_v62 }
 0x233   : > { %v906_v0 = vadd.f32 %v1492_v57, %v883_v58  ;;  %v858_v1 = vmul.f32 %v1182_v59, %v1447_v56 }
 0x234   : > { %919 = vst [vmem:[%s1500_s14 + $0x30] sm:$0xff] %v903_v63  ;;  %v878_v45 = vmul.f32 %v1486_v51, %v855_v52 }
 0x235   : > { %v1184_v2 = vpop.eup %1183  ;;  %922 = vst [vmem:[%s1500_s14 + $0x48] sm:$0xff] %v906_v0  ;;  %v881_v21 = vmul.f32 %v1486_v51, %v858_v1 }
 0x236   : > { %v1186_v61 = vpop.eup %1185  ;;  %v901_v3 = vadd.f32 %v1492_v57, %v878_v45  ;;  %v863_v5 = vmul.f32 %v1184_v2, %v1462_v4 }
 0x237   : > { %v904_v62 = vadd.f32 %v1492_v57, %v881_v21  ;;  %v856_v7 = vmul.f32 %v1186_v61, %v1455_v60 }
 0x238   : > { %917 = vst [vmem:[%s1500_s14 + $0x20] sm:$0xff] %v901_v3  ;;  %v886_v56 = vmul.f32 %v1486_v51, %v863_v5 }
 0x239   : > { %v1188_v6 = vpop.eup %1187  ;;  %920 = vst [vmem:[%s1500_s14 + $0x38] sm:$0xff] %v904_v62  ;;  %v879_v9 = vmul.f32 %v1486_v51, %v856_v7 }
 0x23a   : > { %v1190_v10 = vpop.eup %1189  ;;  %v909_v13 = vadd.f32 %v1492_v57, %v886_v56  ;;  %v865_v4 = vmul.f32 %v1188_v6, %v1472_v14 }
 0x23b   : > { %v902_v18 = vadd.f32 %v1492_v57, %v879_v9  ;;  %v864_v12 = vmul.f32 %v1190_v10, %v1467_v8 }
 0x23c   : > { %925 = vst [vmem:[%s1500_s14 + $0x60] sm:$0xff] %v909_v13  ;;  %v888_v60 = vmul.f32 %v1486_v51, %v865_v4 }
 0x23d   : > { %v1192_v16 = vpop.eup %1191  ;;  %918 = vst [vmem:[%s1500_s14 + $0x28] sm:$0xff] %v902_v18  ;;  %v887_v19 = vmul.f32 %v1486_v51, %v864_v12 }
 0x23e   : > { %v911_v15 = vadd.f32 %v1492_v57, %v888_v60  ;;  %v866_v24 = vmul.f32 %v1192_v16, %v1475_v11 }
 0x23f   : > { %v910_v20 = vadd.f32 %v1492_v57, %v887_v19 }
 0x240   : > { %927 = vst [vmem:[%s1500_s14 + $0x70] sm:$0xff] %v911_v15  ;;  %v889_v14 = vmul.f32 %v1486_v51, %v866_v24 }
 0x241   : > { %926 = vst [vmem:[%s1500_s14 + $0x68] sm:$0xff] %v910_v20 }
 0x242   : > { %v912_v30 = vadd.f32 %v1492_v57, %v889_v14 }
 0x244   : > { %928 = vst [vmem:[%s1500_s14 + $0x78] sm:$0xff] %v912_v30 }
 0x245 PF: > { %s16_s23 = sadd.s32 1, %s1215_s23   ;;  %s1580_s21 = smov %s1211_s22 }
 0x246   : > { %p13_p5 = scmp.ge.s32.totalorder %s16_s23, 4   ;;  %s1581_s22 = smov %s1583_s24 }
 0x248   :  { %15 = sbr.rel (!%p13_p5) target bundleno = 2 (0x2), region = 88 }

// kernel: _lambda_.17
= control target key start
LH: loop header
LB: loop body
LE: loop exit
PB: predicated region body
PF: predicated region fallthrough
CT: control target
= control target key end

     0   :  { %s1427_s21 = smov 0   ;;  %s1429_s22 = smov 0   ;;  %s1805_s0 = inlined_call_operand.vmem [shape: bf16[256,256], index: 0, kind: input, shape index: {}]   ;;  %s1806_s1 = inlined_call_operand.vmem [shape: bf16[256,128], index: 1, kind: input, shape index: {}]   ;;  %s1807_s2 = inlined_call_operand.vmem [shape: f32[1,128], index: 2, kind: input, shape index: {}]   ;;  %s1808_s3 = inlined_call_operand.vmem [shape: f32[256,128], index: 3, kind: input, shape index: {}]   ;;  %s1809_s4 = inlined_call_operand.vmem [shape: f32[1,128], index: 4, kind: input, shape index: {}]   ;;  %s1810_s5 = inlined_call_operand.vmem [shape: f32[1,128], index: 5, kind: input, shape index: {}]   ;;  %s1811_s6 = inlined_call_operand.vmem [shape: f32[256,128], index: 6, kind: output, shape index: {}]  }
   0x1   :  { %s1431_s23 = smov 0   ;;  %s1433_s24 = smov 0  }
   0x2   :  { %s1435_s25 = smov 0   ;;  %s1437_s26 = smov 0  }
   0x3   :  { %s1439_s27 = smov 0  }
   0x4 LB: > { %s25_s28 = sadd.s32 1, %s1381_s25  ;;  %s28_s29 = sadd.s32 1, %s1385_s26  ;;  %s1389_s27 = sphi %s1439_s27, %s16_s27   ;;  %s1385_s26 = sphi %s1437_s26, %s1817_s26   ;;  %s1381_s25 = sphi %s1435_s25, %s1816_s25   ;;  %s1377_s24 = sphi %s1433_s24, %s1815_s24   ;;  %s1373_s23 = sphi %s1431_s23, %s1814_s23   ;;  %s1369_s22 = sphi %s1429_s22, %s1813_s22   ;;  %s1365_s21 = sphi %s1427_s21, %s1812_s21  }
   0x5   : > { %p26_p0 = scmp.ge.s32.totalorder %s25_s28, 2  ;;  %p44_p1 = scmp.ne.s32.totalorder %s1369_s22, %s1365_s21 }
   0x6   : > { %p45_p2 = scmp.eq.s32.totalorder %s1389_s27, 0  ;;  %s37_s9 = sadd.s32 1, %s1369_s22 }
   0x7   : > { %s1819_s28 = smov (%p26_p0, %s25_s28), 0  ;;  %s1821_s29 = smov (!%p26_p0, %s28_s29), %s1385_s26 }
   0x8   : > { %p46_p3 = por %p45_p2, %p44_p1  ;;  %p30_p4 = scmp.ge.s32.totalorder %s1821_s29, 2 }
   0x9   : > { %s33_s30 = ssub.s32 %s1381_s25, %s1819_s28  ;;  %p1129_p6 = scmp.ge.s32.totalorder %s1389_s27, 4 }
   0xa   : > { %s1823_s29 = smov (%p30_p4, %s1821_s29), 0 }
   0xb   : > { %s32_s7 = ssub.s32 %s1385_s26, %s1823_s29  ;;  %220 = sbr.rel (%p1129_p6) target bundleno = 32 (0x20), region = 28 }
   0xc   : > { %s34_s8 = sor.u32 %s33_s30, %s32_s7 }
   0xd   : > { %p35_p5 = scmp.eq.s32.totalorder %s34_s8, 0 }
   0xf   : > { %s1478_s10 = scalar_select %p35_p5, %s1369_s22, %s37_s9  }
  0x10   : > { %223 = sbr.rel (!%p46_p3) target bundleno = 32 (0x20), region = 32  ;;  %s225_s11 = sand.u32 (%p46_p3), 1, %s1369_s22  }
  0x11   : > { %s1165_s12 = sshll.u32 (%p46_p3), %s1385_s26, 5  ;;  %s1130_s13 = sshll.u32 (%p46_p3), %s225_s11, 6 }
  0x12   : > { %s230_s14 = sadd.s32 (%p46_p3), %s1381_s25, %s1165_s12  ;;  %s227_s19 = scalar_lea.vmem (%p46_p3), [#allocation3], %s1130_s13 }
  0x13   : > { %s1133_s15 = sshll.u32 (%p46_p3), %s230_s14, 2 }
  0x14   : > { %s1487_s18 = scalar_lea.vmem (%p46_p3), %s1805_s0, %s1133_s15 }
  0x15   : > { %v249_v0 = vld [vmem:[%s1487_s18] sm:$0xf]  ;;  %v251_v1 = vld [vmem:[%s1487_s18 + $0x8] sm:$0xf]  ;;  %v253_v2 = vld [vmem:[%s1487_s18 + $0x10] sm:$0xf] }
  0x16   : > { %250 = vst [vmem:[%s227_s19] sm:$0xf] %v249_v0  ;;  %252 = vst [vmem:[%s227_s19 + $0x4] sm:$0xf] %v251_v1  ;;  %v255_v3 = vld [vmem:[%s1487_s18 + $0x18] sm:$0xf] }
  0x17   : > { %254 = vst [vmem:[%s227_s19 + $0x8] sm:$0xf] %v253_v2  ;;  %v257_v4 = vld [vmem:[%s1487_s18 + $0x20] sm:$0xf]  ;;  %v259_v5 = vld [vmem:[%s1487_s18 + $0x28] sm:$0xf] }
  0x18   : > { %256 = vst [vmem:[%s227_s19 + $0xc] sm:$0xf] %v255_v3  ;;  %258 = vst [vmem:[%s227_s19 + $0x10] sm:$0xf] %v257_v4  ;;  %v261_v6 = vld [vmem:[%s1487_s18 + $0x30] sm:$0xf] }
  0x19   : > { %260 = vst [vmem:[%s227_s19 + $0x14] sm:$0xf] %v259_v5  ;;  %v263_v7 = vld [vmem:[%s1487_s18 + $0x38] sm:$0xf]  ;;  %v265_v8 = vld [vmem:[%s1487_s18 + $0x40] sm:$0xf] }
  0x1a   : > { %262 = vst [vmem:[%s227_s19 + $0x18] sm:$0xf] %v261_v6  ;;  %264 = vst [vmem:[%s227_s19 + $0x1c] sm:$0xf] %v263_v7  ;;  %v267_v9 = vld [vmem:[%s1487_s18 + $0x48] sm:$0xf] }
  0x1b   : > { %266 = vst [vmem:[%s227_s19 + $0x20] sm:$0xf] %v265_v8  ;;  %v269_v10 = vld [vmem:[%s1487_s18 + $0x50] sm:$0xf]  ;;  %v271_v11 = vld [vmem:[%s1487_s18 + $0x58] sm:$0xf] }
  0x1c   : > { %268 = vst [vmem:[%s227_s19 + $0x24] sm:$0xf] %v267_v9  ;;  %270 = vst [vmem:[%s227_s19 + $0x28] sm:$0xf] %v269_v10  ;;  %v273_v12 = vld [vmem:[%s1487_s18 + $0x60] sm:$0xf] }
  0x1d   : > { %272 = vst [vmem:[%s227_s19 + $0x2c] sm:$0xf] %v271_v11  ;;  %v275_v13 = vld [vmem:[%s1487_s18 + $0x68] sm:$0xf]  ;;  %v277_v14 = vld [vmem:[%s1487_s18 + $0x70] sm:$0xf] }
  0x1e   : > { %274 = vst [vmem:[%s227_s19 + $0x30] sm:$0xf] %v273_v12  ;;  %276 = vst [vmem:[%s227_s19 + $0x34] sm:$0xf] %v275_v13  ;;  %v279_v15 = vld [vmem:[%s1487_s18 + $0x78] sm:$0xf] }
  0x1f   : > { %278 = vst [vmem:[%s227_s19 + $0x38] sm:$0xf] %v277_v14  ;;  %280 = vst [vmem:[%s227_s19 + $0x3c] sm:$0xf] %v279_v15 }
  0x20 PF: > { %p1134_p7 = scmp.ge.s32.totalorder %s1389_s27, 1  ;;  %p353_p8 = scmp.lt.s32.totalorder %s1389_s27, 5 }
  0x22   : > { %p354_p9 = pnand %p1134_p7, %p353_p8 }
  0x23   : > { %s360_s20 = sand.u32 (!%p354_p9), 1, %s1365_s21   ;;  %s1136_s30 = sshll.u32 (!%p354_p9), %s1373_s23, 4 }
  0x24   : > { %357 = sbr.rel (%p354_p9) target bundleno = 645 (0x285), region = 81  ;;  %s1135_s7 = sshll.u32 (!%p354_p9), %s360_s20, 6 }
  0x25   : > { %p401_p10 = scmp.lt.s32.totalorder (!%p354_p9), %s1136_s30, 31  ;;  %s1138_s8 = sshll.u32 (!%p354_p9), %s1377_s24, 4 }
  0x26   : > { %p407_p11 = scmp.lt.s32.totalorder (!%p354_p9), %s1138_s8, 31  ;;  %s1525_s24 = scalar_lea.vmem (!%p354_p9), [#allocation3], %s1135_s7 }
  0x27   : > { %p1142_p12 = scmp.ne.s32.totalorder (!%p354_p9), %s1373_s23, 0 }
  0x29   : > { %s1825_s30 = smov (!%p401_p10, %s1136_s30), 31  ;;  %s1827_s8 = smov (!%p407_p11, %s1138_s8), 31 }
  0x2a   : > { %s1137_s9 = sshll.u32 %s1825_s30, 2  ;;  %s1139_s14 = sshll.u32 %s1827_s8, 3 }
  0x2b   : > { %s1513_s13 = scalar_lea.vmem %s1806_s1, %s1137_s9  ;;  %s1518_s17 = scalar_lea.vmem %s1808_s3, %s1139_s14 }
  0x2c   : > { %s1523_s19 = scalar_lea.vmem %s1811_s6, %s1139_s14  ;;  %422 = sbr.rel (%p1142_p12) target bundleno = 58 (0x3a), region = 89 }
  0x31   : > { %v1391_v16 = vmov 0.0  }
  0x32   : > { %423 = vst [vmem:[#allocation2 + $0x30] sm:$0xff] %v1391_v16  ;;  %424 = vst [vmem:[#allocation2] sm:$0xff] %v1391_v16 }
  0x33   : > { %425 = vst [vmem:[#allocation2 + $0x58] sm:$0xff] %v1391_v16  ;;  %426 = vst [vmem:[#allocation2 + $0x18] sm:$0xff] %v1391_v16 }
  0x34   : > { %427 = vst [vmem:[#allocation2 + $0x50] sm:$0xff] %v1391_v16  ;;  %428 = vst [vmem:[#allocation2 + $0x68] sm:$0xff] %v1391_v16 }
  0x35   : > { %429 = vst [vmem:[#allocation2 + $0x8] sm:$0xff] %v1391_v16  ;;  %430 = vst [vmem:[#allocation2 + $0x48] sm:$0xff] %v1391_v16 }
  0x36   : > { %431 = vst [vmem:[#allocation2 + $0x40] sm:$0xff] %v1391_v16  ;;  %432 = vst [vmem:[#allocation2 + $0x20] sm:$0xff] %v1391_v16 }
  0x37   : > { %433 = vst [vmem:[#allocation2 + $0x10] sm:$0xff] %v1391_v16  ;;  %434 = vst [vmem:[#allocation2 + $0x38] sm:$0xff] %v1391_v16 }
  0x38   : > { %435 = vst [vmem:[#allocation2 + $0x60] sm:$0xff] %v1391_v16  ;;  %436 = vst [vmem:[#allocation2 + $0x70] sm:$0xff] %v1391_v16 }
  0x39   : > { %437 = vst [vmem:[#allocation2 + $0x78] sm:$0xff] %v1391_v16  ;;  %438 = vst [vmem:[#allocation2 + $0x28] sm:$0xff] %v1391_v16 }
  0x3a PF: > { %v1287_v17 = vld [vmem:[%s1513_s13 + $0x38] sm:$0xff]   ;;  %v1288_v18 = vld [vmem:[%s1513_s13 + $0x30] sm:$0xff]   ;;  %v1289_v19 = vld [vmem:[%s1513_s13 + $0x28] sm:$0xff]   ;;  %p1159_p13 = scmp.ne.s32.totalorder %s1373_s23, 1 }
  0x3b   : > { %1182 = vmatprep.subr.bf16.mxu0 %v1287_v17  ;;  %1214 = vmatprep.subr.bf16.mxu1 %v1287_v17  ;;  %v1290_v20 = vld [vmem:[%s1513_s13 + $0x20] sm:$0xff]   ;;  %v1291_v23 = vld [vmem:[%s1513_s13 + $0x18] sm:$0xff]   ;;  %v1292_v24 = vld [vmem:[%s1513_s13 + $0x10] sm:$0xff]  }
  0x3c   : > { %1183 = vmatpush3.bf16.msra.mxu0 %v1287_v17  ;;  %1222 = vmatpush3.bf16.msra.mxu1 %v1287_v17  ;;  %v1295_v21 = vld [vmem:[%s1525_s24] sm:$0xff]   ;;  %v1293_v25 = vld [vmem:[%s1513_s13 + $0x8] sm:$0xff]   ;;  %v1299_v29 = vld [vmem:[%s1525_s24 + $0x10] sm:$0xff]  }
  0x3d   : > { %1184 = vmatprep.subr.bf16.mxu0 %v1288_v18  ;;  %1215 = vmatprep.subr.bf16.mxu1 %v1288_v18  ;;  %v1296_v22 = vld [vmem:[%s1525_s24 + $0x20] sm:$0xff]   ;;  %v1297_v27 = vld [vmem:[%s1525_s24 + $0x8] sm:$0xff]   ;;  %v1300_v30 = vld [vmem:[%s1525_s24 + $0x30] sm:$0xff]  }
  0x3e   : > { %1198 = vmatprep.mubr.bf16.mxu0 %v1295_v21  ;;  %1206 = vmatprep.mubr.bf16.mxu1 %v1296_v22  ;;  %v1294_v26 = vld [vmem:[%s1513_s13] sm:$0xff]   ;;  %v1298_v28 = vld [vmem:[%s1525_s24 + $0x28] sm:$0xff]   ;;  %v1301_v31 = vld [vmem:[%s1525_s24 + $0x18] sm:$0xff]  }
  0x3f   : > { %v1302_v32 = vld [vmem:[%s1525_s24 + $0x38] sm:$0xff]   ;;  %v449_v34 = vld [vmem:[#allocation2 + $0x10] sm:$0xff]  ;;  %v447_v38 = vld [vmem:[#allocation2 + $0x40] sm:$0xff] }
  0x40   : > { %1185 = vmatpush3.bf16.msra.mxu0 %v1288_v18  ;;  %1223 = vmatpush3.bf16.msra.mxu1 %v1288_v18  ;;  %v441_v33 = vld [vmem:[#allocation2 + $0x58] sm:$0xff]  ;;  %v439_v37 = vld [vmem:[#allocation2 + $0x30] sm:$0xff]  ;;  %v440_v49 = vld [vmem:[#allocation2] sm:$0xff] }
  0x41   : > { %1186 = vmatprep.subr.bf16.mxu0 %v1289_v19  ;;  %1216 = vmatprep.subr.bf16.mxu1 %v1289_v19  ;;  %v442_v43 = vld [vmem:[#allocation2 + $0x18] sm:$0xff]  ;;  %v448_v50 = vld [vmem:[#allocation2 + $0x20] sm:$0xff]  ;;  %v445_v55 = vld [vmem:[#allocation2 + $0x8] sm:$0xff] }
  0x42   : > { %v450_v44 = vld [vmem:[#allocation2 + $0x38] sm:$0xff]  ;;  %v443_v61 = vld [vmem:[#allocation2 + $0x50] sm:$0xff]  ;;  %v451_v62 = vld [vmem:[#allocation2 + $0x60] sm:$0xff] }
  0x43   : > { %v453_v56 = vld [vmem:[#allocation2 + $0x78] sm:$0xff]  ;;  %v446_v3 = vld [vmem:[#allocation2 + $0x48] sm:$0xff]  ;;  %v452_v10 = vld [vmem:[#allocation2 + $0x70] sm:$0xff] }
  0x44   : > { %1187 = vmatpush3.bf16.msra.mxu0 %v1289_v19  ;;  %1224 = vmatpush3.bf16.msra.mxu1 %v1289_v19  ;;  %v454_v4 = vld [vmem:[#allocation2 + $0x28] sm:$0xff] }
  0x45   : > { %1188 = vmatprep.subr.bf16.mxu0 %v1290_v20  ;;  %1217 = vmatprep.subr.bf16.mxu1 %v1290_v20  ;;  %v444_v9 = vld [vmem:[#allocation2 + $0x68] sm:$0xff] }
  0x48   : > { %1189 = vmatpush3.bf16.msra.mxu0 %v1290_v20  ;;  %1225 = vmatpush3.bf16.msra.mxu1 %v1290_v20 }
  0x49   : > { %1190 = vmatprep.subr.bf16.mxu0 %v1291_v23  ;;  %1218 = vmatprep.subr.bf16.mxu1 %v1291_v23 }
  0x4c   : > { %1191 = vmatpush3.bf16.msra.mxu0 %v1291_v23  ;;  %1226 = vmatpush3.bf16.msra.mxu1 %v1291_v23 }
  0x4d   : > { %1192 = vmatprep.subr.bf16.mxu0 %v1292_v24  ;;  %1219 = vmatprep.subr.bf16.mxu1 %v1292_v24 }
  0x50   : > { %1193 = vmatpush3.bf16.msra.mxu0 %v1292_v24  ;;  %1227 = vmatpush3.bf16.msra.mxu1 %v1292_v24 }
  0x51   : > { %1194 = vmatprep.subr.bf16.mxu0 %v1293_v25  ;;  %1220 = vmatprep.subr.bf16.mxu1 %v1293_v25 }
  0x54   : > { %1195 = vmatpush3.bf16.msra.mxu0 %v1293_v25  ;;  %1228 = vmatpush3.bf16.msra.mxu1 %v1293_v25 }
  0x55   : > { %1196 = vmatprep.subr.bf16.mxu0 %v1294_v26  ;;  %1221 = vmatprep.subr.bf16.mxu1 %v1294_v26 }
  0x58   : > { %1197 = vmatpush3.bf16.msra.mxu0 %v1294_v26  ;;  %1229 = vmatpush3.bf16.msra.mxu1 %v1294_v26 }
  0x5b   : > { %1199 = vmatmul.mubr.bf16.vlgmr.msra.gmra.mxu0 %v1297_v27  ;;  %1207 = vmatmul.mubr.bf16.vlgmr.msra.gmra.mxu1 %v1298_v28 }
  0x5c   : > { %1202 = vmatprep.mubr.bf16.mxu0 %v1299_v29  ;;  %1210 = vmatprep.mubr.bf16.mxu1 %v1300_v30 }
  0x63   : > { %1203 = vmatmul.mubr.bf16.gmra.mxu0 %v1301_v31  ;;  %1211 = vmatmul.mubr.bf16.gmra.mxu1 %v1302_v32 }
 0x11b   : > { %v1200_v35 = vpop.f32.mrf.mxu0  ;;  %v1208_v36 = vpop.f32.mrf.mxu1 }
 0x11c   : > { %v682_v39 = vadd.f32 %v1200_v35, %v441_v33  ;;  %v690_v40 = vadd.f32 %v1208_v36, %v449_v34 }
 0x11d   : > { %v617_v41 = vpop.f32.mrf.mxu0  ;;  %v649_v42 = vpop.f32.mrf.mxu1 }
 0x11e   : > { %698 = vst [vmem:[#allocation2 + $0x58] sm:$0xff] %v682_v39  ;;  %706 = vst [vmem:[#allocation2 + $0x10] sm:$0xff] %v690_v40  ;;  %v680_v45 = vadd.f32 %v617_v41, %v439_v37  ;;  %v688_v46 = vadd.f32 %v649_v42, %v447_v38 }
 0x11f   : > { %v1201_v47 = vpop.f32.mrf.mxu0  ;;  %v1209_v48 = vpop.f32.mrf.mxu1 }
 0x120   : > { %696 = vst [vmem:[#allocation2 + $0x30] sm:$0xff] %v680_v45  ;;  %704 = vst [vmem:[#allocation2 + $0x40] sm:$0xff] %v688_v46  ;;  %v683_v51 = vadd.f32 %v1201_v47, %v442_v43  ;;  %v691_v52 = vadd.f32 %v1209_v48, %v450_v44 }
 0x121   : > { %v620_v53 = vpop.f32.mrf.mxu0  ;;  %v652_v54 = vpop.f32.mrf.mxu1 }
 0x122   : > { %699 = vst [vmem:[#allocation2 + $0x18] sm:$0xff] %v683_v51  ;;  %707 = vst [vmem:[#allocation2 + $0x38] sm:$0xff] %v691_v52  ;;  %v681_v57 = vadd.f32 %v620_v53, %v440_v49  ;;  %v689_v58 = vadd.f32 %v652_v54, %v448_v50 }
 0x123   : > { %v1204_v59 = vpop.f32.mrf.mxu0  ;;  %v1212_v60 = vpop.f32.mrf.mxu1 }
 0x124   : > { %697 = vst [vmem:[#allocation2] sm:$0xff] %v681_v57  ;;  %705 = vst [vmem:[#allocation2 + $0x20] sm:$0xff] %v689_v58  ;;  %v686_v63 = vadd.f32 %v1204_v59, %v445_v55  ;;  %v694_v0 = vadd.f32 %v1212_v60, %v453_v56 }
 0x125   : > { %v633_v1 = vpop.f32.mrf.mxu0  ;;  %v665_v2 = vpop.f32.mrf.mxu1 }
 0x126   : > { %702 = vst [vmem:[#allocation2 + $0x8] sm:$0xff] %v686_v63  ;;  %710 = vst [vmem:[#allocation2 + $0x78] sm:$0xff] %v694_v0  ;;  %v684_v5 = vadd.f32 %v633_v1, %v443_v61  ;;  %v692_v6 = vadd.f32 %v665_v2, %v451_v62 }
 0x127   : > { %v1205_v7 = vpop.f32.mrf.mxu0  ;;  %v1213_v8 = vpop.f32.mrf.mxu1 }
 0x128   : > { %700 = vst [vmem:[#allocation2 + $0x50] sm:$0xff] %v684_v5  ;;  %708 = vst [vmem:[#allocation2 + $0x60] sm:$0xff] %v692_v6  ;;  %v687_v11 = vadd.f32 %v1205_v7, %v446_v3  ;;  %v695_v12 = vadd.f32 %v1213_v8, %v454_v4  ;;  %715 = sbr.rel (%p1159_p13) target bundleno = 645 (0x285), region = 93 }
 0x129   : > { %v636_v13 = vpop.f32.mrf.mxu0  ;;  %v668_v14 = vpop.f32.mrf.mxu1 }
 0x12a   : > { %703 = vst [vmem:[#allocation2 + $0x48] sm:$0xff] %v687_v11  ;;  %711 = vst [vmem:[#allocation2 + $0x28] sm:$0xff] %v695_v12  ;;  %v685_v15 = vadd.f32 %v636_v13, %v444_v9  ;;  %v693_v16 = vadd.f32 %v668_v14, %v452_v10 }
 0x12c   : > { %701 = vst [vmem:[#allocation2 + $0x68] sm:$0xff] %v685_v15  ;;  %709 = vst [vmem:[#allocation2 + $0x70] sm:$0xff] %v693_v16 }
 0x12d   : > { %v716_v17 = vld [vmem:[#allocation2 + $0x30] sm:$0xff]  ;;  %v1548_v18 = vld [vmem:[%s1807_s2] ss:$0 sm:$0xff]  ;;  %v718_v21 = vld [vmem:[#allocation2 + $0x58] sm:$0xff] }
 0x12e   : > { %v755_v19 = vld [vmem:[%s1518_s17] sm:$0xff]  ;;  %v739_v20 = vadd.f32 %v1548_v18, %v716_v17  ;;  %v757_v22 = vld [vmem:[%s1518_s17 + $0x10] sm:$0xff]  ;;  %v741_v24 = vadd.f32 %v1548_v18, %v718_v21  ;;  %v756_v26 = vld [vmem:[%s1518_s17 + $0x8] sm:$0xff] }
 0x12f   : > { %v717_v23 = vld [vmem:[#allocation2] sm:$0xff]  ;;  %v719_v27 = vld [vmem:[#allocation2 + $0x18] sm:$0xff]  ;;  %v720_v31 = vld [vmem:[#allocation2 + $0x50] sm:$0xff] }
 0x130   : > { %v740_v25 = vadd.f32 %v1548_v18, %v717_v23  ;;  %v1556_v28 = vadd.f32 %v755_v19, %v739_v20  ;;  %v742_v29 = vadd.f32 %v1548_v18, %v719_v27  ;;  %v758_v30 = vld [vmem:[%s1518_s17 + $0x18] sm:$0xff]  ;;  %v1560_v33 = vadd.f32 %v757_v22, %v741_v24  ;;  %v759_v37 = vld [vmem:[%s1518_s17 + $0x20] sm:$0xff]  ;;  %v722_v39 = vld [vmem:[#allocation2 + $0x8] sm:$0xff] }
 0x131   : > { %v743_v35 = vadd.f32 %v1548_v18, %v720_v31  ;;  %v760_v40 = vld [vmem:[%s1518_s17 + $0x28] sm:$0xff]  ;;  %v745_v43 = vadd.f32 %v1548_v18, %v722_v39  ;;  %v761_v45 = vld [vmem:[%s1518_s17 + $0x30] sm:$0xff]  ;;  %v724_v47 = vld [vmem:[#allocation2 + $0x40] sm:$0xff] }
 0x132   : > { %787 = vadd.xlane.f32.xlu0 %v1556_v28  ;;  %v1563_v34 = vadd.f32 %v756_v26, %v740_v25  ;;  %791 = vadd.xlane.f32.xlu1 %v1560_v33  ;;  %v1567_v36 = vadd.f32 %v758_v30, %v742_v29  ;;  %v723_v41 = vld [vmem:[#allocation2 + $0x48] sm:$0xff]  ;;  %v762_v48 = vld [vmem:[%s1518_s17 + $0x38] sm:$0xff]  ;;  %v725_v49 = vld [vmem:[#allocation2 + $0x20] sm:$0xff]  ;;  %v747_v51 = vadd.f32 %v1548_v18, %v724_v47 }
 0x133   : > { %v721_v32 = vld [vmem:[#allocation2 + $0x68] sm:$0xff]  ;;  %v1573_v42 = vadd.f32 %v759_v37, %v743_v35  ;;  %v746_v46 = vadd.f32 %v1548_v18, %v723_v41  ;;  %v1583_v50 = vadd.f32 %v761_v45, %v745_v43  ;;  %v763_v53 = vld [vmem:[%s1518_s17 + $0x40] sm:$0xff]  ;;  %v748_v54 = vadd.f32 %v1548_v18, %v725_v49  ;;  %v726_v55 = vld [vmem:[#allocation2 + $0x10] sm:$0xff] }
 0x134   : > { %v744_v38 = vadd.f32 %v1548_v18, %v721_v32  ;;  %v764_v56 = vld [vmem:[%s1518_s17 + $0x48] sm:$0xff]  ;;  %v727_v57 = vld [vmem:[#allocation2 + $0x38] sm:$0xff]  ;;  %v1593_v58 = vadd.f32 %v763_v53, %v747_v51  ;;  %v749_v59 = vadd.f32 %v1548_v18, %v726_v55  ;;  %v765_v61 = vld [vmem:[%s1518_s17 + $0x50] sm:$0xff] }
 0x135   : > { %v1587_v52 = vadd.f32 %v762_v48, %v746_v46  ;;  %v1597_v60 = vadd.f32 %v764_v56, %v748_v54  ;;  %v750_v62 = vadd.f32 %v1548_v18, %v727_v57  ;;  %v728_v63 = vld [vmem:[#allocation2 + $0x60] sm:$0xff]  ;;  %v766_v0 = vld [vmem:[%s1518_s17 + $0x58] sm:$0xff]  ;;  %v729_v1 = vld [vmem:[#allocation2 + $0x70] sm:$0xff] }
 0x136   : > { %789 = vadd.xlane.f32.xlu0 %v1563_v34  ;;  %793 = vadd.xlane.f32.xlu1 %v1567_v36  ;;  %v1577_v44 = vadd.f32 %v760_v40, %v744_v38  ;;  %v1603_v2 = vadd.f32 %v765_v61, %v749_v59  ;;  %v751_v3 = vadd.f32 %v1548_v18, %v728_v63  ;;  %v767_v5 = vld [vmem:[%s1518_s17 + $0x60] sm:$0xff]  ;;  %v730_v7 = vld [vmem:[#allocation2 + $0x78] sm:$0xff]  ;;  %v768_v8 = vld [vmem:[%s1518_s17 + $0x68] sm:$0xff] }
 0x137   : > { %v1607_v4 = vadd.f32 %v766_v0, %v750_v62  ;;  %v752_v6 = vadd.f32 %v1548_v18, %v729_v1  ;;  %v731_v9 = vld [vmem:[#allocation2 + $0x28] sm:$0xff]  ;;  %v753_v11 = vadd.f32 %v1548_v18, %v730_v7  ;;  %v769_v13 = vld [vmem:[%s1518_s17 + $0x70] sm:$0xff]  ;;  %v770_v15 = vld [vmem:[%s1518_s17 + $0x78] sm:$0xff] }
 0x138   : > { %v1613_v10 = vadd.f32 %v767_v5, %v751_v3  ;;  %v754_v14 = vadd.f32 %v1548_v18, %v731_v9 }
 0x139   : > { %v1617_v12 = vadd.f32 %v768_v8, %v752_v6  ;;  %v1623_v16 = vadd.f32 %v769_v13, %v753_v11 }
 0x13a   : > { %795 = vadd.xlane.f32.xlu0 %v1573_v42  ;;  %797 = vadd.xlane.f32.xlu1 %v1577_v44  ;;  %v1626_v17 = vadd.f32 %v770_v15, %v754_v14 }
 0x13e   : > { %799 = vadd.xlane.f32.xlu0 %v1583_v50  ;;  %801 = vadd.xlane.f32.xlu1 %v1587_v52 }
 0x142   : > { %803 = vadd.xlane.f32.xlu0 %v1593_v58  ;;  %805 = vadd.xlane.f32.xlu1 %v1597_v60 }
 0x146   : > { %807 = vadd.xlane.f32.xlu0 %v1603_v2  ;;  %809 = vadd.xlane.f32.xlu1 %v1607_v4 }
 0x14a   : > { %811 = vadd.xlane.f32.xlu0 %v1613_v10  ;;  %813 = vadd.xlane.f32.xlu1 %v1617_v12 }
 0x14e   : > { %815 = vadd.xlane.f32.xlu0 %v1623_v16  ;;  %817 = vadd.xlane.f32.xlu1 %v1626_v17 }
 0x1bb   : > { %v788_v19 = vpop.xlane.xlu0 %787  ;;  %v792_v21 = vpop.xlane.xlu1 %791 }
 0x1bc   : > { %v820_v20 = vmul.f32 0.0078125, %v788_v19  ;;  %v822_v22 = vmul.f32 0.0078125, %v792_v21 }
 0x1be   : > { %v1631_v23 = vsub.f32 %v1556_v28, %v820_v20  ;;  %v1634_v18 = vsub.f32 %v1560_v33, %v822_v22 }
 0x1bf   : > { %v790_v24 = vpop.xlane.xlu0 %789  ;;  %v794_v27 = vpop.xlane.xlu1 %793 }
 0x1c0   : > { %v821_v25 = vmul.f32 0.0078125, %v790_v24  ;;  %v852_v26 = vmul.f32 %v1631_v23, %v1631_v23  ;;  %v823_v29 = vmul.f32 0.0078125, %v794_v27  ;;  %v854_v31 = vmul.f32 %v1634_v18, %v1634_v18 }
 0x1c2   : > { %v1639_v30 = vsub.f32 %v1563_v34, %v821_v25  ;;  %868 = vadd.xlane.f32.xlu0 %v852_v26  ;;  %v1644_v28 = vsub.f32 %v1567_v36, %v823_v29 }
 0x1c3   : > { %v796_v32 = vpop.xlane.xlu0 %795  ;;  %v798_v37 = vpop.xlane.xlu1 %797 }
 0x1c4   : > { %v824_v33 = vmul.f32 0.0078125, %v796_v32  ;;  %v853_v35 = vmul.f32 %v1639_v30, %v1639_v30  ;;  %v825_v38 = vmul.f32 0.0078125, %v798_v37  ;;  %v855_v34 = vmul.f32 %v1644_v28, %v1644_v28 }
 0x1c6   : > { %v1649_v39 = vsub.f32 %v1573_v42, %v824_v33  ;;  %872 = vadd.xlane.f32.xlu0 %v854_v31  ;;  %870 = vadd.xlane.f32.xlu1 %v853_v35  ;;  %v1654_v40 = vsub.f32 %v1577_v44, %v825_v38 }
 0x1c7   : > { %v800_v36 = vpop.xlane.xlu0 %799  ;;  %v802_v45 = vpop.xlane.xlu1 %801 }
 0x1c8   : > { %v826_v41 = vmul.f32 0.0078125, %v800_v36  ;;  %v856_v43 = vmul.f32 %v1649_v39, %v1649_v39  ;;  %v827_v46 = vmul.f32 0.0078125, %v802_v45  ;;  %v857_v42 = vmul.f32 %v1654_v40, %v1654_v40 }
 0x1ca   : > { %v1659_v47 = vsub.f32 %v1583_v50, %v826_v41  ;;  %874 = vadd.xlane.f32.xlu1 %v855_v34  ;;  %876 = vadd.xlane.f32.xlu0 %v856_v43  ;;  %v1664_v48 = vsub.f32 %v1587_v52, %v827_v46 }
 0x1cb   : > { %v804_v44 = vpop.xlane.xlu0 %803  ;;  %v806_v53 = vpop.xlane.xlu1 %805 }
 0x1cc   : > { %v828_v49 = vmul.f32 0.0078125, %v804_v44  ;;  %v858_v51 = vmul.f32 %v1659_v47, %v1659_v47  ;;  %v829_v54 = vmul.f32 0.0078125, %v806_v53  ;;  %v859_v50 = vmul.f32 %v1664_v48, %v1664_v48 }
 0x1ce   : > { %v1669_v55 = vsub.f32 %v1593_v58, %v828_v49  ;;  %878 = vadd.xlane.f32.xlu1 %v857_v42  ;;  %880 = vadd.xlane.f32.xlu0 %v858_v51  ;;  %v1674_v56 = vsub.f32 %v1597_v60, %v829_v54  ;;  %v1713_v54 = vld [vmem:[%s1809_s4] ss:$0 sm:$0xff] }
 0x1cf   : > { %v808_v52 = vpop.xlane.xlu0 %807  ;;  %v810_v61 = vpop.xlane.xlu1 %809 }
 0x1d0   : > { %v830_v57 = vmul.f32 0.0078125, %v808_v52  ;;  %v860_v59 = vmul.f32 %v1669_v55, %v1669_v55  ;;  %v831_v62 = vmul.f32 0.0078125, %v810_v61  ;;  %v861_v58 = vmul.f32 %v1674_v56, %v1674_v56 }
 0x1d2   : > { %v1679_v63 = vsub.f32 %v1603_v2, %v830_v57  ;;  %882 = vadd.xlane.f32.xlu1 %v859_v50  ;;  %884 = vadd.xlane.f32.xlu0 %v860_v59  ;;  %v1684_v0 = vsub.f32 %v1607_v4, %v831_v62  ;;  %v1719_v59 = vld [vmem:[%s1810_s5] ss:$0 sm:$0xff] }
 0x1d3   : > { %v812_v60 = vpop.xlane.xlu0 %811  ;;  %v814_v5 = vpop.xlane.xlu1 %813 }
 0x1d4   : > { %v832_v1 = vmul.f32 0.0078125, %v812_v60  ;;  %v862_v3 = vmul.f32 %v1679_v63, %v1679_v63  ;;  %v833_v6 = vmul.f32 0.0078125, %v814_v5  ;;  %v863_v2 = vmul.f32 %v1684_v0, %v1684_v0 }
 0x1d6   : > { %v1689_v7 = vsub.f32 %v1613_v10, %v832_v1  ;;  %886 = vadd.xlane.f32.xlu1 %v861_v58  ;;  %888 = vadd.xlane.f32.xlu0 %v862_v3  ;;  %v1694_v8 = vsub.f32 %v1617_v12, %v833_v6 }
 0x1d7   : > { %v816_v4 = vpop.xlane.xlu0 %815  ;;  %v818_v13 = vpop.xlane.xlu1 %817 }
 0x1d8   : > { %v834_v9 = vmul.f32 0.0078125, %v816_v4  ;;  %v864_v11 = vmul.f32 %v1689_v7, %v1689_v7  ;;  %v835_v14 = vmul.f32 0.0078125, %v818_v13  ;;  %v865_v10 = vmul.f32 %v1694_v8, %v1694_v8 }
 0x1da   : > { %v1699_v15 = vsub.f32 %v1623_v16, %v834_v9  ;;  %890 = vadd.xlane.f32.xlu1 %v863_v2  ;;  %892 = vadd.xlane.f32.xlu0 %v864_v11  ;;  %v1704_v19 = vsub.f32 %v1626_v17, %v835_v14 }
 0x1dc   : > { %v866_v12 = vmul.f32 %v1699_v15, %v1699_v15  ;;  %v867_v20 = vmul.f32 %v1704_v19, %v1704_v19 }
 0x1de   : > { %894 = vadd.xlane.f32.xlu1 %v865_v10  ;;  %896 = vadd.xlane.f32.xlu0 %v866_v12 }
 0x1e2   : > { %898 = vadd.xlane.f32.xlu1 %v867_v20 }
 0x24b   : > { %v869_v21 = vpop.xlane.xlu0 %868 }
 0x24c   : > { %v900_v16 = vmul.f32 0.0078125, %v869_v21 }
 0x24e   : > { %v916_v22 = vadd.f32 1e-12, %v900_v16 }
 0x24f   : > { %v871_v24 = vpop.xlane.xlu1 %870  ;;  %v873_v25 = vpop.xlane.xlu0 %872 }
 0x250   : > { %1303 = vrsqrt.f32 %v916_v22  ;;  %v901_v26 = vmul.f32 0.0078125, %v871_v24  ;;  %v902_v27 = vmul.f32 0.0078125, %v873_v25 }
 0x252   : > { %v917_v29 = vadd.f32 1e-12, %v901_v26  ;;  %v918_v17 = vadd.f32 1e-12, %v902_v27 }
 0x253   : > { %v875_v31 = vpop.xlane.xlu1 %874  ;;  %v877_v32 = vpop.xlane.xlu0 %876 }
 0x254   : > { %1305 = vrsqrt.f32 %v917_v29  ;;  %v903_v33 = vmul.f32 0.0078125, %v875_v31  ;;  %v904_v35 = vmul.f32 0.0078125, %v877_v32 }
 0x255   : > { %1307 = vrsqrt.f32 %v918_v17 }
 0x256   : > { %v919_v37 = vadd.f32 1e-12, %v903_v33  ;;  %v920_v38 = vadd.f32 1e-12, %v904_v35 }
 0x257   : > { %v879_v34 = vpop.xlane.xlu1 %878  ;;  %v881_v36 = vpop.xlane.xlu0 %880 }
 0x258   : > { %1309 = vrsqrt.f32 %v919_v37  ;;  %v905_v41 = vmul.f32 0.0078125, %v879_v34  ;;  %v906_v43 = vmul.f32 0.0078125, %v881_v36 }
 0x259   : > { %1311 = vrsqrt.f32 %v920_v38 }
 0x25a   : > { %v921_v45 = vadd.f32 1e-12, %v905_v41  ;;  %v922_v46 = vadd.f32 1e-12, %v906_v43 }
 0x25b   : > { %v883_v42 = vpop.xlane.xlu1 %882  ;;  %v885_v44 = vpop.xlane.xlu0 %884 }
 0x25c   : > { %1313 = vrsqrt.f32 %v921_v45  ;;  %v907_v49 = vmul.f32 0.0078125, %v883_v42  ;;  %v908_v51 = vmul.f32 0.0078125, %v885_v44 }
 0x25d   : > { %v1304_v53 = vpop.eup %1303  ;;  %1315 = vrsqrt.f32 %v922_v46 }
 0x25e   : > { %v948_v50 = vmul.f32 %v1304_v53, %v1631_v23  ;;  %v923_v52 = vadd.f32 1e-12, %v907_v49  ;;  %v924_v57 = vadd.f32 1e-12, %v908_v51 }
 0x25f   : > { %v887_v61 = vpop.xlane.xlu1 %886  ;;  %v889_v62 = vpop.xlane.xlu0 %888 }
 0x260   : > { %v971_v58 = vmul.f32 %v1713_v54, %v948_v50  ;;  %1317 = vrsqrt.f32 %v923_v52  ;;  %v909_v60 = vmul.f32 0.0078125, %v887_v61  ;;  %v910_v1 = vmul.f32 0.0078125, %v889_v62 }
 0x261   : > { %v1306_v3 = vpop.eup %1305  ;;  %1319 = vrsqrt.f32 %v924_v57 }
 0x262   : > { %v1308_v5 = vpop.eup %1307  ;;  %v994_v23 = vadd.f32 %v1719_v59, %v971_v58  ;;  %v949_v6 = vmul.f32 %v1306_v3, %v1639_v30  ;;  %v925_v2 = vadd.f32 1e-12, %v909_v60  ;;  %v926_v4 = vadd.f32 1e-12, %v910_v1 }
 0x263   : > { %v950_v9 = vmul.f32 %v1308_v5, %v1634_v18  ;;  %v891_v11 = vpop.xlane.xlu1 %890  ;;  %v893_v13 = vpop.xlane.xlu0 %892 }
 0x264   : > { %1010 = vst [vmem:[%s1523_s19] sm:$0xff] %v994_v23  ;;  %v972_v14 = vmul.f32 %v1713_v54, %v949_v6  ;;  %1321 = vrsqrt.f32 %v925_v2  ;;  %v911_v10 = vmul.f32 0.0078125, %v891_v11  ;;  %v912_v12 = vmul.f32 0.0078125, %v893_v13 }
 0x265   : > { %v1310_v20 = vpop.eup %1309  ;;  %v973_v21 = vmul.f32 %v1713_v54, %v950_v9  ;;  %1323 = vrsqrt.f32 %v926_v4 }
 0x266   : > { %v1312_v16 = vpop.eup %1311  ;;  %v995_v30 = vadd.f32 %v1719_v59, %v972_v14  ;;  %v951_v22 = vmul.f32 %v1310_v20, %v1644_v28  ;;  %v927_v18 = vadd.f32 1e-12, %v911_v10  ;;  %v928_v24 = vadd.f32 1e-12, %v912_v12 }
 0x267   : > { %v996_v25 = vadd.f32 %v1719_v59, %v973_v21  ;;  %v952_v26 = vmul.f32 %v1312_v16, %v1649_v39  ;;  %v895_v27 = vpop.xlane.xlu1 %894  ;;  %v897_v29 = vpop.xlane.xlu0 %896 }
 0x268   : > { %1011 = vst [vmem:[%s1523_s19 + $0x8] sm:$0xff] %v995_v30  ;;  %v974_v17 = vmul.f32 %v1713_v54, %v951_v22  ;;  %1325 = vrsqrt.f32 %v927_v18  ;;  %v913_v31 = vmul.f32 0.0078125, %v895_v27  ;;  %v914_v32 = vmul.f32 0.0078125, %v897_v29 }
 0x269   : > { %v1314_v33 = vpop.eup %1313  ;;  %1012 = vst [vmem:[%s1523_s19 + $0x10] sm:$0xff] %v996_v25  ;;  %v975_v28 = vmul.f32 %v1713_v54, %v952_v26  ;;  %1327 = vrsqrt.f32 %v928_v24 }
 0x26a   : > { %v1316_v35 = vpop.eup %1315  ;;  %v997_v37 = vadd.f32 %v1719_v59, %v974_v17  ;;  %v953_v39 = vmul.f32 %v1314_v33, %v1654_v40  ;;  %v929_v38 = vadd.f32 1e-12, %v913_v31  ;;  %v930_v34 = vadd.f32 1e-12, %v914_v32 }
 0x26b   : > { %v998_v36 = vadd.f32 %v1719_v59, %v975_v28  ;;  %v954_v41 = vmul.f32 %v1316_v35, %v1659_v47  ;;  %v899_v43 = vpop.xlane.xlu1 %898 }
 0x26c   : > { %1013 = vst [vmem:[%s1523_s19 + $0x18] sm:$0xff] %v997_v37  ;;  %v976_v45 = vmul.f32 %v1713_v54, %v953_v39  ;;  %1329 = vrsqrt.f32 %v929_v38  ;;  %v915_v46 = vmul.f32 0.0078125, %v899_v43 }
 0x26d   : > { %v1318_v42 = vpop.eup %1317  ;;  %1014 = vst [vmem:[%s1523_s19 + $0x20] sm:$0xff] %v998_v36  ;;  %v977_v44 = vmul.f32 %v1713_v54, %v954_v41  ;;  %1331 = vrsqrt.f32 %v930_v34 }
 0x26e   : > { %v1320_v40 = vpop.eup %1319  ;;  %v999_v49 = vadd.f32 %v1719_v59, %v976_v45  ;;  %v955_v51 = vmul.f32 %v1318_v42, %v1664_v48  ;;  %v931_v47 = vadd.f32 1e-12, %v915_v46 }
 0x26f   : > { %v1000_v53 = vadd.f32 %v1719_v59, %v977_v44  ;;  %v956_v50 = vmul.f32 %v1320_v40, %v1669_v55 }
 0x270   : > { %1015 = vst [vmem:[%s1523_s19 + $0x28] sm:$0xff] %v999_v49  ;;  %v978_v52 = vmul.f32 %v1713_v54, %v955_v51  ;;  %1333 = vrsqrt.f32 %v931_v47 }
 0x271   : > { %v1322_v57 = vpop.eup %1321  ;;  %1016 = vst [vmem:[%s1523_s19 + $0x30] sm:$0xff] %v1000_v53  ;;  %v979_v61 = vmul.f32 %v1713_v54, %v956_v50 }
 0x272   : > { %v1324_v62 = vpop.eup %1323  ;;  %v1001_v58 = vadd.f32 %v1719_v59, %v978_v52  ;;  %v957_v48 = vmul.f32 %v1322_v57, %v1674_v56 }
 0x273   : > { %v1002_v60 = vadd.f32 %v1719_v59, %v979_v61  ;;  %v958_v1 = vmul.f32 %v1324_v62, %v1679_v63 }
 0x274   : > { %1017 = vst [vmem:[%s1523_s19 + $0x38] sm:$0xff] %v1001_v58  ;;  %v980_v55 = vmul.f32 %v1713_v54, %v957_v48 }
 0x275   : > { %v1326_v3 = vpop.eup %1325  ;;  %1018 = vst [vmem:[%s1523_s19 + $0x40] sm:$0xff] %v1002_v60  ;;  %v981_v5 = vmul.f32 %v1713_v54, %v958_v1 }
 0x276   : > { %v1328_v23 = vpop.eup %1327  ;;  %v1003_v6 = vadd.f32 %v1719_v59, %v980_v55  ;;  %v959_v2 = vmul.f32 %v1326_v3, %v1684_v0 }
 0x277   : > { %v1004_v56 = vadd.f32 %v1719_v59, %v981_v5  ;;  %v960_v4 = vmul.f32 %v1328_v23, %v1689_v7 }
 0x278   : > { %1019 = vst [vmem:[%s1523_s19 + $0x48] sm:$0xff] %v1003_v6  ;;  %v982_v63 = vmul.f32 %v1713_v54, %v959_v2 }
 0x279   : > { %v1330_v9 = vpop.eup %1329  ;;  %1020 = vst [vmem:[%s1523_s19 + $0x50] sm:$0xff] %v1004_v56  ;;  %v983_v11 = vmul.f32 %v1713_v54, %v960_v4 }
 0x27a   : > { %v1332_v13 = vpop.eup %1331  ;;  %v1005_v14 = vadd.f32 %v1719_v59, %v982_v63  ;;  %v961_v0 = vmul.f32 %v1330_v9, %v1694_v8 }
 0x27b   : > { %v1006_v10 = vadd.f32 %v1719_v59, %v983_v11  ;;  %v962_v12 = vmul.f32 %v1332_v13, %v1699_v15 }
 0x27c   : > { %1021 = vst [vmem:[%s1523_s19 + $0x58] sm:$0xff] %v1005_v14  ;;  %v984_v7 = vmul.f32 %v1713_v54, %v961_v0 }
 0x27d   : > { %v1334_v20 = vpop.eup %1333  ;;  %1022 = vst [vmem:[%s1523_s19 + $0x60] sm:$0xff] %v1006_v10  ;;  %v985_v21 = vmul.f32 %v1713_v54, %v962_v12 }
 0x27e   : > { %v1007_v16 = vadd.f32 %v1719_v59, %v984_v7  ;;  %v963_v30 = vmul.f32 %v1334_v20, %v1704_v19 }
 0x27f   : > { %v1008_v22 = vadd.f32 %v1719_v59, %v985_v21 }
 0x280   : > { %1023 = vst [vmem:[%s1523_s19 + $0x68] sm:$0xff] %v1007_v16  ;;  %v986_v8 = vmul.f32 %v1713_v54, %v963_v30 }
 0x281   : > { %1024 = vst [vmem:[%s1523_s19 + $0x70] sm:$0xff] %v1008_v22 }
 0x282   : > { %v1009_v18 = vadd.f32 %v1719_v59, %v986_v8 }
 0x284   : > { %1025 = vst [vmem:[%s1523_s19 + $0x78] sm:$0xff] %v1009_v18 }
 0x285 PF: > { %s16_s27 = sadd.s32 1, %s1389_s27   ;;  %s1812_s21 = smov %s1369_s22 }
 0x286   : > { %p13_p0 = scmp.ge.s32.totalorder %s16_s27, 6   ;;  %s1813_s22 = smov %s1478_s10 }
 0x287   : > { %s1814_s23 = smov %s1381_s25  ;;  %s1815_s24 = smov %s1385_s26 }
 0x288   : > { %s1816_s25 = smov %s1819_s28  ;;  %s1817_s26 = smov %s1823_s29 }
 0x289   :  { %15 = sbr.rel (!%p13_p0) target bundleno = 4 (0x4), region = 134 }

// kernel: _lambda_.16
= control target key start
LH: loop header
LB: loop body
LE: loop exit
PB: predicated region body
PF: predicated region fallthrough
CT: control target
= control target key end

     0   :  { %s1505_s12 = smov 0   ;;  %s1507_s13 = smov 0   ;;  %s1826_s0 = inlined_call_operand.vmem [shape: bf16[256,128], index: 0, kind: input, shape index: {}]   ;;  %s1827_s1 = inlined_call_operand.vmem [shape: bf16[128,256], index: 1, kind: input, shape index: {}]   ;;  %s1828_s2 = inlined_call_operand.vmem [shape: f32[1,256], index: 2, kind: input, shape index: {}]   ;;  %s1829_s3 = inlined_call_operand.vmem [shape: bf16[256,256], index: 3, kind: output, shape index: {}]  }
   0x1   :  { %s1509_s14 = smov 0   ;;  %s1511_s15 = smov 0  }
   0x2   :  { %s1513_s16 = smov 0   ;;  %s1515_s17 = smov 0  }
   0x3   :  { %s1517_s18 = smov 0   ;;  %s1519_s19 = smov 0  }
   0x4   :  { %s1521_s20 = smov 0  }
   0x5 LB: > { %s1115_s21 = sadd.s32 4294967295, %s1483_s20   ;;  %s28_s22 = sadd.s32 1, %s1475_s18  ;;  %s1483_s20 = sphi %s1521_s20, %s13_s20   ;;  %s1479_s19 = sphi %s1519_s19, %s1838_s19   ;;  %s1475_s18 = sphi %s1517_s18, %s1837_s18   ;;  %s1471_s17 = sphi %s1515_s17, %s1836_s17   ;;  %s1467_s16 = sphi %s1513_s16, %s1835_s16   ;;  %s1463_s15 = sphi %s1511_s15, %s1834_s15   ;;  %s1459_s14 = sphi %s1509_s14, %s1833_s14   ;;  %s1455_s13 = sphi %s1507_s13, %s1832_s13   ;;  %s1451_s12 = sphi %s1505_s12, %s1831_s12  }
   0x6   : > { %p30_p0 = scmp.ge.s32.totalorder %s28_s22, 2  ;;  %s32_s23 = sadd.s32 1, %s1479_s19 }
   0x7   : > { %s69_s24 = sadd.s32 1, %s1463_s15  ;;  %p76_p1 = scmp.ne.s32.totalorder %s1463_s15, %s1459_s14 }
   0x8   : > { %s1840_s22 = smov (%p30_p0, %s28_s22), 0  ;;  %s1842_s23 = smov (!%p30_p0, %s32_s23), %s1479_s19 }
   0x9   : > { %s65_s25 = ssub.s32 %s1475_s18, %s1840_s22  ;;  %p77_p2 = scmp.eq.s32.totalorder %s1483_s20, 0 }
   0xa   : > { %p34_p3 = scmp.ge.s32.totalorder %s1842_s23, 2  ;;  %p67_p4 = scmp.eq.s32.totalorder %s65_s25, 0 }
   0xb   : > { %p78_p5 = por %p77_p2, %p76_p1  ;;  %s123_s26 = sadd.s32 1, %s1455_s13 }
   0xc   : > { %s1844_s23 = smov (%p34_p3, %s1842_s23), 0  ;;  %p133_p6 = scmp.ne.s32.totalorder %s1455_s13, %s1451_s12 }
   0xd   : > { %s1566_s27 = scalar_select %p67_p4, %s1463_s15, %s69_s24  }
   0xe   : > { %s118_s28 = ssub.s32 %s1479_s19, %s1844_s23  ;;  %p134_p7 = scmp.eq.s32.totalorder %s1115_s21, 3 }
   0xf   : > { %s120_s29 = sor.u32 %s118_s28, %s65_s25  ;;  %p1118_p10 = scmp.ge.s32.totalorder %s1483_s20, 4 }
  0x10   : > { %p121_p8 = scmp.eq.s32.totalorder %s120_s29, 0  ;;  %p1572_p9 = por %p134_p7, %p133_p6 }
  0x11   : > { %156 = sbr.rel (%p1118_p10) target bundleno = 36 (0x24), region = 16 }
  0x12   : > { %s1577_s4 = scalar_select %p121_p8, %s1455_s13, %s123_s26  }
  0x16   : > { %171 = sbr.rel (!%p78_p5) target bundleno = 36 (0x24), region = 24  ;;  %s173_s5 = sand.u32 (%p78_p5), 1, %s1463_s15  }
  0x17   : > { %s1120_s6 = sshll.u32 (%p78_p5), %s1475_s18, 2  ;;  %s1119_s7 = sshll.u32 (%p78_p5), %s173_s5, 6 }
  0x18   : > { %s1585_s10 = scalar_lea.vmem (%p78_p5), %s1827_s1, %s1120_s6  ;;  %s175_s11 = scalar_lea.vmem (%p78_p5), [#allocation3], %s1119_s7 }
  0x19   : > { %v197_v0 = vld [vmem:[%s1585_s10] sm:$0xf] (%p78_p5)  ;;  %v199_v1 = vld [vmem:[%s1585_s10 + $0x8] sm:$0xf] (%p78_p5)  ;;  %v201_v2 = vld [vmem:[%s1585_s10 + $0x10] sm:$0xf] (%p78_p5) }
  0x1a   : > { %198 = vst [vmem:[%s175_s11] sm:$0xf] (%p78_p5), %v197_v0  ;;  %200 = vst [vmem:[%s175_s11 + $0x4] sm:$0xf] (%p78_p5), %v199_v1  ;;  %v203_v3 = vld [vmem:[%s1585_s10 + $0x18] sm:$0xf] (%p78_p5) }
  0x1b   : > { %v205_v4 = vld [vmem:[%s1585_s10 + $0x20] sm:$0xf]  ;;  %202 = vst [vmem:[%s175_s11 + $0x8] sm:$0xf] %v201_v2  ;;  %204 = vst [vmem:[%s175_s11 + $0xc] sm:$0xf] %v203_v3 }
  0x1c   : > { %206 = vst [vmem:[%s175_s11 + $0x10] sm:$0xf] %v205_v4  ;;  %v207_v5 = vld [vmem:[%s1585_s10 + $0x28] sm:$0xf]  ;;  %v209_v6 = vld [vmem:[%s1585_s10 + $0x30] sm:$0xf] }
  0x1d   : > { %v211_v7 = vld [vmem:[%s1585_s10 + $0x38] sm:$0xf]  ;;  %208 = vst [vmem:[%s175_s11 + $0x14] sm:$0xf] %v207_v5  ;;  %210 = vst [vmem:[%s175_s11 + $0x18] sm:$0xf] %v209_v6 }
  0x1e   : > { %212 = vst [vmem:[%s175_s11 + $0x1c] sm:$0xf] %v211_v7  ;;  %v213_v8 = vld [vmem:[%s1585_s10 + $0x40] sm:$0xf]  ;;  %v215_v9 = vld [vmem:[%s1585_s10 + $0x48] sm:$0xf] }
  0x1f   : > { %v217_v10 = vld [vmem:[%s1585_s10 + $0x50] sm:$0xf]  ;;  %214 = vst [vmem:[%s175_s11 + $0x20] sm:$0xf] %v213_v8  ;;  %216 = vst [vmem:[%s175_s11 + $0x24] sm:$0xf] %v215_v9 }
  0x20   : > { %218 = vst [vmem:[%s175_s11 + $0x28] sm:$0xf] %v217_v10  ;;  %v219_v11 = vld [vmem:[%s1585_s10 + $0x58] sm:$0xf]  ;;  %v221_v12 = vld [vmem:[%s1585_s10 + $0x60] sm:$0xf] }
  0x21   : > { %v223_v13 = vld [vmem:[%s1585_s10 + $0x68] sm:$0xf]  ;;  %220 = vst [vmem:[%s175_s11 + $0x2c] sm:$0xf] %v219_v11  ;;  %222 = vst [vmem:[%s175_s11 + $0x30] sm:$0xf] %v221_v12 }
  0x22   : > { %224 = vst [vmem:[%s175_s11 + $0x34] sm:$0xf] %v223_v13  ;;  %v225_v14 = vld [vmem:[%s1585_s10 + $0x70] sm:$0xf]  ;;  %v227_v15 = vld [vmem:[%s1585_s10 + $0x78] sm:$0xf] }
  0x23   : > { %226 = vst [vmem:[%s175_s11 + $0x38] sm:$0xf] %v225_v14  ;;  %228 = vst [vmem:[%s175_s11 + $0x3c] sm:$0xf] %v227_v15 }
  0x24 PF: > { %p1121_p11 = scmp.ge.s32.totalorder %s1483_s20, 1  ;;  %p289_p12 = scmp.lt.s32.totalorder %s1483_s20, 5 }
  0x26   : > { %p290_p13 = pnand %p1121_p11, %p289_p12 }
  0x27   : > { %s296_s21 = sand.u32 (!%p290_p13), 1, %s1459_s14   ;;  %s1124_s24 = sshll.u32 (!%p290_p13), %s1471_s17, 4 }
  0x28   : > { %293 = sbr.rel (%p290_p13) target bundleno = 339 (0x153), region = 69  ;;  %s1122_s25 = sshll.u32 (!%p290_p13), %s296_s21, 6 }
  0x29   : > { %p330_p0 = scmp.lt.s32.totalorder (!%p290_p13), %s1124_s24, 31  ;;  %s1607_s26 = scalar_lea.vmem (!%p290_p13), [#allocation3], %s1122_s25 }
  0x2a   : > { %p339_p1 = scmp.lt.s32.totalorder (!%p290_p13), %s1467_s16, 1  ;;  %s326_s10 = sand.u32 (!%p290_p13), 1, %s1451_s12  }
  0x2b   : > { %s1123_s11 = sshll.u32 (!%p290_p13), %s326_s10, 6 }
  0x2c   : > { %s1758_s12 = scalar_lea.vmem (!%p290_p13), [#allocation4], %s1123_s11 }
  0x2d   : > { %v1365_v16 = vld [vmem:[%s1607_s26 + $0x38] sm:$0xff]   ;;  %s1846_s24 = smov (!%p330_p0, %s1124_s24), 31  ;;  %v1366_v17 = vld [vmem:[%s1607_s26 + $0x30] sm:$0xff]   ;;  %v1367_v18 = vld [vmem:[%s1607_s26 + $0x28] sm:$0xff]   ;;  %s1181_s21 = sshll.u32 (%p1572_p9), %s1471_s17, 5 }
  0x2e   : > { %1245 = vmatprep.subr.bf16.mxu0 %v1365_v16  ;;  %1277 = vmatprep.subr.bf16.mxu1 %v1365_v16  ;;  %s1125_s28 = sshll.u32 %s1846_s24, 2  ;;  %v1368_v19 = vld [vmem:[%s1607_s26 + $0x20] sm:$0xff]   ;;  %v1369_v22 = vld [vmem:[%s1607_s26 + $0x18] sm:$0xff]   ;;  %v1370_v23 = vld [vmem:[%s1607_s26 + $0x10] sm:$0xff]   ;;  %s912_s24 = sadd.s32 (%p1572_p9), %s1467_s16, %s1181_s21 }
  0x2f   : > { %1246 = vmatpush3.bf16.msra.mxu0 %v1365_v16  ;;  %1285 = vmatpush3.bf16.msra.mxu1 %v1365_v16  ;;  %s1615_s5 = scalar_lea.vmem %s1826_s0, %s1125_s28  ;;  %v1371_v24 = vld [vmem:[%s1607_s26 + $0x8] sm:$0xff]   ;;  %v1372_v25 = vld [vmem:[%s1607_s26] sm:$0xff]   ;;  %s1162_s30 = sshll.u32 (%p1572_p9), %s912_s24, 2 }
  0x30   : > { %1247 = vmatprep.subr.bf16.mxu0 %v1366_v17  ;;  %1278 = vmatprep.subr.bf16.mxu1 %v1366_v17  ;;  %v1373_v20 = vld [vmem:[%s1615_s5] sm:$0xff]   ;;  %v1375_v26 = vld [vmem:[%s1615_s5 + $0x8] sm:$0xff]   ;;  %v1377_v28 = vld [vmem:[%s1615_s5 + $0x10] sm:$0xff]   ;;  %s340_s6 = scalar_select %p339_p1, %s1467_s16, 1 }
  0x31   : > { %v1374_v21 = vld [vmem:[%s1615_s5 + $0x20] sm:$0xff]   ;;  %1261 = vmatprep.mubr.bf16.mxu0 %v1373_v20  ;;  %v1376_v27 = vld [vmem:[%s1615_s5 + $0x28] sm:$0xff]   ;;  %v1378_v29 = vld [vmem:[%s1615_s5 + $0x30] sm:$0xff]   ;;  %s914_s28 = scalar_lea.vmem (%p1572_p9), %s1829_s3, %s1162_s30 }
  0x32   : > { %1269 = vmatprep.mubr.bf16.mxu1 %v1374_v21  ;;  %v1379_v30 = vld [vmem:[%s1615_s5 + $0x18] sm:$0xff]   ;;  %s341_s9 = scalar_lea.vmem %s1828_s2, %s340_s6 }
  0x33   : > { %1248 = vmatpush3.bf16.msra.mxu0 %v1366_v17  ;;  %1286 = vmatpush3.bf16.msra.mxu1 %v1366_v17  ;;  %v1380_v31 = vld [vmem:[%s1615_s5 + $0x38] sm:$0xff]   ;;  %v1635_v32 = vld [vmem:[%s341_s9] ss:$0 sm:$0xff] }
  0x34   : > { %1249 = vmatprep.subr.bf16.mxu0 %v1367_v18  ;;  %1279 = vmatprep.subr.bf16.mxu1 %v1367_v18 }
  0x37   : > { %1250 = vmatpush3.bf16.msra.mxu0 %v1367_v18  ;;  %1287 = vmatpush3.bf16.msra.mxu1 %v1367_v18 }
  0x38   : > { %1251 = vmatprep.subr.bf16.mxu0 %v1368_v19  ;;  %1280 = vmatprep.subr.bf16.mxu1 %v1368_v19 }
  0x3b   : > { %1252 = vmatpush3.bf16.msra.mxu0 %v1368_v19  ;;  %1288 = vmatpush3.bf16.msra.mxu1 %v1368_v19 }
  0x3c   : > { %1253 = vmatprep.subr.bf16.mxu0 %v1369_v22  ;;  %1281 = vmatprep.subr.bf16.mxu1 %v1369_v22 }
  0x3f   : > { %1254 = vmatpush3.bf16.msra.mxu0 %v1369_v22  ;;  %1289 = vmatpush3.bf16.msra.mxu1 %v1369_v22 }
  0x40   : > { %1255 = vmatprep.subr.bf16.mxu0 %v1370_v23  ;;  %1282 = vmatprep.subr.bf16.mxu1 %v1370_v23 }
  0x43   : > { %1256 = vmatpush3.bf16.msra.mxu0 %v1370_v23  ;;  %1290 = vmatpush3.bf16.msra.mxu1 %v1370_v23 }
  0x44   : > { %1257 = vmatprep.subr.bf16.mxu0 %v1371_v24  ;;  %1283 = vmatprep.subr.bf16.mxu1 %v1371_v24 }
  0x47   : > { %1258 = vmatpush3.bf16.msra.mxu0 %v1371_v24  ;;  %1291 = vmatpush3.bf16.msra.mxu1 %v1371_v24 }
  0x48   : > { %1259 = vmatprep.subr.bf16.mxu0 %v1372_v25  ;;  %1284 = vmatprep.subr.bf16.mxu1 %v1372_v25 }
  0x4b   : > { %1260 = vmatpush3.bf16.msra.mxu0 %v1372_v25  ;;  %1292 = vmatpush3.bf16.msra.mxu1 %v1372_v25 }
  0x4e   : > { %1262 = vmatmul.mubr.bf16.vlgmr.msra.gmra.mxu0 %v1375_v26  ;;  %1270 = vmatmul.mubr.bf16.vlgmr.msra.gmra.mxu1 %v1376_v27 }
  0x4f   : > { %1265 = vmatprep.mubr.bf16.mxu0 %v1377_v28  ;;  %1273 = vmatprep.mubr.bf16.mxu1 %v1378_v29 }
  0x56   : > { %1266 = vmatmul.mubr.bf16.gmra.mxu0 %v1379_v30  ;;  %1274 = vmatmul.mubr.bf16.gmra.mxu1 %v1380_v31 }
 0x10e   : > { %v1263_v33 = vpop.f32.mrf.mxu0  ;;  %v1271_v34 = vpop.f32.mrf.mxu1 }
 0x10f   : > { %v1638_v35 = vadd.f32 %v1263_v33, %v1635_v32  ;;  %v1641_v36 = vadd.f32 %v1271_v34, %v1635_v32 }
 0x110   : > { %v542_v37 = vpop.f32.mrf.mxu0  ;;  %v574_v38 = vpop.f32.mrf.mxu1 }
 0x111   : > { %v681_v39 = vmul.f32 %v1638_v35, %v1638_v35  ;;  %v689_v40 = vmul.f32 %v1641_v36, %v1641_v36  ;;  %v1648_v41 = vadd.f32 %v1635_v32, %v542_v37  ;;  %v1651_v42 = vadd.f32 %v1635_v32, %v574_v38 }
 0x112   : > { %v1264_v43 = vpop.f32.mrf.mxu0  ;;  %v1272_v44 = vpop.f32.mrf.mxu1 }
 0x113   : > { %v697_v45 = vmul.f32 %v681_v39, %v1638_v35  ;;  %v705_v46 = vmul.f32 %v689_v40, %v1641_v36  ;;  %v679_v47 = vmul.f32 %v1648_v41, %v1648_v41  ;;  %v687_v48 = vmul.f32 %v1651_v42, %v1651_v42 }
 0x114   : > { %v1660_v49 = vadd.f32 %v1264_v43, %v1635_v32  ;;  %v1663_v50 = vadd.f32 %v1272_v44, %v1635_v32  ;;  %v545_v51 = vpop.f32.mrf.mxu0  ;;  %v577_v52 = vpop.f32.mrf.mxu1 }
 0x115   : > { %v713_v53 = vmul.f32 0.044715, %v697_v45  ;;  %v721_v54 = vmul.f32 0.044715, %v705_v46  ;;  %v695_v55 = vmul.f32 %v679_v47, %v1648_v41  ;;  %v703_v56 = vmul.f32 %v687_v48, %v1651_v42 }
 0x116   : > { %v682_v57 = vmul.f32 %v1660_v49, %v1660_v49  ;;  %v690_v58 = vmul.f32 %v1663_v50, %v1663_v50  ;;  %v1672_v59 = vadd.f32 %v1635_v32, %v545_v51  ;;  %v1675_v60 = vadd.f32 %v1635_v32, %v577_v52  ;;  %v1267_v61 = vpop.f32.mrf.mxu0  ;;  %v1275_v62 = vpop.f32.mrf.mxu1 }
 0x117   : > { %v729_v63 = vadd.f32 %v713_v53, %v1638_v35  ;;  %v737_v0 = vadd.f32 %v721_v54, %v1641_v36  ;;  %v711_v1 = vmul.f32 0.044715, %v695_v55  ;;  %v719_v2 = vmul.f32 0.044715, %v703_v56 }
 0x118   : > { %v698_v3 = vmul.f32 %v682_v57, %v1660_v49  ;;  %v706_v4 = vmul.f32 %v690_v58, %v1663_v50  ;;  %v680_v5 = vmul.f32 %v1672_v59, %v1672_v59  ;;  %v688_v6 = vmul.f32 %v1675_v60, %v1675_v60  ;;  %v558_v11 = vpop.f32.mrf.mxu0  ;;  %v590_v16 = vpop.f32.mrf.mxu1 }
 0x119   : > { %v745_v7 = vmul.f32 0.7978846, %v729_v63  ;;  %v753_v8 = vmul.f32 0.7978846, %v737_v0  ;;  %v727_v9 = vadd.f32 %v711_v1, %v1648_v41  ;;  %v735_v10 = vadd.f32 %v719_v2, %v1651_v42 }
 0x11a   : > { %v714_v12 = vmul.f32 0.044715, %v698_v3  ;;  %v722_v13 = vmul.f32 0.044715, %v706_v4  ;;  %v696_v14 = vmul.f32 %v680_v5, %v1672_v59  ;;  %v704_v15 = vmul.f32 %v688_v6, %v1675_v60  ;;  %v1268_v26 = vpop.f32.mrf.mxu0  ;;  %v1276_v30 = vpop.f32.mrf.mxu1 }
 0x11b   : > { %1381 = vtanh.f32 %v745_v7  ;;  %v743_v17 = vmul.f32 0.7978846, %v727_v9  ;;  %v751_v18 = vmul.f32 0.7978846, %v735_v10  ;;  %v1690_v19 = vadd.f32 %v1267_v61, %v1635_v32 }
 0x11c   : > { %1383 = vtanh.f32 %v753_v8  ;;  %v730_v20 = vadd.f32 %v714_v12, %v1660_v49  ;;  %v738_v21 = vadd.f32 %v722_v13, %v1663_v50  ;;  %v712_v22 = vmul.f32 0.044715, %v696_v14  ;;  %v561_v46 = vpop.f32.mrf.mxu0  ;;  %v593_v52 = vpop.f32.mrf.mxu1 }
 0x11d   : > { %1385 = vtanh.f32 %v743_v17  ;;  %v720_v23 = vmul.f32 0.044715, %v704_v15  ;;  %v685_v24 = vmul.f32 %v1690_v19, %v1690_v19  ;;  %v1697_v25 = vadd.f32 %v1275_v62, %v1635_v32 }
 0x11e   : > { %1387 = vtanh.f32 %v751_v18  ;;  %v746_v27 = vmul.f32 0.7978846, %v730_v20  ;;  %v754_v28 = vmul.f32 0.7978846, %v738_v21  ;;  %v728_v29 = vadd.f32 %v712_v22, %v1672_v59 }
 0x11f   : > { %v736_v31 = vadd.f32 %v720_v23, %v1675_v60  ;;  %v701_v33 = vmul.f32 %v685_v24, %v1690_v19  ;;  %v693_v34 = vmul.f32 %v1697_v25, %v1697_v25  ;;  %v1705_v37 = vadd.f32 %v1635_v32, %v558_v11 }
 0x120   : > { %1389 = vtanh.f32 %v746_v27  ;;  %v744_v38 = vmul.f32 0.7978846, %v728_v29  ;;  %v1708_v39 = vadd.f32 %v1635_v32, %v590_v16  ;;  %v1711_v40 = vadd.f32 %v1268_v26, %v1635_v32 }
 0x121   : > { %1391 = vtanh.f32 %v754_v28  ;;  %v752_v43 = vmul.f32 0.7978846, %v736_v31  ;;  %v717_v44 = vmul.f32 0.044715, %v701_v33  ;;  %v709_v45 = vmul.f32 %v693_v34, %v1697_v25 }
 0x122   : > { %1393 = vtanh.f32 %v744_v38  ;;  %v683_v47 = vmul.f32 %v1705_v37, %v1705_v37  ;;  %v691_v48 = vmul.f32 %v1708_v39, %v1708_v39  ;;  %v686_v51 = vmul.f32 %v1711_v40, %v1711_v40 }
 0x123   : > { %1395 = vtanh.f32 %v752_v43  ;;  %v733_v53 = vadd.f32 %v717_v44, %v1690_v19  ;;  %v725_v54 = vmul.f32 0.044715, %v709_v45  ;;  %v1722_v55 = vadd.f32 %v1276_v30, %v1635_v32 }
 0x124   : > { %v699_v56 = vmul.f32 %v683_v47, %v1705_v37  ;;  %v707_v57 = vmul.f32 %v691_v48, %v1708_v39  ;;  %v702_v58 = vmul.f32 %v686_v51, %v1711_v40  ;;  %v1728_v61 = vadd.f32 %v1635_v32, %v561_v46 }
 0x125   : > { %v749_v62 = vmul.f32 0.7978846, %v733_v53  ;;  %v741_v63 = vadd.f32 %v725_v54, %v1697_v25  ;;  %v694_v0 = vmul.f32 %v1722_v55, %v1722_v55  ;;  %v1734_v1 = vadd.f32 %v1635_v32, %v593_v52 }
 0x126   : > { %v715_v2 = vmul.f32 0.044715, %v699_v56  ;;  %v723_v3 = vmul.f32 0.044715, %v707_v57  ;;  %v718_v4 = vmul.f32 0.044715, %v702_v58  ;;  %v684_v5 = vmul.f32 %v1728_v61, %v1728_v61 }
 0x127   : > { %1397 = vtanh.f32 %v749_v62  ;;  %v757_v6 = vmul.f32 0.7978846, %v741_v63  ;;  %v710_v7 = vmul.f32 %v694_v0, %v1722_v55  ;;  %v692_v8 = vmul.f32 %v1734_v1, %v1734_v1 }
 0x128   : > { %v1382_v9 = vpop.eup %1381  ;;  %v731_v10 = vadd.f32 %v715_v2, %v1705_v37  ;;  %v739_v11 = vadd.f32 %v723_v3, %v1708_v39  ;;  %v734_v32 = vadd.f32 %v718_v4, %v1711_v40  ;;  %v700_v12 = vmul.f32 %v684_v5, %v1728_v61 }
 0x129   : > { %v1384_v13 = vpop.eup %1383  ;;  %1399 = vtanh.f32 %v757_v6  ;;  %v726_v14 = vmul.f32 0.044715, %v710_v7  ;;  %v777_v16 = vadd.f32 1.0, %v1382_v9  ;;  %v708_v27 = vmul.f32 %v692_v8, %v1734_v1 }
 0x12a   : > { %v1386_v15 = vpop.eup %1385  ;;  %v785_v17 = vadd.f32 1.0, %v1384_v13  ;;  %v747_v18 = vmul.f32 0.7978846, %v731_v10  ;;  %v750_v22 = vmul.f32 0.7978846, %v734_v32 }
 0x12b   : > { %v1388_v20 = vpop.eup %1387  ;;  %v775_v21 = vadd.f32 1.0, %v1386_v15  ;;  %v742_v23 = vadd.f32 %v726_v14, %v1722_v55  ;;  %v755_v24 = vmul.f32 0.7978846, %v739_v11  ;;  %v716_v26 = vmul.f32 0.044715, %v700_v12 }
 0x12c   : > { %v783_v29 = vadd.f32 1.0, %v1388_v20  ;;  %1401 = vtanh.f32 %v747_v18  ;;  %v793_v33 = vmul.f32 0.5, %v777_v16  ;;  %v801_v34 = vmul.f32 0.5, %v785_v17 }
 0x12d   : > { %v1390_v28 = vpop.eup %1389  ;;  %v758_v30 = vmul.f32 0.7978846, %v742_v23  ;;  %1403 = vtanh.f32 %v750_v22  ;;  %v791_v44 = vmul.f32 0.5, %v775_v21  ;;  %v732_v46 = vadd.f32 %v716_v26, %v1728_v61 }
 0x12e   : > { %v1392_v31 = vpop.eup %1391  ;;  %v778_v38 = vadd.f32 1.0, %v1390_v28  ;;  %v724_v52 = vmul.f32 0.044715, %v708_v27  ;;  %v799_v53 = vmul.f32 0.5, %v783_v29  ;;  %v809_v58 = vmul.f32 %v793_v33, %v1638_v35 }
 0x12f   : > { %v1394_v43 = vpop.eup %1393  ;;  %v786_v45 = vadd.f32 1.0, %v1392_v31  ;;  %1405 = vtanh.f32 %v758_v30  ;;  %v748_v57 = vmul.f32 0.7978846, %v732_v46  ;;  %v817_v2 = vmul.f32 %v801_v34, %v1641_v36 }
 0x130   : > { %v1396_v47 = vpop.eup %1395  ;;  %v794_v48 = vmul.f32 0.5, %v778_v38  ;;  %v776_v51 = vadd.f32 1.0, %v1394_v43  ;;  %1407 = vtanh.f32 %v755_v24  ;;  %v740_v0 = vadd.f32 %v724_v52, %v1734_v1 }
 0x131   : > { %v802_v54 = vmul.f32 0.5, %v786_v45  ;;  %v784_v56 = vadd.f32 1.0, %v1396_v47  ;;  %1409 = vtanh.f32 %v748_v57  ;;  %v807_v6 = vmul.f32 %v791_v44, %v1648_v41 }
 0x132   : > { %v810_v62 = vmul.f32 %v794_v48, %v1660_v49  ;;  %v792_v63 = vmul.f32 0.5, %v776_v51  ;;  %v756_v9 = vmul.f32 0.7978846, %v740_v0  ;;  %v815_v35 = vmul.f32 %v799_v53, %v1651_v42 }
 0x133   : > { %v818_v3 = vmul.f32 %v802_v54, %v1663_v50  ;;  %v800_v4 = vmul.f32 0.5, %v784_v56 }
 0x134   : > { %v1398_v5 = vpop.eup %1397  ;;  %v1190_v7 = vpack.c.bf16 %v810_v62, %v809_v58  ;;  %v808_v8 = vmul.f32 %v792_v63, %v1672_v59  ;;  %1411 = vtanh.f32 %v756_v9 }
 0x135   : > { %v1210_v10 = vpack.c.bf16 %v818_v3, %v817_v2  ;;  %v816_v49 = vmul.f32 %v800_v4, %v1675_v60  ;;  %v781_v50 = vadd.f32 1.0, %v1398_v5 }
 0x136   : > { %v1400_v11 = vpop.eup %1399  ;;  %1222 = vst [vmem:[%s1758_s12 + $0x8] sm:$0xff] %v1190_v7   ;;  %v1185_v36 = vpack.c.bf16 %v808_v8, %v807_v6 }
 0x137   : > { %1226 = vst [vmem:[%s1758_s12 + $0x28] sm:$0xff] %v1210_v10   ;;  %v1205_v41 = vpack.c.bf16 %v816_v49, %v815_v35  ;;  %v789_v59 = vadd.f32 1.0, %v1400_v11  ;;  %v797_v60 = vmul.f32 0.5, %v781_v50 }
 0x138   : > { %1186 = vst [vmem:[%s1758_s12] sm:$0xff] %v1185_v36  }
 0x139   : > { %1225 = vst [vmem:[%s1758_s12 + $0x20] sm:$0xff] %v1205_v41   ;;  %v1402_v42 = vpop.eup %1401  ;;  %v805_v15 = vmul.f32 0.5, %v789_v59  ;;  %v813_v22 = vmul.f32 %v797_v60, %v1690_v19 }
 0x13a   : > { %v1404_v32 = vpop.eup %1403  ;;  %v779_v16 = vadd.f32 1.0, %v1402_v42 }
 0x13b   : > { %v782_v13 = vadd.f32 1.0, %v1404_v32  ;;  %v821_v26 = vmul.f32 %v805_v15, %v1697_v25 }
 0x13c   : > { %v1406_v12 = vpop.eup %1405  ;;  %v795_v27 = vmul.f32 0.5, %v779_v16 }
 0x13d   : > { %v1408_v14 = vpop.eup %1407  ;;  %v790_v17 = vadd.f32 1.0, %v1406_v12  ;;  %v798_v18 = vmul.f32 0.5, %v782_v13 }
 0x13e   : > { %v1410_v21 = vpop.eup %1409  ;;  %v787_v23 = vadd.f32 1.0, %v1408_v14  ;;  %v811_v19 = vmul.f32 %v795_v27, %v1705_v37  ;;  %v951_v56 = vld [vmem:[%s1758_s12 + $0x28] sm:$0xf] (%p1572_p9)  ;;  %v953_v57 = vld [vmem:[%s1758_s12 + $0x2c] sm:$0xf] (%p1572_p9) }
 0x13f   : > { %v806_v20 = vmul.f32 0.5, %v790_v17  ;;  %v814_v24 = vmul.f32 %v798_v18, %v1711_v40  ;;  %v780_v29 = vadd.f32 1.0, %v1410_v21  ;;  %v931_v37 = vld [vmem:[%s1758_s12] sm:$0xf] (%p1572_p9)  ;;  %952 = vst [vmem:[%s914_s28 + $0x50] sm:$0xf] (%p1572_p9), %v951_v56 }
 0x140   : > { %v803_v38 = vmul.f32 0.5, %v787_v23  ;;  %v947_v53 = vld [vmem:[%s1758_s12 + $0x20] sm:$0xf] (%p1572_p9)  ;;  %v949_v54 = vld [vmem:[%s1758_s12 + $0x24] sm:$0xf] (%p1572_p9)  ;;  %932 = vst [vmem:[%s914_s28] sm:$0xf] (%p1572_p9), %v931_v37 }
 0x141   : > { %v822_v28 = vmul.f32 %v806_v20, %v1722_v55  ;;  %v1200_v30 = vpack.c.bf16 %v814_v24, %v813_v22  ;;  %v1412_v31 = vpop.eup %1411  ;;  %v796_v34 = vmul.f32 0.5, %v780_v29  ;;  %948 = vst [vmem:[%s914_s28 + $0x40] sm:$0xf] (%p1572_p9), %v947_v53  ;;  %950 = vst [vmem:[%s914_s28 + $0x48] sm:$0xf] (%p1572_p9), %v949_v54 }
 0x142   : > { %v788_v43 = vadd.f32 1.0, %v1412_v31  ;;  %v819_v45 = vmul.f32 %v803_v38, %v1708_v39  ;;  %v933_v39 = vld [vmem:[%s1758_s12 + $0x4] sm:$0xf] (%p1572_p9)  ;;  %954 = vst [vmem:[%s914_s28 + $0x58] sm:$0xf] (%p1572_p9), %v953_v57 }
 0x143   : > { %v1220_v33 = vpack.c.bf16 %v822_v28, %v821_v26  ;;  %1224 = vst [vmem:[%s1758_s12 + $0x18] sm:$0xff] %v1200_v30   ;;  %v812_v40 = vmul.f32 %v796_v34, %v1728_v61  ;;  %v935_v61 = vld [vmem:[%s1758_s12 + $0x8] sm:$0xf] (%p1572_p9)  ;;  %934 = vst [vmem:[%s914_s28 + $0x8] sm:$0xf] (%p1572_p9), %v933_v39 }
 0x144   : > { %v804_v44 = vmul.f32 0.5, %v788_v43  ;;  %936 = vst [vmem:[%s914_s28 + $0x10] sm:$0xf] (%p1572_p9), %v935_v61 }
 0x145   : > { %1228 = vst [vmem:[%s1758_s12 + $0x38] sm:$0xff] %v1220_v33   ;;  %v1195_v25 = vpack.c.bf16 %v812_v40, %v811_v19 }
 0x146   : > { %v820_v55 = vmul.f32 %v804_v44, %v1734_v1  ;;  %909 = sbr.rel (!%p1572_p9) target bundleno = 339 (0x153), region = 85  ;;  %v937_v1 = vld [vmem:[%s1758_s12 + $0xc] sm:$0xf] (%p1572_p9) }
 0x147   : > { %1223 = vst [vmem:[%s1758_s12 + $0x10] sm:$0xff] %v1195_v25   ;;  %938 = vst [vmem:[%s914_s28 + $0x18] sm:$0xf] (%p1572_p9), %v937_v1 }
 0x148   : > { %v1215_v46 = vpack.c.bf16 %v820_v55, %v819_v45 }
 0x14a   : > { %1227 = vst [vmem:[%s1758_s12 + $0x30] sm:$0xff] %v1215_v46   ;;  %v943_v51 = vld [vmem:[%s1758_s12 + $0x18] sm:$0xf] (%p1572_p9)  ;;  %v945_v52 = vld [vmem:[%s1758_s12 + $0x1c] sm:$0xf] (%p1572_p9) }
 0x14b   : > { %944 = vst [vmem:[%s914_s28 + $0x30] sm:$0xf] %v943_v51  ;;  %946 = vst [vmem:[%s914_s28 + $0x38] sm:$0xf] %v945_v52 }
 0x14c   : > { %v959_v63 = vld [vmem:[%s1758_s12 + $0x38] sm:$0xf]  ;;  %v961_v0 = vld [vmem:[%s1758_s12 + $0x3c] sm:$0xf] }
 0x14d   : > { %960 = vst [vmem:[%s914_s28 + $0x70] sm:$0xf] %v959_v63  ;;  %962 = vst [vmem:[%s914_s28 + $0x78] sm:$0xf] %v961_v0 }
 0x14e   : > { %v939_v47 = vld [vmem:[%s1758_s12 + $0x10] sm:$0xf]  ;;  %v941_v48 = vld [vmem:[%s1758_s12 + $0x14] sm:$0xf] }
 0x14f   : > { %940 = vst [vmem:[%s914_s28 + $0x20] sm:$0xf] %v939_v47  ;;  %942 = vst [vmem:[%s914_s28 + $0x28] sm:$0xf] %v941_v48 }
 0x151   : > { %v955_v58 = vld [vmem:[%s1758_s12 + $0x30] sm:$0xf]  ;;  %v957_v62 = vld [vmem:[%s1758_s12 + $0x34] sm:$0xf] }
 0x152   : > { %956 = vst [vmem:[%s914_s28 + $0x60] sm:$0xf] %v955_v58  ;;  %958 = vst [vmem:[%s914_s28 + $0x68] sm:$0xf] %v957_v62 }
 0x153 PF: > { %s13_s20 = sadd.s32 1, %s1483_s20   ;;  %s1831_s12 = smov %s1455_s13 }
 0x154   : > { %p10_p2 = scmp.ge.s32.totalorder %s13_s20, 6   ;;  %s1832_s13 = smov %s1577_s4 }
 0x155   : > { %s1833_s14 = smov %s1463_s15  ;;  %s1834_s15 = smov %s1566_s27 }
 0x156   : > { %s1835_s16 = smov %s1475_s18  ;;  %s1836_s17 = smov %s1479_s19 }
 0x157   : > { %s1837_s18 = smov %s1840_s22  ;;  %s1838_s19 = smov %s1844_s23 }
 0x158   :  { %12 = sbr.rel (!%p10_p2) target bundleno = 5 (0x5), region = 163 }

// kernel: _lambda_.23
= control target key start
LH: loop header
LB: loop body
LE: loop exit
PB: predicated region body
PF: predicated region fallthrough
CT: control target
= control target key end

     0   :  { %s1329_s12 = smov 0   ;;  %s1331_s13 = smov 0   ;;  %s1520_s0 = inlined_call_operand.vmem [shape: bf16[256,128], index: 0, kind: input, shape index: {}]   ;;  %s1521_s1 = inlined_call_operand.vmem [shape: bf16[128,1024], index: 1, kind: input, shape index: {}]   ;;  %s1522_s2 = inlined_call_operand.vmem [shape: f32[1,1024], index: 2, kind: input, shape index: {}]   ;;  %s1523_s3 = inlined_call_operand.vmem [shape: bf16[256,1024], index: 3, kind: output, shape index: {}]  }
   0x1   :  { %s1333_s14 = smov 0   ;;  %s1335_s15 = smov 0  }
   0x2   :  { %s1337_s16 = smov 0   ;;  %s1339_s17 = smov 0  }
   0x3   :  { %s1341_s18 = smov 0   ;;  %s1343_s19 = smov 0  }
   0x4   :  { %s1345_s20 = smov 0  }
   0x5 LB: > { %s971_s21 = sadd.s32 4294967295, %s1307_s20   ;;  %s28_s22 = sadd.s32 1, %s1299_s18  ;;  %s1307_s20 = sphi %s1345_s20, %s13_s20   ;;  %s1303_s19 = sphi %s1343_s19, %s1532_s19   ;;  %s1299_s18 = sphi %s1341_s18, %s1531_s18   ;;  %s1295_s17 = sphi %s1339_s17, %s1530_s17   ;;  %s1291_s16 = sphi %s1337_s16, %s1529_s16   ;;  %s1287_s15 = sphi %s1335_s15, %s1528_s15   ;;  %s1283_s14 = sphi %s1333_s14, %s1527_s14   ;;  %s1279_s13 = sphi %s1331_s13, %s1526_s13   ;;  %s1275_s12 = sphi %s1329_s12, %s1525_s12  }
   0x6   : > { %p30_p0 = scmp.ge.s32.totalorder %s28_s22, 8  ;;  %s32_s23 = sadd.s32 1, %s1303_s19 }
   0x7   : > { %s69_s24 = sadd.s32 1, %s1287_s15  ;;  %p76_p1 = scmp.ne.s32.totalorder %s1287_s15, %s1283_s14 }
   0x8   : > { %s1534_s22 = smov (%p30_p0, %s28_s22), 0  ;;  %s1536_s23 = smov (!%p30_p0, %s32_s23), %s1303_s19 }
   0x9   : > { %s65_s25 = ssub.s32 %s1299_s18, %s1534_s22  ;;  %p77_p2 = scmp.eq.s32.totalorder %s1307_s20, 0 }
   0xa   : > { %p34_p3 = scmp.ge.s32.totalorder %s1536_s23, 2  ;;  %p67_p4 = scmp.eq.s32.totalorder %s65_s25, 0 }
   0xb   : > { %p78_p5 = por %p77_p2, %p76_p1  ;;  %s123_s26 = sadd.s32 1, %s1279_s13 }
   0xc   : > { %s1538_s23 = smov (%p34_p3, %s1536_s23), 0  ;;  %p133_p6 = scmp.ne.s32.totalorder %s1279_s13, %s1275_s12 }
   0xd   : > { %s1390_s27 = scalar_select %p67_p4, %s1287_s15, %s69_s24  }
   0xe   : > { %s118_s28 = ssub.s32 %s1303_s19, %s1538_s23  ;;  %p134_p7 = scmp.eq.s32.totalorder %s971_s21, 15 }
   0xf   : > { %s120_s29 = sor.u32 %s118_s28, %s65_s25  ;;  %p974_p10 = scmp.ge.s32.totalorder %s1307_s20, 16 }
  0x10   : > { %p121_p8 = scmp.eq.s32.totalorder %s120_s29, 0  ;;  %p1396_p9 = por %p134_p7, %p133_p6 }
  0x11   : > { %156 = sbr.rel (%p974_p10) target bundleno = 42 (0x2a), region = 16 }
  0x12   : > { %s1401_s4 = scalar_select %p121_p8, %s1279_s13, %s123_s26  }
  0x16   : > { %171 = sbr.rel (!%p78_p5) target bundleno = 42 (0x2a), region = 24  ;;  %s173_s5 = sand.u32 (%p78_p5), 1, %s1287_s15  }
  0x17   : > { %s976_s6 = sshll.u32 (%p78_p5), %s1299_s18, 2  ;;  %s975_s7 = sshll.u32 (%p78_p5), %s173_s5, 6 }
  0x18   : > { %s1409_s10 = scalar_lea.vmem (%p78_p5), %s1521_s1, %s976_s6  ;;  %s175_s11 = scalar_lea.vmem (%p78_p5), [#allocation3], %s975_s7 }
  0x19   : > { %v197_v0 = vld [vmem:[%s1409_s10] sm:$0xf] (%p78_p5) }
  0x1a   : > { %v199_v1 = vld [vmem:[%s1409_s10 + $0x20] sm:$0xf] (%p78_p5)  ;;  %198 = vst [vmem:[%s175_s11] sm:$0xf] (%p78_p5), %v197_v0 }
  0x1b   : > { %200 = vst [vmem:[%s175_s11 + $0x4] sm:$0xf] %v199_v1  ;;  %v201_v2 = vld [vmem:[%s1409_s10 + $0x40] sm:$0xf] }
  0x1c   : > { %v203_v3 = vld [vmem:[%s1409_s10 + $0x60] sm:$0xf]  ;;  %202 = vst [vmem:[%s175_s11 + $0x8] sm:$0xf] %v201_v2 }
  0x1d   : > { %v205_v4 = vld [vmem:[%s1409_s10 + $0x80] sm:$0xf]  ;;  %204 = vst [vmem:[%s175_s11 + $0xc] sm:$0xf] %v203_v3 }
  0x1e   : > { %206 = vst [vmem:[%s175_s11 + $0x10] sm:$0xf] %v205_v4  ;;  %v207_v5 = vld [vmem:[%s1409_s10 + $0xa0] sm:$0xf] }
  0x1f   : > { %v209_v6 = vld [vmem:[%s1409_s10 + $0xc0] sm:$0xf]  ;;  %208 = vst [vmem:[%s175_s11 + $0x14] sm:$0xf] %v207_v5 }
  0x20   : > { %v211_v7 = vld [vmem:[%s1409_s10 + $0xe0] sm:$0xf]  ;;  %210 = vst [vmem:[%s175_s11 + $0x18] sm:$0xf] %v209_v6 }
  0x21   : > { %212 = vst [vmem:[%s175_s11 + $0x1c] sm:$0xf] %v211_v7  ;;  %v213_v8 = vld [vmem:[%s1409_s10 + $0x100] sm:$0xf] }
  0x22   : > { %v215_v9 = vld [vmem:[%s1409_s10 + $0x120] sm:$0xf]  ;;  %214 = vst [vmem:[%s175_s11 + $0x20] sm:$0xf] %v213_v8 }
  0x23   : > { %v217_v10 = vld [vmem:[%s1409_s10 + $0x140] sm:$0xf]  ;;  %216 = vst [vmem:[%s175_s11 + $0x24] sm:$0xf] %v215_v9 }
  0x24   : > { %218 = vst [vmem:[%s175_s11 + $0x28] sm:$0xf] %v217_v10  ;;  %v219_v11 = vld [vmem:[%s1409_s10 + $0x160] sm:$0xf] }
  0x25   : > { %v221_v12 = vld [vmem:[%s1409_s10 + $0x180] sm:$0xf]  ;;  %220 = vst [vmem:[%s175_s11 + $0x2c] sm:$0xf] %v219_v11 }
  0x26   : > { %v223_v13 = vld [vmem:[%s1409_s10 + $0x1a0] sm:$0xf]  ;;  %222 = vst [vmem:[%s175_s11 + $0x30] sm:$0xf] %v221_v12 }
  0x27   : > { %224 = vst [vmem:[%s175_s11 + $0x34] sm:$0xf] %v223_v13  ;;  %v225_v14 = vld [vmem:[%s1409_s10 + $0x1c0] sm:$0xf] }
  0x28   : > { %v227_v15 = vld [vmem:[%s1409_s10 + $0x1e0] sm:$0xf]  ;;  %226 = vst [vmem:[%s175_s11 + $0x38] sm:$0xf] %v225_v14 }
  0x29   : > { %228 = vst [vmem:[%s175_s11 + $0x3c] sm:$0xf] %v227_v15 }
  0x2a PF: > { %p977_p11 = scmp.ge.s32.totalorder %s1307_s20, 1  ;;  %p289_p12 = scmp.lt.s32.totalorder %s1307_s20, 17 }
  0x2c   : > { %p290_p13 = pnand %p977_p11, %p289_p12 }
  0x2d   : > { %s296_s21 = sand.u32 (!%p290_p13), 1, %s1283_s14   ;;  %s980_s24 = sshll.u32 (!%p290_p13), %s1295_s17, 4 }
  0x2e   : > { %293 = sbr.rel (%p290_p13) target bundleno = 306 (0x132), region = 69  ;;  %s978_s25 = sshll.u32 (!%p290_p13), %s296_s21, 6 }
  0x2f   : > { %p330_p0 = scmp.lt.s32.totalorder (!%p290_p13), %s980_s24, 31  ;;  %s1431_s26 = scalar_lea.vmem (!%p290_p13), [#allocation3], %s978_s25 }
  0x30   : > { %p339_p1 = scmp.lt.s32.totalorder (!%p290_p13), %s1291_s16, 7  ;;  %s326_s10 = sand.u32 (!%p290_p13), 1, %s1275_s12  }
  0x31   : > { %s979_s11 = sshll.u32 (!%p290_p13), %s326_s10, 6 }
  0x32   : > { %s1460_s12 = scalar_lea.vmem (!%p290_p13), [#allocation4], %s979_s11 }
  0x33   : > { %v1221_v16 = vld [vmem:[%s1431_s26 + $0x38] sm:$0xff]   ;;  %s1540_s24 = smov (!%p330_p0, %s980_s24), 31  ;;  %v1222_v17 = vld [vmem:[%s1431_s26 + $0x30] sm:$0xff]   ;;  %v1223_v18 = vld [vmem:[%s1431_s26 + $0x28] sm:$0xff]   ;;  %s1037_s21 = sshll.u32 (%p1396_p9), %s1295_s17, 7 }
  0x34   : > { %1101 = vmatprep.subr.bf16.mxu0 %v1221_v16  ;;  %1133 = vmatprep.subr.bf16.mxu1 %v1221_v16  ;;  %s981_s28 = sshll.u32 %s1540_s24, 2  ;;  %v1224_v19 = vld [vmem:[%s1431_s26 + $0x20] sm:$0xff]   ;;  %v1225_v22 = vld [vmem:[%s1431_s26 + $0x18] sm:$0xff]   ;;  %v1226_v23 = vld [vmem:[%s1431_s26 + $0x10] sm:$0xff]   ;;  %s768_s24 = sadd.s32 (%p1396_p9), %s1291_s16, %s1037_s21 }
  0x35   : > { %1102 = vmatpush3.bf16.msra.mxu0 %v1221_v16  ;;  %1141 = vmatpush3.bf16.msra.mxu1 %v1221_v16  ;;  %s1439_s5 = scalar_lea.vmem %s1520_s0, %s981_s28  ;;  %v1227_v24 = vld [vmem:[%s1431_s26 + $0x8] sm:$0xff]   ;;  %v1228_v25 = vld [vmem:[%s1431_s26] sm:$0xff]   ;;  %s1018_s30 = sshll.u32 (%p1396_p9), %s768_s24, 2 }
  0x36   : > { %1103 = vmatprep.subr.bf16.mxu0 %v1222_v17  ;;  %1134 = vmatprep.subr.bf16.mxu1 %v1222_v17  ;;  %v1229_v20 = vld [vmem:[%s1439_s5] sm:$0xff]   ;;  %v1231_v26 = vld [vmem:[%s1439_s5 + $0x8] sm:$0xff]   ;;  %v1233_v28 = vld [vmem:[%s1439_s5 + $0x10] sm:$0xff]   ;;  %s340_s6 = scalar_select %p339_p1, %s1291_s16, 7 }
  0x37   : > { %v1230_v21 = vld [vmem:[%s1439_s5 + $0x20] sm:$0xff]   ;;  %1117 = vmatprep.mubr.bf16.mxu0 %v1229_v20  ;;  %v1232_v27 = vld [vmem:[%s1439_s5 + $0x28] sm:$0xff]   ;;  %v1234_v29 = vld [vmem:[%s1439_s5 + $0x30] sm:$0xff]   ;;  %s770_s28 = scalar_lea.vmem (%p1396_p9), %s1523_s3, %s1018_s30 }
  0x38   : > { %1125 = vmatprep.mubr.bf16.mxu1 %v1230_v21  ;;  %v1235_v30 = vld [vmem:[%s1439_s5 + $0x18] sm:$0xff]   ;;  %s341_s9 = scalar_lea.vmem %s1522_s2, %s340_s6 }
  0x39   : > { %1104 = vmatpush3.bf16.msra.mxu0 %v1222_v17  ;;  %1142 = vmatpush3.bf16.msra.mxu1 %v1222_v17  ;;  %v1236_v31 = vld [vmem:[%s1439_s5 + $0x38] sm:$0xff]   ;;  %v998_v34 = vld [vmem:[%s341_s9] ss:$0 sm:$0xff] }
  0x3a   : > { %1105 = vmatprep.subr.bf16.mxu0 %v1223_v18  ;;  %1135 = vmatprep.subr.bf16.mxu1 %v1223_v18 }
  0x3d   : > { %1106 = vmatpush3.bf16.msra.mxu0 %v1223_v18  ;;  %1143 = vmatpush3.bf16.msra.mxu1 %v1223_v18 }
  0x3e   : > { %1107 = vmatprep.subr.bf16.mxu0 %v1224_v19  ;;  %1136 = vmatprep.subr.bf16.mxu1 %v1224_v19 }
  0x41   : > { %1108 = vmatpush3.bf16.msra.mxu0 %v1224_v19  ;;  %1144 = vmatpush3.bf16.msra.mxu1 %v1224_v19 }
  0x42   : > { %1109 = vmatprep.subr.bf16.mxu0 %v1225_v22  ;;  %1137 = vmatprep.subr.bf16.mxu1 %v1225_v22 }
  0x45   : > { %1110 = vmatpush3.bf16.msra.mxu0 %v1225_v22  ;;  %1145 = vmatpush3.bf16.msra.mxu1 %v1225_v22 }
  0x46   : > { %1111 = vmatprep.subr.bf16.mxu0 %v1226_v23  ;;  %1138 = vmatprep.subr.bf16.mxu1 %v1226_v23 }
  0x49   : > { %1112 = vmatpush3.bf16.msra.mxu0 %v1226_v23  ;;  %1146 = vmatpush3.bf16.msra.mxu1 %v1226_v23 }
  0x4a   : > { %1113 = vmatprep.subr.bf16.mxu0 %v1227_v24  ;;  %1139 = vmatprep.subr.bf16.mxu1 %v1227_v24 }
  0x4d   : > { %1114 = vmatpush3.bf16.msra.mxu0 %v1227_v24  ;;  %1147 = vmatpush3.bf16.msra.mxu1 %v1227_v24 }
  0x4e   : > { %1115 = vmatprep.subr.bf16.mxu0 %v1228_v25  ;;  %1140 = vmatprep.subr.bf16.mxu1 %v1228_v25 }
  0x51   : > { %1116 = vmatpush3.bf16.msra.mxu0 %v1228_v25  ;;  %1148 = vmatpush3.bf16.msra.mxu1 %v1228_v25 }
  0x54   : > { %1118 = vmatmul.mubr.bf16.vlgmr.msra.gmra.mxu0 %v1231_v26  ;;  %1126 = vmatmul.mubr.bf16.vlgmr.msra.gmra.mxu1 %v1232_v27 }
  0x55   : > { %1121 = vmatprep.mubr.bf16.mxu0 %v1233_v28  ;;  %1129 = vmatprep.mubr.bf16.mxu1 %v1234_v29 }
  0x5c   : > { %1122 = vmatmul.mubr.bf16.gmra.mxu0 %v1235_v30  ;;  %1130 = vmatmul.mubr.bf16.gmra.mxu1 %v1236_v31 }
 0x114   : > { %v1119_v32 = vpop.f32.mrf.mxu0  ;;  %v1127_v33 = vpop.f32.mrf.mxu1 }
 0x115   : > { %v665_v39 = vadd.f32 %v1119_v32, %v998_v34  ;;  %v673_v40 = vadd.f32 %v1127_v33, %v998_v34 }
 0x116   : > { %v542_v35 = vpop.f32.mrf.mxu0  ;;  %v574_v36 = vpop.f32.mrf.mxu1 }
 0x117   : > { %v663_v43 = vadd.f32 %v998_v34, %v542_v35  ;;  %v671_v44 = vadd.f32 %v998_v34, %v574_v36 }
 0x118   : > { %v1120_v37 = vpop.f32.mrf.mxu0  ;;  %v1128_v38 = vpop.f32.mrf.mxu1 }
 0x119   : > { %v666_v41 = vadd.f32 %v1120_v37, %v998_v34  ;;  %v674_v42 = vadd.f32 %v1128_v38, %v998_v34 }
 0x11a   : > { %v545_v45 = vpop.f32.mrf.mxu0  ;;  %v577_v46 = vpop.f32.mrf.mxu1 }
 0x11b   : > { %v1046_v47 = vpack.c.bf16 %v666_v41, %v665_v39  ;;  %v1066_v48 = vpack.c.bf16 %v674_v42, %v673_v40  ;;  %v664_v49 = vadd.f32 %v998_v34, %v545_v45  ;;  %v672_v50 = vadd.f32 %v998_v34, %v577_v46 }
 0x11c   : > { %v1123_v51 = vpop.f32.mrf.mxu0  ;;  %v1131_v52 = vpop.f32.mrf.mxu1 }
 0x11d   : > { %1078 = vst [vmem:[%s1460_s12 + $0x8] sm:$0xff] %v1046_v47   ;;  %1082 = vst [vmem:[%s1460_s12 + $0x28] sm:$0xff] %v1066_v48   ;;  %v1041_v53 = vpack.c.bf16 %v664_v49, %v663_v43  ;;  %v1061_v54 = vpack.c.bf16 %v672_v50, %v671_v44  ;;  %v669_v59 = vadd.f32 %v1123_v51, %v998_v34 }
 0x11e   : > { %v558_v55 = vpop.f32.mrf.mxu0  ;;  %v590_v56 = vpop.f32.mrf.mxu1  ;;  %v677_v60 = vadd.f32 %v1131_v52, %v998_v34 }
 0x11f   : > { %1042 = vst [vmem:[%s1460_s12] sm:$0xff] %v1041_v53   ;;  %1081 = vst [vmem:[%s1460_s12 + $0x20] sm:$0xff] %v1061_v54   ;;  %v667_v63 = vadd.f32 %v998_v34, %v558_v55  ;;  %v675_v0 = vadd.f32 %v998_v34, %v590_v56 }
 0x120   : > { %v1124_v57 = vpop.f32.mrf.mxu0  ;;  %v1132_v58 = vpop.f32.mrf.mxu1 }
 0x121   : > { %v670_v61 = vadd.f32 %v1124_v57, %v998_v34  ;;  %v678_v62 = vadd.f32 %v1132_v58, %v998_v34 }
 0x122   : > { %v561_v1 = vpop.f32.mrf.mxu0  ;;  %v593_v2 = vpop.f32.mrf.mxu1 }
 0x123   : > { %v1056_v3 = vpack.c.bf16 %v670_v61, %v669_v59  ;;  %v1076_v4 = vpack.c.bf16 %v678_v62, %v677_v60  ;;  %v668_v5 = vadd.f32 %v998_v34, %v561_v1  ;;  %v676_v6 = vadd.f32 %v998_v34, %v593_v2  ;;  %765 = sbr.rel (!%p1396_p9) target bundleno = 306 (0x132), region = 85 }
 0x124   : > { %v791_v11 = vld [vmem:[%s1460_s12 + $0x8] sm:$0xf] (%p1396_p9)  ;;  %v793_v12 = vld [vmem:[%s1460_s12 + $0xc] sm:$0xf] (%p1396_p9) }
 0x125   : > { %1080 = vst [vmem:[%s1460_s12 + $0x18] sm:$0xff] %v1056_v3   ;;  %1084 = vst [vmem:[%s1460_s12 + $0x38] sm:$0xff] %v1076_v4   ;;  %v1051_v7 = vpack.c.bf16 %v668_v5, %v667_v63  ;;  %v1071_v8 = vpack.c.bf16 %v676_v6, %v675_v0  ;;  %v807_v19 = vld [vmem:[%s1460_s12 + $0x28] sm:$0xf] (%p1396_p9)  ;;  %v809_v20 = vld [vmem:[%s1460_s12 + $0x2c] sm:$0xf] (%p1396_p9) }
 0x126   : > { %v787_v9 = vld [vmem:[%s1460_s12] sm:$0xf] (%p1396_p9)  ;;  %v789_v10 = vld [vmem:[%s1460_s12 + $0x4] sm:$0xf] (%p1396_p9)  ;;  %792 = vst [vmem:[%s770_s28 + $0x40] sm:$0xf] (%p1396_p9), %v791_v11 }
 0x127   : > { %1079 = vst [vmem:[%s1460_s12 + $0x10] sm:$0xff] %v1051_v7   ;;  %1083 = vst [vmem:[%s1460_s12 + $0x30] sm:$0xff] %v1071_v8   ;;  %v803_v17 = vld [vmem:[%s1460_s12 + $0x20] sm:$0xf] (%p1396_p9)  ;;  %v805_v18 = vld [vmem:[%s1460_s12 + $0x24] sm:$0xf] (%p1396_p9) }
 0x128   : > { %788 = vst [vmem:[%s770_s28] sm:$0xf] %v787_v9  ;;  %790 = vst [vmem:[%s770_s28 + $0x20] sm:$0xf] %v789_v10 }
 0x129   : > { %794 = vst [vmem:[%s770_s28 + $0x60] sm:$0xf] %v793_v12  ;;  %804 = vst [vmem:[%s770_s28 + $0x100] sm:$0xf] %v803_v17 }
 0x12a   : > { %806 = vst [vmem:[%s770_s28 + $0x120] sm:$0xf] %v805_v18  ;;  %808 = vst [vmem:[%s770_s28 + $0x140] sm:$0xf] %v807_v19 }
 0x12b   : > { %810 = vst [vmem:[%s770_s28 + $0x160] sm:$0xf] %v809_v20 }
 0x12c   : > { %v799_v15 = vld [vmem:[%s1460_s12 + $0x18] sm:$0xf]  ;;  %v801_v16 = vld [vmem:[%s1460_s12 + $0x1c] sm:$0xf] }
 0x12d   : > { %800 = vst [vmem:[%s770_s28 + $0xc0] sm:$0xf] %v799_v15  ;;  %802 = vst [vmem:[%s770_s28 + $0xe0] sm:$0xf] %v801_v16  ;;  %v815_v23 = vld [vmem:[%s1460_s12 + $0x38] sm:$0xf] }
 0x12e   : > { %v795_v13 = vld [vmem:[%s1460_s12 + $0x10] sm:$0xf]  ;;  %v797_v14 = vld [vmem:[%s1460_s12 + $0x14] sm:$0xf]  ;;  %v817_v24 = vld [vmem:[%s1460_s12 + $0x3c] sm:$0xf] }
 0x12f   : > { %796 = vst [vmem:[%s770_s28 + $0x80] sm:$0xf] %v795_v13  ;;  %798 = vst [vmem:[%s770_s28 + $0xa0] sm:$0xf] %v797_v14  ;;  %v811_v21 = vld [vmem:[%s1460_s12 + $0x30] sm:$0xf] }
 0x130   : > { %812 = vst [vmem:[%s770_s28 + $0x180] sm:$0xf] %v811_v21  ;;  %v813_v22 = vld [vmem:[%s1460_s12 + $0x34] sm:$0xf]  ;;  %816 = vst [vmem:[%s770_s28 + $0x1c0] sm:$0xf] %v815_v23 }
 0x131   : > { %814 = vst [vmem:[%s770_s28 + $0x1a0] sm:$0xf] %v813_v22  ;;  %818 = vst [vmem:[%s770_s28 + $0x1e0] sm:$0xf] %v817_v24 }
 0x132 PF: > { %s13_s20 = sadd.s32 1, %s1307_s20   ;;  %s1525_s12 = smov %s1279_s13 }
 0x133   : > { %p10_p2 = scmp.ge.s32.totalorder %s13_s20, 18   ;;  %s1526_s13 = smov %s1401_s4 }
 0x134   : > { %s1527_s14 = smov %s1287_s15  ;;  %s1528_s15 = smov %s1390_s27 }
 0x135   : > { %s1529_s16 = smov %s1299_s18  ;;  %s1530_s17 = smov %s1303_s19 }
 0x136   : > { %s1531_s18 = smov %s1534_s22  ;;  %s1532_s19 = smov %s1538_s23 }
 0x137   :  { %12 = sbr.rel (!%p10_p2) target bundleno = 5 (0x5), region = 163 }

// kernel: _lambda_.24
= control target key start
LH: loop header
LB: loop body
LE: loop exit
PB: predicated region body
PF: predicated region fallthrough
CT: control target
= control target key end

     0   :  { %s1437_s15 = smov 0   ;;  %s1439_s16 = smov 0   ;;  %s1815_s0 = inlined_call_operand.vmem [shape: f32[2,128,1], index: 0, kind: input, shape index: {}]   ;;  %s1816_s1 = inlined_call_operand.vmem [shape: f32[2,1,128], index: 1, kind: input, shape index: {}]   ;;  %s1817_s2 = inlined_call_operand.vmem [shape: bf16[2,2,128,64], index: 2, kind: input, shape index: {}]   ;;  %s1818_s3 = inlined_call_operand.vmem [shape: bf16[2,2,128,64], index: 3, kind: input, shape index: {}]   ;;  %s1819_s4 = inlined_call_operand.vmem [shape: f32[2,2,128,128], index: 4, kind: output, shape index: {}]  }
   0x1   :  { %s1441_s17 = smov 0   ;;  %s1443_s18 = smov 0  }
   0x2   :  { %s1445_s19 = smov 0  }
   0x3 LB: > { %s36_s20 = sadd.s32 1, %s1400_s17  ;;  %s40_s21 = sadd.s32 1, %s1404_s18  ;;  %s1408_s19 = sphi %s1445_s19, %s14_s19   ;;  %s1404_s18 = sphi %s1443_s18, %s1827_s18   ;;  %s1400_s17 = sphi %s1441_s17, %s1826_s17   ;;  %s1396_s16 = sphi %s1439_s16, %s1825_s16   ;;  %s1392_s15 = sphi %s1437_s15, %s1824_s15  }
   0x4   : > { %p38_p0 = scmp.ge.s32.totalorder %s36_s20, 2  ;;  %p1174_p1 = scmp.ge.s32.totalorder %s1408_s19, 1 }
   0x5   : > { %p260_p2 = scmp.lt.s32.totalorder %s1408_s19, 5 }
   0x6   : > { %s1829_s20 = smov (%p38_p0, %s36_s20), 0  ;;  %s1831_s21 = smov (!%p38_p0, %s40_s21), %s1404_s18 }
   0x7   : > { %p261_p3 = pnand %p1174_p1, %p260_p2  ;;  %p42_p4 = scmp.ge.s32.totalorder %s1831_s21, 2 }
   0x9   : > { %s1833_s21 = smov (%p42_p4, %s1831_s21), 0  ;;  %264 = sbr.rel (%p261_p3) target bundleno = 304 (0x130), region = 36 }
   0xe   : > { %p334_p5 = scmp.lt.s32.totalorder %s1396_s16, 1  ;;  %p352_p6 = scmp.lt.s32.totalorder %s1392_s15, 1  ;;  %v1410_v0 = vmov 0   ;;  %vm507_vm0 = vcmask 523264   ;;  %v852_v46 = vlaneseq }
   0xf   : > { %1353 = vset.pattern.permute.xlu1 %v1410_v0  ;;  %1352 = vset.pattern.permute.xlu0 %v1410_v0 }
  0x10   : > { %s1835_s16 = smov (!%p334_p5, %s1396_s16), 1  ;;  %s1837_s15 = smov (!%p352_p6, %s1392_s15), 1  ;;  %v1559_v49 = vshrl.u32 %v852_v46, 7  ;;  %v1568_v55 = vand.u32 127, %v852_v46 }
  0x11   : > { %s1178_s22 = sshll.u32 %s1835_s16, 5  ;;  %s1229_s23 = sshll.u32 %s1835_s16, 7 }
  0x12   : > { %s1177_s24 = sshll.u32 %s1837_s15, 4  ;;  %s1474_s27 = scalar_lea.vmem %s1815_s0, %s1229_s23  ;;  %v855_v54 = vadd.s32 16, %v1559_v49  ;;  %v863_v58 = vadd.s32 80, %v1559_v49  ;;  %v861_v62 = vadd.s32 64, %v1559_v49  ;;  %vm892_vm3 = vcmp.gt.s32.totalorder %v1559_v49, %v1568_v55 }
  0x13   : > { %s1476_s28 = sadd.s32 %s1178_s22, %s1177_s24  ;;  %v671_v1 = vld [vmem:[%s1474_s27 + $0x10] sm:$0xff]  ;;  %v669_v2 = vld [vmem:[%s1474_s27] sm:$0xff]  ;;  %v672_v4 = vld [vmem:[%s1474_s27 + $0x18] sm:$0xff]  ;;  %s348_s12 = scalar_lea.vmem %s1816_s1, %s1835_s16 }
  0x14   : > { %s1179_s29 = sshll.u32 %s1476_s28, 2  ;;  %698 = vperm.xlu1 %1353, %v671_v1   ;;  %688 = vperm.xlu0 %1352, %v669_v2   ;;  %v670_v7 = vld [vmem:[%s1474_s27 + $0x8] sm:$0xff]  ;;  %v673_v9 = vld [vmem:[%s1474_s27 + $0x20] sm:$0xff]  ;;  %v676_v14 = vld [vmem:[%s1474_s27 + $0x38] sm:$0xff]  ;;  %vm894_vm1 = vcmp.gt.s32.totalorder %v855_v54, %v1568_v55  ;;  %vm902_vm2 = vcmp.gt.s32.totalorder %v863_v58, %v1568_v55  ;;  %vm900_vm4 = vcmp.gt.s32.totalorder %v861_v62, %v1568_v55  ;;  %s1185_s13 = sshll.u32 %s1476_s28, 3 }
  0x15   : > { %s1484_s6 = scalar_lea.vmem %s1818_s3, %s1179_s29  ;;  %s1498_s9 = scalar_lea.vmem %s1817_s2, %s1179_s29  ;;  %v674_v8 = vld [vmem:[%s1474_s27 + $0x28] sm:$0xff]  ;;  %v675_v15 = vld [vmem:[%s1474_s27 + $0x30] sm:$0xff]  ;;  %v677_v19 = vld [vmem:[%s1474_s27 + $0x40] sm:$0xff] }
  0x16   : > { %v1354_v3 = vld [vmem:[%s1484_s6 + $0x38] sm:$0xff]   ;;  %v1355_v5 = vld [vmem:[%s1484_s6 + $0x30] sm:$0xff]   ;;  %v1356_v10 = vld [vmem:[%s1484_s6 + $0x28] sm:$0xff]   ;;  %s1739_s16 = scalar_lea.vmem %s1819_s4, %s1185_s13 }
  0x17   : > { %1294 = vmatprep.subr.msk.bf16.mxu0 %vm507_vm0, %v1354_v3  ;;  %1295 = vmatprep.subr.msk.bf16.mxu1 %vm507_vm0, %v1354_v3  ;;  %v554_v6 = vsel %vm507_vm0, %v1354_v3, 0  ;;  %v551_v11 = vsel %vm507_vm0, %v1355_v5, 0  ;;  %v1362_v12 = vld [vmem:[%s1498_s9] sm:$0xff]   ;;  %v678_v16 = vld [vmem:[%s1474_s27 + $0x48] sm:$0xff]  ;;  %v548_v17 = vsel %vm507_vm0, %v1356_v10, 0  ;;  %v680_v20 = vld [vmem:[%s1474_s27 + $0x58] sm:$0xff] }
  0x18   : > { %1247 = vmatpush3.bf16.xpose.msra.mxu0 %v554_v6  ;;  %1286 = vmatpush3.bf16.xpose.msra.mxu1 %v554_v6  ;;  %v1363_v13 = vld [vmem:[%s1498_s9 + $0x20] sm:$0xff]   ;;  %v679_v21 = vld [vmem:[%s1474_s27 + $0x50] sm:$0xff]  ;;  %v682_v22 = vld [vmem:[%s1474_s27 + $0x68] sm:$0xff]  ;;  %v1411_v6 = vmov 0.0  }
  0x19   : > { %1296 = vmatprep.subr.msk.bf16.mxu0 %vm507_vm0, %v1355_v5  ;;  %1297 = vmatprep.subr.msk.bf16.mxu1 %vm507_vm0, %v1355_v5  ;;  %v1357_v18 = vld [vmem:[%s1484_s6 + $0x20] sm:$0xff]   ;;  %v1358_v25 = vld [vmem:[%s1484_s6 + $0x18] sm:$0xff]   ;;  %v683_v27 = vld [vmem:[%s1474_s27 + $0x70] sm:$0xff] }
  0x1a   : > { %703 = vperm.xlu1 %1353, %v672_v4   ;;  %693 = vperm.xlu0 %1352, %v670_v7   ;;  %v681_v23 = vld [vmem:[%s1474_s27 + $0x60] sm:$0xff]  ;;  %v545_v24 = vsel %vm507_vm0, %v1357_v18, 0  ;;  %v684_v26 = vld [vmem:[%s1474_s27 + $0x78] sm:$0xff]  ;;  %v542_v28 = vsel %vm507_vm0, %v1358_v25, 0  ;;  %v1359_v29 = vld [vmem:[%s1484_s6 + $0x10] sm:$0xff]   ;;  %v1213_v7 = vsel %vm894_vm1, 1.0, %v1411_v6 }
  0x1b   : > { %1262 = vmatprep.mubr.msk.bf16.mxu0 %vm507_vm0, %v1362_v12  ;;  %1270 = vmatprep.mubr.msk.bf16.mxu1 %vm507_vm0, %v1363_v13  ;;  %v539_v30 = vsel %vm507_vm0, %v1359_v29, 0  ;;  %v1360_v31 = vld [vmem:[%s1484_s6 + $0x8] sm:$0xff]   ;;  %v1361_v33 = vld [vmem:[%s1484_s6] sm:$0xff]   ;;  %v1366_v37 = vld [vmem:[%s1498_s9 + $0x10] sm:$0xff]   ;;  %v1221_v13 = vsel %vm902_vm2, 1.0, %v1411_v6 }
  0x1c   : > { %v536_v32 = vsel %vm507_vm0, %v1360_v31, 0  ;;  %v533_v34 = vsel %vm507_vm0, %v1361_v33, 0  ;;  %v1364_v35 = vld [vmem:[%s1498_s9 + $0x8] sm:$0xff]   ;;  %v1367_v38 = vld [vmem:[%s1498_s9 + $0x30] sm:$0xff]   ;;  %v1368_v39 = vld [vmem:[%s1498_s9 + $0x18] sm:$0xff]  }
  0x1d   : > { %v1365_v36 = vld [vmem:[%s1498_s9 + $0x28] sm:$0xff]   ;;  %v1369_v40 = vld [vmem:[%s1498_s9 + $0x38] sm:$0xff]   ;;  %v1557_v48 = vld [vmem:[%s348_s12] ss:$0 sm:$0xff] }
  0x1e   : > { %713 = vperm.xlu1 %1353, %v674_v8   ;;  %708 = vperm.xlu0 %1352, %v673_v9   ;;  %v856_v9 = vadd.s32 24, %v1559_v49 }
  0x20   : > { %1249 = vmatpush3.bf16.xpose.msra.mxu0 %v551_v11  ;;  %1287 = vmatpush3.bf16.xpose.msra.mxu1 %v551_v11  ;;  %vm895_vm5 = vcmp.gt.s32.totalorder %v856_v9, %v1568_v55 }
  0x21   : > { %1298 = vmatprep.subr.msk.bf16.mxu0 %vm507_vm0, %v1356_v10  ;;  %1299 = vmatprep.subr.msk.bf16.mxu1 %vm507_vm0, %v1356_v10 }
  0x22   : > { %723 = vperm.xlu1 %1353, %v676_v14   ;;  %718 = vperm.xlu0 %1352, %v675_v15   ;;  %v864_v14 = vadd.s32 88, %v1559_v49 }
  0x24   : > { %vm903_vm6 = vcmp.gt.s32.totalorder %v864_v14, %v1568_v55 }
  0x26   : > { %733 = vperm.xlu1 %1353, %v678_v16   ;;  %728 = vperm.xlu0 %1352, %v677_v19  }
  0x28   : > { %1251 = vmatpush3.bf16.xpose.msra.mxu0 %v548_v17  ;;  %1288 = vmatpush3.bf16.xpose.msra.mxu1 %v548_v17 }
  0x29   : > { %1300 = vmatprep.subr.msk.bf16.mxu0 %vm507_vm0, %v1357_v18  ;;  %1301 = vmatprep.subr.msk.bf16.mxu1 %vm507_vm0, %v1357_v18  ;;  %v1613_v18 = vmul.f32 1e+12, %v1213_v7 }
  0x2a   : > { %743 = vperm.xlu1 %1353, %v680_v20   ;;  %738 = vperm.xlu0 %1352, %v679_v21   ;;  %v1211_v21 = vsel %vm892_vm3, 1.0, %v1411_v6 }
  0x2e   : > { %753 = vperm.xlu1 %1353, %v682_v22   ;;  %748 = vperm.xlu0 %1352, %v681_v23   ;;  %v1219_v22 = vsel %vm900_vm4, 1.0, %v1411_v6  ;;  %v854_v23 = vadd.s32 8, %v1559_v49 }
  0x30   : > { %1253 = vmatpush3.bf16.xpose.msra.mxu0 %v545_v24  ;;  %1289 = vmatpush3.bf16.xpose.msra.mxu1 %v545_v24  ;;  %vm893_vm7 = vcmp.gt.s32.totalorder %v854_v23, %v1568_v55 }
  0x31   : > { %1302 = vmatprep.subr.msk.bf16.mxu0 %vm507_vm0, %v1358_v25  ;;  %1303 = vmatprep.subr.msk.bf16.mxu1 %vm507_vm0, %v1358_v25  ;;  %v1622_v25 = vmul.f32 1e+12, %v1221_v13  ;;  %v1212_v46 = vsel %vm893_vm7, 1.0, %v1411_v6 }
  0x32   : > { %763 = vperm.xlu1 %1353, %v684_v26   ;;  %758 = vperm.xlu0 %1352, %v683_v27   ;;  %v862_v26 = vadd.s32 72, %v1559_v49 }
  0x34   : > { %vm901_vm8 = vcmp.gt.s32.totalorder %v862_v26, %v1568_v55 }
  0x35   : > { %v1220_v58 = vsel %vm901_vm8, 1.0, %v1411_v6 }
  0x36   : > { %v1679_v9 = vmul.f32 1e+12, %v1220_v58 }
  0x38   : > { %1255 = vmatpush3.bf16.xpose.msra.mxu0 %v542_v28  ;;  %1290 = vmatpush3.bf16.xpose.msra.mxu1 %v542_v28 }
  0x39   : > { %1304 = vmatprep.subr.msk.bf16.mxu0 %vm507_vm0, %v1359_v29  ;;  %1305 = vmatprep.subr.msk.bf16.mxu1 %vm507_vm0, %v1359_v29  ;;  %v859_v29 = vadd.s32 48, %v1559_v49 }
  0x3b   : > { %vm898_vm9 = vcmp.gt.s32.totalorder %v859_v29, %v1568_v55  ;;  %v858_v29 = vadd.s32 40, %v1559_v49 }
  0x3d   : > { %vm897_vm15 = vcmp.gt.s32.totalorder %v858_v29, %v1568_v55 }
  0x40   : > { %1257 = vmatpush3.bf16.xpose.msra.mxu0 %v539_v30  ;;  %1291 = vmatpush3.bf16.xpose.msra.mxu1 %v539_v30 }
  0x41   : > { %1306 = vmatprep.subr.msk.bf16.mxu0 %vm507_vm0, %v1360_v31  ;;  %1307 = vmatprep.subr.msk.bf16.mxu1 %vm507_vm0, %v1360_v31  ;;  %v1633_v31 = vmul.f32 1e+12, %v1211_v21 }
  0x48   : > { %1259 = vmatpush3.bf16.xpose.msra.mxu0 %v536_v32  ;;  %1292 = vmatpush3.bf16.xpose.msra.mxu1 %v536_v32  ;;  %v1635_v32 = vmul.f32 1e+12, %v1219_v22 }
  0x49   : > { %1308 = vmatprep.subr.msk.bf16.mxu0 %vm507_vm0, %v1361_v33  ;;  %1309 = vmatprep.subr.msk.bf16.mxu1 %vm507_vm0, %v1361_v33 }
  0x50   : > { %1261 = vmatpush3.bf16.xpose.msra.mxu0 %v533_v34  ;;  %1293 = vmatpush3.bf16.xpose.msra.mxu1 %v533_v34 }
  0x57   : > { %1263 = vmatmul.mubr.msk.bf16.vlgmr.msra.gmra.mxu0 %vm507_vm0, %v1364_v35  ;;  %1271 = vmatmul.mubr.msk.bf16.vlgmr.msra.gmra.mxu1 %vm507_vm0, %v1365_v36  ;;  %v1214_v36 = vsel %vm895_vm5, 1.0, %v1411_v6 }
  0x58   : > { %1266 = vmatprep.mubr.msk.bf16.mxu0 %vm507_vm0, %v1366_v37  ;;  %1274 = vmatprep.mubr.msk.bf16.mxu1 %vm507_vm0, %v1367_v38  ;;  %v1222_v38 = vsel %vm903_vm6, 1.0, %v1411_v6 }
  0x59   : > { %v1663_v54 = vmul.f32 1e+12, %v1222_v38 }
  0x5f   : > { %1267 = vmatmul.mubr.msk.bf16.gmra.mxu0 %vm507_vm0, %v1368_v39  ;;  %1275 = vmatmul.mubr.msk.bf16.gmra.mxu1 %vm507_vm0, %v1369_v40  ;;  %v867_v39 = vadd.s32 112, %v1559_v49 }
  0x61   : > { %vm906_vm10 = vcmp.gt.s32.totalorder %v867_v39, %v1568_v55 }
  0x62   : > { %v1225_v14 = vsel %vm906_vm10, 1.0, %v1411_v6 }
  0x8f   : > { %v699_v41 = vpop.permute.xlu1 %698  ;;  %v689_v42 = vpop.permute.xlu0 %688 }
  0x90   : > { %v1562_v51 = vmul.f32 %v1557_v48, %v699_v41  ;;  %v1565_v52 = vmul.f32 %v1557_v48, %v689_v42 }
  0x92   : > { %v806_v59 = vsub.f32 1.0, %v1562_v51  ;;  %v804_v60 = vsub.f32 1.0, %v1565_v52 }
  0x94   : > { %v1590_v4 = vmul.f32 1e+12, %v806_v59  ;;  %v1592_v5 = vmul.f32 1e+12, %v804_v60  ;;  %v1217_v60 = vsel %vm898_vm9, 1.0, %v1411_v6 }
  0x95   : > { %v704_v43 = vpop.permute.xlu1 %703  ;;  %v694_v44 = vpop.permute.xlu0 %693  ;;  %v1685_v13 = vmul.f32 1e+12, %v1217_v60 }
  0x96   : > { %v1571_v56 = vmul.f32 %v1557_v48, %v704_v43  ;;  %v1574_v57 = vmul.f32 %v1557_v48, %v694_v44  ;;  %v857_v43 = vadd.s32 32, %v1559_v49 }
  0x98   : > { %v807_v2 = vsub.f32 1.0, %v1571_v56  ;;  %v805_v3 = vsub.f32 1.0, %v1574_v57  ;;  %vm896_vm11 = vcmp.gt.s32.totalorder %v857_v43, %v1568_v55 }
  0x99   : > { %v714_v45 = vpop.permute.xlu1 %713  ;;  %v709_v47 = vpop.permute.xlu0 %708  ;;  %v1215_v22 = vsel %vm896_vm11, 1.0, %v1411_v6 }
  0x9a   : > { %v1582_v63 = vmul.f32 %v1557_v48, %v714_v45  ;;  %v1585_v0 = vmul.f32 %v1557_v48, %v709_v47  ;;  %v1606_v15 = vmul.f32 1e+12, %v807_v2  ;;  %v1608_v16 = vmul.f32 1e+12, %v805_v3 }
  0x9b   : > { %v1656_v45 = vmul.f32 1e+12, %v1214_v36  ;;  %v865_v47 = vadd.s32 96, %v1559_v49  ;;  %v1673_v3 = vmul.f32 1e+12, %v1212_v46 }
  0x9c   : > { %v809_v10 = vsub.f32 1.0, %v1582_v63  ;;  %v808_v11 = vsub.f32 1.0, %v1585_v0  ;;  %v1704_v36 = vmul.f32 1e+12, %v1225_v14  ;;  %v1706_v38 = vmul.f32 1e+12, %v1215_v22 }
  0x9d   : > { %v724_v50 = vpop.permute.xlu1 %723  ;;  %v719_v53 = vpop.permute.xlu0 %718  ;;  %vm904_vm12 = vcmp.gt.s32.totalorder %v865_v47, %v1568_v55 }
  0x9e   : > { %v1596_v8 = vmul.f32 %v1557_v48, %v724_v50  ;;  %v1611_v17 = vmul.f32 %v1557_v48, %v719_v53  ;;  %v1626_v27 = vmul.f32 1e+12, %v809_v10  ;;  %v1628_v28 = vmul.f32 1e+12, %v808_v11 }
  0x9f   : > { %v868_v10 = vadd.s32 120, %v1559_v49  ;;  %v1223_v26 = vsel %vm904_vm12, 1.0, %v1411_v6 }
  0xa0   : > { %v811_v24 = vsub.f32 1.0, %v1596_v8  ;;  %1820 = vst [vmem:[#allocation2_spill] sm:$0xff] %v1626_v27  ;;  %v810_v30 = vsub.f32 1.0, %v1611_v17 }
  0xa1   : > { %v734_v61 = vpop.permute.xlu1 %733  ;;  %v729_v1 = vpop.permute.xlu0 %728  ;;  %vm907_vm14 = vcmp.gt.s32.totalorder %v868_v10, %v1568_v55 }
  0xa2   : > { %v1616_v19 = vmul.f32 %v1557_v48, %v734_v61  ;;  %v1639_v34 = vmul.f32 %v1557_v48, %v729_v1  ;;  %v1643_v37 = vmul.f32 1e+12, %v811_v24  ;;  %v1654_v44 = vmul.f32 1e+12, %v810_v30 }
  0xa3   : > { %v860_v61 = vadd.s32 56, %v1559_v49  ;;  %v1226_v60 = vsel %vm907_vm14, 1.0, %v1411_v6 }
  0xa4   : > { %v813_v33 = vsub.f32 1.0, %v1616_v19  ;;  %v812_v53 = vsub.f32 1.0, %v1639_v34 }
  0xa5   : > { %v744_v12 = vpop.permute.xlu1 %743  ;;  %v739_v20 = vpop.permute.xlu0 %738  ;;  %vm899_vm13 = vcmp.gt.s32.totalorder %v860_v61, %v1568_v55 }
  0xa6   : > { %v1649_v40 = vmul.f32 %v1557_v48, %v744_v12  ;;  %v782_v41 = vmul.f32 %v1557_v48, %v739_v20  ;;  %v1660_v50 = vmul.f32 1e+12, %v813_v33  ;;  %v1683_v11 = vmul.f32 1e+12, %v812_v53 }
  0xa7   : > { %v1218_v39 = vsel %vm899_vm13, 1.0, %v1411_v6  ;;  %v1712_v53 = vmul.f32 1e+12, %v1223_v26 }
  0xa8   : > { %v815_v62 = vsub.f32 1.0, %v1649_v40  ;;  %v814_v1 = vsub.f32 1.0, %v782_v41 }
  0xa9   : > { %v754_v35 = vpop.permute.xlu1 %753  ;;  %v749_v42 = vpop.permute.xlu0 %748 }
  0xaa   : > { %v1667_v59 = vmul.f32 %v1557_v48, %v754_v35  ;;  %v1677_v7 = vmul.f32 %v1557_v48, %v749_v42  ;;  %v1694_v23 = vmul.f32 1e+12, %v815_v62  ;;  %v830_v24 = vmul.f32 1e+12, %v814_v1 }
  0xab   : > { %v866_v35 = vadd.s32 104, %v1559_v49 }
  0xac   : > { %v817_v20 = vsub.f32 1.0, %v1667_v59  ;;  %v816_v30 = vsub.f32 1.0, %v1677_v7 }
  0xad   : > { %v764_v2 = vpop.permute.xlu1 %763  ;;  %v759_v12 = vpop.permute.xlu0 %758  ;;  %vm905_vm0 = vcmp.gt.s32.totalorder %v866_v35, %v1568_v55 }
  0xae   : > { %v1690_v21 = vmul.f32 %v1557_v48, %v764_v2  ;;  %v1700_v33 = vmul.f32 %v1557_v48, %v759_v12  ;;  %v1709_v42 = vmul.f32 1e+12, %v817_v20  ;;  %v1716_v49 = vmul.f32 1e+12, %v816_v30 }
  0xaf   : > { %v1719_v2 = vmul.f32 1e+12, %v1218_v39  ;;  %v1726_v30 = vmul.f32 1e+12, %v1226_v60 }
  0xb0   : > { %1821 = vst [vmem:[#allocation3_spill] sm:$0xff] %v1709_v42  ;;  %v819_v43 = vsub.f32 1.0, %v1690_v21  ;;  %v818_v61 = vsub.f32 1.0, %v1700_v33 }
  0xb2   : > { %v1724_v22 = vmul.f32 1e+12, %v819_v43 }
 0x117   : > { %v1264_v46 = vpop.f32.mrf.mxu0  ;;  %v1272_v47 = vpop.f32.mrf.mxu1 }
 0x118   : > { %v655_v48 = vmul.f32 0.125, %v1264_v46  ;;  %v663_v58 = vmul.f32 0.125, %v1272_v47  ;;  %v1731_v47 = vsel %vm897_vm15, 1.0, %v1411_v6 }
 0x119   : > { %v590_v62 = vpop.f32.mrf.mxu0  ;;  %v622_v1 = vpop.f32.mrf.mxu1 }
 0x11a   : > { %v790_v10 = vmul.f32 %v1562_v51, %v655_v48  ;;  %v798_v12 = vmul.f32 %v782_v41, %v663_v58  ;;  %v653_v14 = vmul.f32 0.125, %v590_v62  ;;  %v661_v20 = vmul.f32 0.125, %v622_v1 }
 0x11b   : > { %v1265_v26 = vpop.f32.mrf.mxu0  ;;  %v1273_v46 = vpop.f32.mrf.mxu1  ;;  %v834_v41 = vmul.f32 1e+12, %v818_v61 }
 0x11c   : > { %v838_v39 = vsub.f32 %v790_v10, %v1590_v4  ;;  %v846_v42 = vsub.f32 %v798_v12, %v830_v24  ;;  %v788_v27 = vmul.f32 %v1565_v52, %v653_v14  ;;  %v796_v51 = vmul.f32 %v1639_v34, %v661_v20 }
 0x11d   : > { %v656_v43 = vmul.f32 0.125, %v1265_v26  ;;  %v664_v48 = vmul.f32 0.125, %v1273_v46  ;;  %v593_v29 = vpop.f32.mrf.mxu0  ;;  %v625_v58 = vpop.f32.mrf.mxu1  ;;  %v1224_v4 = vsel %vm905_vm0, 1.0, %v1411_v6 }
 0x11e   : > { %v958_v52 = vsub.f32 %v838_v39, %v1613_v18  ;;  %v966_v34 = vsub.f32 %v846_v42, %v1622_v25  ;;  %v836_v24 = vsub.f32 %v788_v27, %v1592_v5  ;;  %v844_v60 = vsub.f32 %v796_v51, %v1683_v11 }
 0x11f   : > { %v791_v61 = vmul.f32 %v1571_v56, %v656_v43  ;;  %v799_v62 = vmul.f32 %v1649_v40, %v664_v48  ;;  %v654_v1 = vmul.f32 0.125, %v593_v29  ;;  %v662_v10 = vmul.f32 0.125, %v625_v58  ;;  %v1268_v12 = vpop.f32.mrf.mxu0  ;;  %v1276_v14 = vpop.f32.mrf.mxu1 }
 0x120   : > { %974 = vst [vmem:[%s1739_s16 + $0x10] sm:$0xff] %v958_v52  ;;  %982 = vst [vmem:[%s1739_s16 + $0x50] sm:$0xff] %v966_v34  ;;  %v956_v55 = vsub.f32 %v836_v24, %v1633_v31  ;;  %v964_v6 = vsub.f32 %v844_v60, %v1635_v32  ;;  %v659_v18 = vmul.f32 0.125, %v1268_v12  ;;  %v667_v5 = vmul.f32 0.125, %v1276_v14 }
 0x121   : > { %v839_v25 = vsub.f32 %v791_v61, %v1606_v15  ;;  %v847_v56 = vsub.f32 %v799_v62, %v1694_v23  ;;  %v789_v27 = vmul.f32 %v1574_v57, %v654_v1  ;;  %v797_v40 = vmul.f32 %v1616_v19, %v662_v10  ;;  %v606_v11 = vpop.f32.mrf.mxu0  ;;  %v638_v35 = vpop.f32.mrf.mxu1 }
 0x122   : > { %972 = vst [vmem:[%s1739_s16] sm:$0xff] %v956_v55  ;;  %980 = vst [vmem:[%s1739_s16 + $0x40] sm:$0xff] %v964_v6  ;;  %v794_v31 = vmul.f32 %v1611_v17, %v659_v18  ;;  %v802_v32 = vmul.f32 %v1700_v33, %v667_v5  ;;  %v657_v42 = vmul.f32 0.125, %v606_v11  ;;  %v665_v20 = vmul.f32 0.125, %v638_v35 }
 0x123   : > { %v959_v15 = vsub.f32 %v839_v25, %v1656_v45  ;;  %v967_v23 = vsub.f32 %v847_v56, %v1663_v54  ;;  %v837_v57 = vsub.f32 %v789_v27, %v1608_v16  ;;  %v845_v19 = vsub.f32 %v797_v40, %v1660_v50  ;;  %v1269_v26 = vpop.f32.mrf.mxu0  ;;  %v1277_v46 = vpop.f32.mrf.mxu1 }
 0x124   : > { %v842_v39 = vsub.f32 %v794_v31, %v1654_v44  ;;  %v850_v51 = vsub.f32 %v802_v32, %v834_v41  ;;  %v792_v17 = vmul.f32 %v1585_v0, %v657_v42  ;;  %v800_v33 = vmul.f32 %v1677_v7, %v665_v20 }
 0x125   : > { %975 = vst [vmem:[%s1739_s16 + $0x18] sm:$0xff] %v959_v15  ;;  %983 = vst [vmem:[%s1739_s16 + $0x58] sm:$0xff] %v967_v23  ;;  %v957_v45 = vsub.f32 %v837_v57, %v1673_v3  ;;  %v965_v16 = vsub.f32 %v845_v19, %v1679_v9  ;;  %v660_v50 = vmul.f32 0.125, %v1269_v26  ;;  %v668_v54 = vmul.f32 0.125, %v1277_v46  ;;  %v609_v43 = vpop.f32.mrf.mxu0  ;;  %v641_v48 = vpop.f32.mrf.mxu1 }
 0x126   : > { %v962_v44 = vsub.f32 %v842_v39, %v1685_v13  ;;  %v970_v41 = vsub.f32 %v850_v51, %v1704_v36  ;;  %v840_v0 = vsub.f32 %v792_v17, %v1628_v28  ;;  %v848_v7 = vsub.f32 %v800_v33, %v1716_v49 }
 0x127   : > { %973 = vst [vmem:[%s1739_s16 + $0x8] sm:$0xff] %v957_v45  ;;  %981 = vst [vmem:[%s1739_s16 + $0x48] sm:$0xff] %v965_v16  ;;  %v795_v3 = vmul.f32 %v1596_v8, %v660_v50  ;;  %v803_v9 = vmul.f32 %v1690_v21, %v668_v54  ;;  %v658_v29 = vmul.f32 0.125, %v609_v43  ;;  %v666_v58 = vmul.f32 0.125, %v641_v48 }
 0x128   : > { %978 = vst [vmem:[%s1739_s16 + $0x30] sm:$0xff] %v962_v44  ;;  %986 = vst [vmem:[%s1739_s16 + $0x70] sm:$0xff] %v970_v41  ;;  %v960_v13 = vsub.f32 %v840_v0, %v1706_v38  ;;  %v968_v28 = vsub.f32 %v848_v7, %v1712_v53  ;;  %v945_v36 = vmul.f32 1e+12, %v1731_v47  ;;  %v953_v49 = vmul.f32 1e+12, %v1224_v4 }
 0x129   : > { %v843_v52 = vsub.f32 %v795_v3, %v1643_v37  ;;  %v851_v8 = vsub.f32 %v803_v9, %v1724_v22  ;;  %v793_v21 = vmul.f32 %v1582_v63, %v658_v29  ;;  %v801_v34 = vmul.f32 %v1667_v59, %v666_v58  ;;  %v1822_v53 = vld [vmem:[#allocation2_spill] sm:$0xff]  ;;  %v1823_v47 = vld [vmem:[#allocation3_spill] sm:$0xff] }
 0x12a   : > { %976 = vst [vmem:[%s1739_s16 + $0x20] sm:$0xff] %v960_v13  ;;  %984 = vst [vmem:[%s1739_s16 + $0x60] sm:$0xff] %v968_v28 }
 0x12b   : > { %v963_v24 = vsub.f32 %v843_v52, %v1719_v2  ;;  %v971_v38 = vsub.f32 %v851_v8, %v1726_v30  ;;  %v841_v60 = vsub.f32 %v793_v21, %v1822_v53  ;;  %v849_v61 = vsub.f32 %v801_v34, %v1823_v47 }
 0x12d   : > { %979 = vst [vmem:[%s1739_s16 + $0x38] sm:$0xff] %v963_v24  ;;  %987 = vst [vmem:[%s1739_s16 + $0x78] sm:$0xff] %v971_v38  ;;  %v961_v4 = vsub.f32 %v841_v60, %v945_v36  ;;  %v969_v37 = vsub.f32 %v849_v61, %v953_v49 }
 0x12f   : > { %977 = vst [vmem:[%s1739_s16 + $0x28] sm:$0xff] %v961_v4  ;;  %985 = vst [vmem:[%s1739_s16 + $0x68] sm:$0xff] %v969_v37 }
 0x130 PF: > { %s14_s19 = sadd.s32 1, %s1408_s19   ;;  %s1824_s15 = smov %s1400_s17 }
 0x131   : > { %p11_p7 = scmp.ge.s32.totalorder %s14_s19, 6   ;;  %s1825_s16 = smov %s1404_s18 }
 0x132   : > { %s1826_s17 = smov %s1829_s20  ;;  %s1827_s18 = smov %s1833_s21 }
 0x133   :  { %13 = sbr.rel (!%p11_p7) target bundleno = 3 (0x3), region = 75 }

// kernel: _lambda_.25
= control target key start
LH: loop header
LB: loop body
LE: loop exit
PB: predicated region body
PF: predicated region fallthrough
CT: control target
= control target key end

     0   :  { %s1297_s15 = smov 0   ;;  %s1299_s16 = smov 0   ;;  %s1514_s0 = inlined_call_operand.vmem [shape: f32[2,128,1], index: 0, kind: input, shape index: {}]   ;;  %s1515_s1 = inlined_call_operand.vmem [shape: f32[2,1,128], index: 1, kind: input, shape index: {}]   ;;  %s1516_s2 = inlined_call_operand.vmem [shape: bf16[2,6,128,64], index: 2, kind: input, shape index: {}]   ;;  %s1517_s3 = inlined_call_operand.vmem [shape: bf16[2,6,128,64], index: 3, kind: input, shape index: {}]   ;;  %s1518_s4 = inlined_call_operand.vmem [shape: f32[2,6,128,128], index: 4, kind: output, shape index: {}]  }
   0x1   :  { %s1301_s17 = smov 0   ;;  %s1303_s18 = smov 0  }
   0x2   :  { %s1305_s19 = smov 0  }
   0x3 LB: > { %s36_s20 = sadd.s32 1, %s1261_s17  ;;  %s40_s21 = sadd.s32 1, %s1265_s18  ;;  %s1269_s19 = sphi %s1305_s19, %s14_s19   ;;  %s1265_s18 = sphi %s1303_s18, %s1522_s18   ;;  %s1261_s17 = sphi %s1301_s17, %s1521_s17   ;;  %s1257_s16 = sphi %s1299_s16, %s1520_s16   ;;  %s1253_s15 = sphi %s1297_s15, %s1519_s15  }
   0x4   : > { %p38_p0 = scmp.ge.s32.totalorder %s36_s20, 6  ;;  %p1054_p1 = scmp.ge.s32.totalorder %s1269_s19, 1 }
   0x5   : > { %p260_p2 = scmp.lt.s32.totalorder %s1269_s19, 13 }
   0x6   : > { %s1524_s20 = smov (%p38_p0, %s36_s20), 0  ;;  %s1526_s21 = smov (!%p38_p0, %s40_s21), %s1265_s18 }
   0x7   : > { %p261_p3 = pnand %p1054_p1, %p260_p2  ;;  %p42_p4 = scmp.ge.s32.totalorder %s1526_s21, 2 }
   0x8   : > { %p334_p5 = scmp.lt.s32.totalorder (!%p261_p3), %s1257_s16, 1  ;;  %p352_p6 = scmp.lt.s32.totalorder (!%p261_p3), %s1253_s15, 5 }
   0x9   : > { %s1528_s21 = smov (%p42_p4, %s1526_s21), 0  ;;  %264 = sbr.rel (%p261_p3) target bundleno = 299 (0x12b), region = 36 }
   0xe   : > { %v1271_v0 = vmov 0   ;;  %s1530_s16 = smov (!%p334_p5, %s1257_s16), 1  ;;  %s1532_s15 = smov (!%p352_p6, %s1253_s15), 5  ;;  %vm507_vm0 = vcmask 523264  }
   0xf   : > { %1214 = vset.pattern.permute.xlu1 %v1271_v0  ;;  %1213 = vset.pattern.permute.xlu0 %v1271_v0  ;;  %s1171_s22 = smul.u32 96, %s1530_s16  ;;  %s1090_s23 = sshll.u32 %s1530_s16, 7 }
  0x10   : > { %s1057_s24 = sshll.u32 %s1532_s15, 4  ;;  %s1334_s27 = scalar_lea.vmem %s1514_s0, %s1090_s23 }
  0x11   : > { %s1336_s28 = sadd.s32 %s1171_s22, %s1057_s24  ;;  %v671_v1 = vld [vmem:[%s1334_s27 + $0x10] sm:$0xff]  ;;  %v669_v2 = vld [vmem:[%s1334_s27] sm:$0xff]  ;;  %v672_v4 = vld [vmem:[%s1334_s27 + $0x18] sm:$0xff]  ;;  %s348_s12 = scalar_lea.vmem %s1515_s1, %s1530_s16 }
  0x12   : > { %s1058_s29 = sshll.u32 %s1336_s28, 2  ;;  %698 = vperm.xlu1 %1214, %v671_v1   ;;  %688 = vperm.xlu0 %1213, %v669_v2   ;;  %v670_v7 = vld [vmem:[%s1334_s27 + $0x8] sm:$0xff]  ;;  %v673_v9 = vld [vmem:[%s1334_s27 + $0x20] sm:$0xff]  ;;  %v676_v14 = vld [vmem:[%s1334_s27 + $0x38] sm:$0xff]  ;;  %s1062_s13 = sshll.u32 %s1336_s28, 3 }
  0x13   : > { %s1344_s6 = scalar_lea.vmem %s1517_s3, %s1058_s29  ;;  %s1358_s9 = scalar_lea.vmem %s1516_s2, %s1058_s29  ;;  %v674_v8 = vld [vmem:[%s1334_s27 + $0x28] sm:$0xff]  ;;  %v675_v15 = vld [vmem:[%s1334_s27 + $0x30] sm:$0xff]  ;;  %v677_v19 = vld [vmem:[%s1334_s27 + $0x40] sm:$0xff] }
  0x14   : > { %v1215_v3 = vld [vmem:[%s1344_s6 + $0x38] sm:$0xff]   ;;  %v1216_v5 = vld [vmem:[%s1344_s6 + $0x30] sm:$0xff]   ;;  %v1217_v10 = vld [vmem:[%s1344_s6 + $0x28] sm:$0xff]   ;;  %s1466_s16 = scalar_lea.vmem %s1518_s4, %s1062_s13 }
  0x15   : > { %1155 = vmatprep.subr.msk.bf16.mxu0 %vm507_vm0, %v1215_v3  ;;  %1156 = vmatprep.subr.msk.bf16.mxu1 %vm507_vm0, %v1215_v3  ;;  %v554_v6 = vsel %vm507_vm0, %v1215_v3, 0  ;;  %v551_v11 = vsel %vm507_vm0, %v1216_v5, 0  ;;  %v1223_v12 = vld [vmem:[%s1358_s9] sm:$0xff]   ;;  %v678_v16 = vld [vmem:[%s1334_s27 + $0x48] sm:$0xff]  ;;  %v548_v17 = vsel %vm507_vm0, %v1217_v10, 0  ;;  %v680_v20 = vld [vmem:[%s1334_s27 + $0x58] sm:$0xff] }
  0x16   : > { %1108 = vmatpush3.bf16.xpose.msra.mxu0 %v554_v6  ;;  %1147 = vmatpush3.bf16.xpose.msra.mxu1 %v554_v6  ;;  %v1224_v13 = vld [vmem:[%s1358_s9 + $0x20] sm:$0xff]   ;;  %v679_v21 = vld [vmem:[%s1334_s27 + $0x50] sm:$0xff]  ;;  %v682_v22 = vld [vmem:[%s1334_s27 + $0x68] sm:$0xff] }
  0x17   : > { %1157 = vmatprep.subr.msk.bf16.mxu0 %vm507_vm0, %v1216_v5  ;;  %1158 = vmatprep.subr.msk.bf16.mxu1 %vm507_vm0, %v1216_v5  ;;  %v1218_v18 = vld [vmem:[%s1344_s6 + $0x20] sm:$0xff]   ;;  %v1219_v25 = vld [vmem:[%s1344_s6 + $0x18] sm:$0xff]   ;;  %v683_v27 = vld [vmem:[%s1334_s27 + $0x70] sm:$0xff] }
  0x18   : > { %703 = vperm.xlu1 %1214, %v672_v4   ;;  %693 = vperm.xlu0 %1213, %v670_v7   ;;  %v681_v23 = vld [vmem:[%s1334_s27 + $0x60] sm:$0xff]  ;;  %v545_v24 = vsel %vm507_vm0, %v1218_v18, 0  ;;  %v684_v26 = vld [vmem:[%s1334_s27 + $0x78] sm:$0xff]  ;;  %v542_v28 = vsel %vm507_vm0, %v1219_v25, 0  ;;  %v1220_v29 = vld [vmem:[%s1344_s6 + $0x10] sm:$0xff]  }
  0x19   : > { %1123 = vmatprep.mubr.msk.bf16.mxu0 %vm507_vm0, %v1223_v12  ;;  %1131 = vmatprep.mubr.msk.bf16.mxu1 %vm507_vm0, %v1224_v13  ;;  %v539_v30 = vsel %vm507_vm0, %v1220_v29, 0  ;;  %v1221_v31 = vld [vmem:[%s1344_s6 + $0x8] sm:$0xff]   ;;  %v1222_v33 = vld [vmem:[%s1344_s6] sm:$0xff]   ;;  %v1227_v37 = vld [vmem:[%s1358_s9 + $0x10] sm:$0xff]  }
  0x1a   : > { %v536_v32 = vsel %vm507_vm0, %v1221_v31, 0  ;;  %v533_v34 = vsel %vm507_vm0, %v1222_v33, 0  ;;  %v1225_v35 = vld [vmem:[%s1358_s9 + $0x8] sm:$0xff]   ;;  %v1228_v38 = vld [vmem:[%s1358_s9 + $0x30] sm:$0xff]   ;;  %v1229_v39 = vld [vmem:[%s1358_s9 + $0x18] sm:$0xff]  }
  0x1b   : > { %v1226_v36 = vld [vmem:[%s1358_s9 + $0x28] sm:$0xff]   ;;  %v1230_v40 = vld [vmem:[%s1358_s9 + $0x38] sm:$0xff]   ;;  %v1417_v52 = vld [vmem:[%s348_s12] ss:$0 sm:$0xff] }
  0x1c   : > { %713 = vperm.xlu1 %1214, %v674_v8   ;;  %708 = vperm.xlu0 %1213, %v673_v9  }
  0x1e   : > { %1110 = vmatpush3.bf16.xpose.msra.mxu0 %v551_v11  ;;  %1148 = vmatpush3.bf16.xpose.msra.mxu1 %v551_v11 }
  0x1f   : > { %1159 = vmatprep.subr.msk.bf16.mxu0 %vm507_vm0, %v1217_v10  ;;  %1160 = vmatprep.subr.msk.bf16.mxu1 %vm507_vm0, %v1217_v10 }
  0x20   : > { %723 = vperm.xlu1 %1214, %v676_v14   ;;  %718 = vperm.xlu0 %1213, %v675_v15  }
  0x24   : > { %733 = vperm.xlu1 %1214, %v678_v16   ;;  %728 = vperm.xlu0 %1213, %v677_v19  }
  0x26   : > { %1112 = vmatpush3.bf16.xpose.msra.mxu0 %v548_v17  ;;  %1149 = vmatpush3.bf16.xpose.msra.mxu1 %v548_v17 }
  0x27   : > { %1161 = vmatprep.subr.msk.bf16.mxu0 %vm507_vm0, %v1218_v18  ;;  %1162 = vmatprep.subr.msk.bf16.mxu1 %vm507_vm0, %v1218_v18 }
  0x28   : > { %743 = vperm.xlu1 %1214, %v680_v20   ;;  %738 = vperm.xlu0 %1213, %v679_v21  }
  0x2c   : > { %753 = vperm.xlu1 %1214, %v682_v22   ;;  %748 = vperm.xlu0 %1213, %v681_v23  }
  0x2e   : > { %1114 = vmatpush3.bf16.xpose.msra.mxu0 %v545_v24  ;;  %1150 = vmatpush3.bf16.xpose.msra.mxu1 %v545_v24 }
  0x2f   : > { %1163 = vmatprep.subr.msk.bf16.mxu0 %vm507_vm0, %v1219_v25  ;;  %1164 = vmatprep.subr.msk.bf16.mxu1 %vm507_vm0, %v1219_v25 }
  0x30   : > { %763 = vperm.xlu1 %1214, %v684_v26   ;;  %758 = vperm.xlu0 %1213, %v683_v27  }
  0x36   : > { %1116 = vmatpush3.bf16.xpose.msra.mxu0 %v542_v28  ;;  %1151 = vmatpush3.bf16.xpose.msra.mxu1 %v542_v28 }
  0x37   : > { %1165 = vmatprep.subr.msk.bf16.mxu0 %vm507_vm0, %v1220_v29  ;;  %1166 = vmatprep.subr.msk.bf16.mxu1 %vm507_vm0, %v1220_v29 }
  0x3e   : > { %1118 = vmatpush3.bf16.xpose.msra.mxu0 %v539_v30  ;;  %1152 = vmatpush3.bf16.xpose.msra.mxu1 %v539_v30 }
  0x3f   : > { %1167 = vmatprep.subr.msk.bf16.mxu0 %vm507_vm0, %v1221_v31  ;;  %1168 = vmatprep.subr.msk.bf16.mxu1 %vm507_vm0, %v1221_v31 }
  0x46   : > { %1120 = vmatpush3.bf16.xpose.msra.mxu0 %v536_v32  ;;  %1153 = vmatpush3.bf16.xpose.msra.mxu1 %v536_v32 }
  0x47   : > { %1169 = vmatprep.subr.msk.bf16.mxu0 %vm507_vm0, %v1222_v33  ;;  %1170 = vmatprep.subr.msk.bf16.mxu1 %vm507_vm0, %v1222_v33 }
  0x4e   : > { %1122 = vmatpush3.bf16.xpose.msra.mxu0 %v533_v34  ;;  %1154 = vmatpush3.bf16.xpose.msra.mxu1 %v533_v34 }
  0x55   : > { %1124 = vmatmul.mubr.msk.bf16.vlgmr.msra.gmra.mxu0 %vm507_vm0, %v1225_v35  ;;  %1132 = vmatmul.mubr.msk.bf16.vlgmr.msra.gmra.mxu1 %vm507_vm0, %v1226_v36 }
  0x56   : > { %1127 = vmatprep.mubr.msk.bf16.mxu0 %vm507_vm0, %v1227_v37  ;;  %1135 = vmatprep.mubr.msk.bf16.mxu1 %vm507_vm0, %v1228_v38 }
  0x5d   : > { %1128 = vmatmul.mubr.msk.bf16.gmra.mxu0 %vm507_vm0, %v1229_v39  ;;  %1136 = vmatmul.mubr.msk.bf16.gmra.mxu1 %vm507_vm0, %v1230_v40 }
  0x8d   : > { %v689_v41 = vpop.permute.xlu0 %688  ;;  %v699_v42 = vpop.permute.xlu1 %698 }
  0x8e   : > { %v774_v53 = vmul.f32 %v1417_v52, %v699_v42  ;;  %v772_v54 = vmul.f32 %v1417_v52, %v689_v41 }
  0x90   : > { %v806_v62 = vsub.f32 1.0, %v774_v53  ;;  %v804_v63 = vsub.f32 1.0, %v772_v54 }
  0x92   : > { %v822_v11 = vmul.f32 1e+12, %v806_v62  ;;  %v820_v12 = vmul.f32 1e+12, %v804_v63 }
  0x93   : > { %v694_v43 = vpop.permute.xlu0 %693  ;;  %v704_v44 = vpop.permute.xlu1 %703 }
  0x94   : > { %v1422_v55 = vmul.f32 %v1417_v52, %v704_v44  ;;  %v1425_v57 = vmul.f32 %v1417_v52, %v694_v43 }
  0x96   : > { %v807_v0 = vsub.f32 1.0, %v1422_v55  ;;  %v805_v1 = vsub.f32 1.0, %v1425_v57 }
  0x97   : > { %v709_v45 = vpop.permute.xlu0 %708  ;;  %v714_v46 = vpop.permute.xlu1 %713 }
  0x98   : > { %v1428_v58 = vmul.f32 %v1417_v52, %v709_v45  ;;  %v1442_v5 = vmul.f32 %v1417_v52, %v714_v46  ;;  %v1449_v13 = vmul.f32 1e+12, %v807_v0  ;;  %v1451_v15 = vmul.f32 1e+12, %v805_v1 }
  0x9a   : > { %v808_v6 = vsub.f32 1.0, %v1428_v58  ;;  %v809_v21 = vsub.f32 1.0, %v1442_v5 }
  0x9b   : > { %v719_v47 = vpop.permute.xlu0 %718  ;;  %v724_v48 = vpop.permute.xlu1 %723 }
  0x9c   : > { %v1431_v60 = vmul.f32 %v1417_v52, %v719_v47  ;;  %v1446_v8 = vmul.f32 %v1417_v52, %v724_v48  ;;  %v1455_v22 = vmul.f32 1e+12, %v808_v6 }
  0x9e   : > { %v810_v9 = vsub.f32 1.0, %v1431_v60  ;;  %v811_v25 = vsub.f32 1.0, %v1446_v8 }
  0x9f   : > { %v729_v49 = vpop.permute.xlu0 %728  ;;  %v734_v50 = vpop.permute.xlu1 %733 }
  0xa0   : > { %v1437_v2 = vmul.f32 %v1417_v52, %v734_v50  ;;  %v780_v3 = vmul.f32 %v1417_v52, %v729_v49  ;;  %v1459_v26 = vmul.f32 1e+12, %v810_v9 }
  0xa2   : > { %v813_v16 = vsub.f32 1.0, %v1437_v2  ;;  %v812_v17 = vsub.f32 1.0, %v780_v3 }
  0xa3   : > { %v739_v51 = vpop.permute.xlu0 %738  ;;  %v744_v56 = vpop.permute.xlu1 %743 }
  0xa4   : > { %v782_v61 = vmul.f32 %v1417_v52, %v739_v51  ;;  %v783_v4 = vmul.f32 %v1417_v52, %v744_v56  ;;  %v829_v36 = vmul.f32 1e+12, %v813_v16  ;;  %v828_v37 = vmul.f32 1e+12, %v812_v17 }
  0xa6   : > { %v814_v10 = vsub.f32 1.0, %v782_v61  ;;  %v815_v18 = vsub.f32 1.0, %v783_v4 }
  0xa7   : > { %v749_v59 = vpop.permute.xlu0 %748  ;;  %v754_v7 = vpop.permute.xlu1 %753 }
  0xa8   : > { %v830_v27 = vmul.f32 1e+12, %v814_v10  ;;  %v831_v38 = vmul.f32 1e+12, %v815_v18  ;;  %v784_v39 = vmul.f32 %v1417_v52, %v749_v59  ;;  %v785_v62 = vmul.f32 %v1417_v52, %v754_v7 }
  0xaa   : > { %v816_v63 = vsub.f32 1.0, %v784_v39 }
  0xab   : > { %v759_v14 = vpop.permute.xlu0 %758  ;;  %v764_v31 = vpop.permute.xlu1 %763 }
  0xac   : > { %v786_v28 = vmul.f32 %v1417_v52, %v759_v14  ;;  %v787_v46 = vmul.f32 %v1417_v52, %v764_v31  ;;  %v832_v31 = vmul.f32 1e+12, %v816_v63 }
  0xae   : > { %v818_v47 = vsub.f32 1.0, %v786_v28 }
  0xb0   : > { %v834_v14 = vmul.f32 1e+12, %v818_v47 }
 0x115   : > { %v1125_v19 = vpop.f32.mrf.mxu0  ;;  %v1133_v20 = vpop.f32.mrf.mxu1 }
 0x116   : > { %v655_v23 = vmul.f32 0.125, %v1125_v19  ;;  %v663_v24 = vmul.f32 0.125, %v1133_v20  ;;  %v827_v19 = vmul.f32 1e+12, %v811_v25 }
 0x117   : > { %v590_v29 = vpop.f32.mrf.mxu0  ;;  %v622_v30 = vpop.f32.mrf.mxu1 }
 0x118   : > { %v790_v32 = vmul.f32 %v774_v53, %v655_v23  ;;  %v798_v33 = vmul.f32 %v782_v61, %v663_v24  ;;  %v653_v34 = vmul.f32 0.125, %v590_v29  ;;  %v661_v35 = vmul.f32 0.125, %v622_v30 }
 0x119   : > { %v1126_v40 = vpop.f32.mrf.mxu0  ;;  %v1134_v41 = vpop.f32.mrf.mxu1 }
 0x11a   : > { %v838_v42 = vsub.f32 %v790_v32, %v822_v11  ;;  %v846_v43 = vsub.f32 %v798_v33, %v830_v27  ;;  %v788_v44 = vmul.f32 %v772_v54, %v653_v34  ;;  %v796_v45 = vmul.f32 %v780_v3, %v661_v35 }
 0x11b   : > { %v656_v48 = vmul.f32 0.125, %v1126_v40  ;;  %v664_v49 = vmul.f32 0.125, %v1134_v41  ;;  %v593_v50 = vpop.f32.mrf.mxu0  ;;  %v625_v51 = vpop.f32.mrf.mxu1 }
 0x11c   : > { %854 = vst [vmem:[%s1466_s16 + $0x10] sm:$0xff] %v838_v42  ;;  %862 = vst [vmem:[%s1466_s16 + $0x50] sm:$0xff] %v846_v43  ;;  %v836_v53 = vsub.f32 %v788_v44, %v820_v12  ;;  %v844_v56 = vsub.f32 %v796_v45, %v828_v37  ;;  %v654_v59 = vmul.f32 0.125, %v593_v50  ;;  %v662_v61 = vmul.f32 0.125, %v625_v51 }
 0x11d   : > { %v791_v54 = vmul.f32 %v1422_v55, %v656_v48  ;;  %v799_v0 = vmul.f32 %v783_v4, %v664_v49  ;;  %v1129_v1 = vpop.f32.mrf.mxu0  ;;  %v1137_v3 = vpop.f32.mrf.mxu1  ;;  %v819_v12 = vsub.f32 1.0, %v787_v46  ;;  %v825_v37 = vmul.f32 1e+12, %v809_v21 }
 0x11e   : > { %852 = vst [vmem:[%s1466_s16] sm:$0xff] %v836_v53  ;;  %860 = vst [vmem:[%s1466_s16 + $0x40] sm:$0xff] %v844_v56  ;;  %v789_v6 = vmul.f32 %v1425_v57, %v654_v59  ;;  %v797_v9 = vmul.f32 %v1437_v2, %v662_v61  ;;  %v659_v10 = vmul.f32 0.125, %v1129_v1  ;;  %v667_v11 = vmul.f32 0.125, %v1137_v3 }
 0x11f   : > { %v839_v52 = vsub.f32 %v791_v54, %v1449_v13  ;;  %v847_v7 = vsub.f32 %v799_v0, %v831_v38  ;;  %v606_v55 = vpop.f32.mrf.mxu0  ;;  %v638_v4 = vpop.f32.mrf.mxu1  ;;  %v817_v2 = vsub.f32 1.0, %v785_v62 }
 0x120   : > { %v837_v16 = vsub.f32 %v789_v6, %v1451_v15  ;;  %v845_v17 = vsub.f32 %v797_v9, %v829_v36  ;;  %v794_v57 = vmul.f32 %v1431_v60, %v659_v10  ;;  %v802_v18 = vmul.f32 %v786_v28, %v667_v11 }
 0x121   : > { %855 = vst [vmem:[%s1466_s16 + $0x18] sm:$0xff] %v839_v52  ;;  %863 = vst [vmem:[%s1466_s16 + $0x58] sm:$0xff] %v847_v7  ;;  %v657_v20 = vmul.f32 0.125, %v606_v55  ;;  %v665_v23 = vmul.f32 0.125, %v638_v4  ;;  %v1130_v13 = vpop.f32.mrf.mxu0  ;;  %v1138_v24 = vpop.f32.mrf.mxu1  ;;  %v835_v60 = vmul.f32 1e+12, %v819_v12 }
 0x122   : > { %853 = vst [vmem:[%s1466_s16 + $0x8] sm:$0xff] %v837_v16  ;;  %861 = vst [vmem:[%s1466_s16 + $0x48] sm:$0xff] %v845_v17  ;;  %v842_v27 = vsub.f32 %v794_v57, %v1459_v26  ;;  %v850_v29 = vsub.f32 %v802_v18, %v834_v14  ;;  %v660_v15 = vmul.f32 0.125, %v1130_v13  ;;  %v668_v30 = vmul.f32 0.125, %v1138_v24 }
 0x123   : > { %v792_v25 = vmul.f32 %v1428_v58, %v657_v20  ;;  %v800_v28 = vmul.f32 %v784_v39, %v665_v23  ;;  %v609_v32 = vpop.f32.mrf.mxu0  ;;  %v641_v33 = vpop.f32.mrf.mxu1  ;;  %v833_v58 = vmul.f32 1e+12, %v817_v2 }
 0x124   : > { %858 = vst [vmem:[%s1466_s16 + $0x30] sm:$0xff] %v842_v27  ;;  %866 = vst [vmem:[%s1466_s16 + $0x70] sm:$0xff] %v850_v29  ;;  %v795_v34 = vmul.f32 %v1446_v8, %v660_v15  ;;  %v803_v35 = vmul.f32 %v787_v46, %v668_v30  ;;  %v658_v26 = vmul.f32 0.125, %v609_v32  ;;  %v666_v36 = vmul.f32 0.125, %v641_v33 }
 0x125   : > { %v840_v38 = vsub.f32 %v792_v25, %v1455_v22  ;;  %v848_v39 = vsub.f32 %v800_v28, %v832_v31 }
 0x126   : > { %v843_v40 = vsub.f32 %v795_v34, %v827_v19  ;;  %v851_v41 = vsub.f32 %v803_v35, %v835_v60  ;;  %v793_v42 = vmul.f32 %v1442_v5, %v658_v26  ;;  %v801_v43 = vmul.f32 %v785_v62, %v666_v36 }
 0x127   : > { %856 = vst [vmem:[%s1466_s16 + $0x20] sm:$0xff] %v840_v38  ;;  %864 = vst [vmem:[%s1466_s16 + $0x60] sm:$0xff] %v848_v39 }
 0x128   : > { %859 = vst [vmem:[%s1466_s16 + $0x38] sm:$0xff] %v843_v40  ;;  %867 = vst [vmem:[%s1466_s16 + $0x78] sm:$0xff] %v851_v41  ;;  %v841_v8 = vsub.f32 %v793_v42, %v825_v37  ;;  %v849_v44 = vsub.f32 %v801_v43, %v833_v58 }
 0x12a   : > { %857 = vst [vmem:[%s1466_s16 + $0x28] sm:$0xff] %v841_v8  ;;  %865 = vst [vmem:[%s1466_s16 + $0x68] sm:$0xff] %v849_v44 }
 0x12b PF: > { %s14_s19 = sadd.s32 1, %s1269_s19   ;;  %s1519_s15 = smov %s1261_s17 }
 0x12c   : > { %p11_p7 = scmp.ge.s32.totalorder %s14_s19, 14   ;;  %s1520_s16 = smov %s1265_s18 }
 0x12d   : > { %s1521_s17 = smov %s1524_s20  ;;  %s1522_s18 = smov %s1528_s21 }
 0x12e   :  { %13 = sbr.rel (!%p11_p7) target bundleno = 3 (0x3), region = 75 }

</bundles_post_ra>
